<compile_context>
chip_gen: v7x
topology: tpu7x:2x2x1
jax: 0.10.0
libtpu: 0.0.40
codegen_flags: <defaults>
</compile_context>

<pallas_src>
import jax
import jax.numpy as jnp
from jax import lax
from jax.experimental import pallas as pl
from jax.experimental.pallas import tpu as pltpu


def _toeplitz_conv_weights(w, W):
    """PyTorch conv weight (Cout, Cin, 3, 3) -> (3, W*Cin, W*Cout) Toeplitz.

    T[ky][(w+kx-1)*Cin + ci, w*Cout + co] = w[co, ci, ky, kx]; entries whose
    input column w+kx-1 falls outside [0, W) are omitted, which implements
    the width zero-padding of the conv."""
    Cout, Cin, KH, KW = w.shape
    wt = jnp.transpose(w, (2, 3, 1, 0)).astype(jnp.float32)      # (ky, kx, ci, co)
    pos = jnp.arange(W)
    mats = []
    for ky in range(KH):
        acc = jnp.zeros((W, Cin, W, Cout), jnp.float32)
        for kx in range(KW):
            sel = (pos[:, None] == pos[None, :] + (kx - 1)).astype(jnp.float32)
            acc = acc + sel[:, None, :, None] * wt[ky, kx][None, :, None, :]
        mats.append(acc.reshape(W * Cin, W * Cout))
    return jnp.stack(mats, axis=0)                               # (3, W*Cin, W*Cout)


def resnet_se_kernel(x_ref, t1_ref, b1_ref, t2_ref, b2_ref,
                     wfc1_ref, wfc2_ref, o_ref, pad_ref):
    # x_ref   : (bb, H+2, W*Cin)    lane-dense input, zero-padded in H only
    # t1_ref  : (3, W*Cin, W*Cout)  conv1 width-Toeplitz weights (per ky)
    # b1_ref  : (1, W*Cout)         conv1 bias, lane-replicated
    # t2_ref  : (3, W*Cout, W*Cout) conv2 width-Toeplitz weights (per ky)
    # b2_ref  : (1, W*Cout)         conv2 bias, lane-replicated
    # wfc1_ref: (W*Cout, Cred)      SE fc1, row-tiled W times, pre-scaled 1/(H*W)
    # wfc2_ref: (Cred, W*Cout)      SE fc2, column-tiled W times
    # o_ref   : (bb, H, W*Cout)     lane-dense output block (written once)
    # pad_ref : (bb, H+2, W*Cout)   VMEM scratch: H-zero-padded conv1 activation
    bb, Hp2, WCin = x_ref.shape
    H = Hp2 - 2
    WCout = o_ref.shape[2]
    mm1 = t1_ref.dtype
    mm2 = t2_ref.dtype

    # ---- conv1: 3 accumulating matmuls over ky row windows (f32 acc) ----
    h1 = jnp.dot(x_ref[:, 0:H, :].reshape(bb * H, WCin).astype(mm1),
                 t1_ref[0], preferred_element_type=jnp.float32)
    h1 = h1 + jnp.dot(x_ref[:, 1:H + 1, :].reshape(bb * H, WCin).astype(mm1),
                      t1_ref[1], preferred_element_type=jnp.float32)
    h1 = h1 + jnp.dot(x_ref[:, 2:H + 2, :].reshape(bb * H, WCin).astype(mm1),
                      t1_ref[2], preferred_element_type=jnp.float32)
    h1 = jnp.maximum(h1 + b1_ref[...], 0.0)                      # (bb*H, W*Cout) f32

    # ---- stage conv1 activation into an H-zero-padded lane-dense scratch ----
    # Only the top/bottom rows need zeroing (width padding is baked into the
    # Toeplitz weights).  Done every step (not program_id-gated) so it stays
    # correct when the "parallel" batch axis is megacore-sharded.
    zrow = jnp.zeros((bb, 1, WCout), pad_ref.dtype)
    pad_ref[:, 0:1, :] = zrow
    pad_ref[:, H + 1:H + 2, :] = zrow
    pad_ref[:, 1:H + 1, :] = h1.reshape(bb, H, WCout).astype(pad_ref.dtype)

    # ---- conv2: 3 accumulating matmuls over ky row windows (f32 acc) ----
    h2 = jnp.dot(pad_ref[:, 0:H, :].reshape(bb * H, WCout).astype(mm2),
                 t2_ref[0], preferred_element_type=jnp.float32)
    h2 = h2 + jnp.dot(pad_ref[:, 1:H + 1, :].reshape(bb * H, WCout).astype(mm2),
                      t2_ref[1], preferred_element_type=jnp.float32)
    h2 = h2 + jnp.dot(pad_ref[:, 2:H + 2, :].reshape(bb * H, WCout).astype(mm2),
                      t2_ref[2], preferred_element_type=jnp.float32)
    h2 = h2 + b2_ref[...]                                        # (bb*H, W*Cout) f32
    h2_3d = h2.reshape(bb, H, WCout)

    # ---- SE squeeze/excitation, entirely in the lane-dense layout ----
    # pooled @ fc1 == (sum_{h,w,c} h2 * fc1) / (H*W); the w/c lane folding and
    # the 1/(H*W) scale are baked into wfc1_ref, so only a sublane sum over H
    # remains.  wfc2_ref is lane-replicated, so s already matches h2's layout.
    h2_sum = jnp.sum(h2_3d, axis=1)                              # (bb, W*Cout) f32
    s_mid = jnp.maximum(
        jnp.dot(h2_sum.astype(wfc1_ref.dtype), wfc1_ref[...],
                preferred_element_type=jnp.float32), 0.0)        # (bb, Cred)
    s = jax.nn.sigmoid(
        jnp.dot(s_mid.astype(wfc2_ref.dtype), wfc2_ref[...],
                preferred_element_type=jnp.float32))             # (bb, W*Cout)

    # ---- apply the SE scale to f32 h2 and store exactly once (lane-dense) ----
    o_ref[...] = (h2_3d * s[:, None, :]).astype(o_ref.dtype)


def resnet_with_se(x_nchw, params, *, batch_block=1, use_bf16=False):
    """Forward pass matching the PyTorch ResNetWithSE module (NCHW in/out)."""
    w1, b1, w2, b2, fc1, fc2 = params                 # PyTorch-shaped weights
    N, Cin, H, W = x_nchw.shape
    Cout = w1.shape[0]
    Cred = fc1.shape[0]
    bb = batch_block
    assert N % bb == 0, (N, bb)
    WCin, WCout = W * Cin, W * Cout
    mm_dt = jnp.bfloat16 if use_bf16 else jnp.float32

    # ---- layout glue (plain XLA, outside the kernel) ----
    # lane-dense input slab (N, H+2, W*Cin), zero-padded in H only.
    x_dense = jnp.transpose(x_nchw, (0, 2, 3, 1)).reshape(N, H, WCin)
    x_dense = jnp.pad(x_dense, ((0, 0), (1, 1), (0, 0)))

    t1 = _toeplitz_conv_weights(w1, W).astype(mm_dt)             # (3, WCin, WCout)
    t2 = _toeplitz_conv_weights(w2, W).astype(mm_dt)             # (3, WCout, WCout)
    b1d = jnp.tile(b1.astype(jnp.float32), W).reshape(1, WCout)
    b2d = jnp.tile(b2.astype(jnp.float32), W).reshape(1, WCout)

    # SE fc weights with the global-average-pool lane folding baked in.
    wfc1_m = jnp.transpose(fc1[:, :, 0, 0], (1, 0)).astype(jnp.float32)  # (Cout,Cred)
    wfc2_m = jnp.transpose(fc2[:, :, 0, 0], (1, 0)).astype(jnp.float32)  # (Cred,Cout)
    wfc1_t = (jnp.tile(wfc1_m, (W, 1)) / float(H * W)).astype(mm_dt)     # (WCout,Cred)
    wfc2_t = jnp.tile(wfc2_m, (1, W)).astype(mm_dt)                      # (Cred,WCout)

    wbytes = 2 if use_bf16 else 4
    flops = int(N * H * 2 * (3 * WCin * WCout + 3 * WCout * WCout)
                + N * 4 * WCout * Cred + N * H * WCout * 2)
    bytes_accessed = int(4 * (x_dense.size + N * H * WCout + b1d.size + b2d.size)
                         + wbytes * (t1.size + t2.size + wfc1_t.size + wfc2_t.size))
    cost = pl.CostEstimate(flops=flops, transcendentals=int(N * WCout),
                           bytes_accessed=bytes_accessed)

    out_dense = pl.pallas_call(
        resnet_se_kernel,
        out_shape=jax.ShapeDtypeStruct((N, H, WCout), x_nchw.dtype),
        grid=(N // bb,),
        in_specs=[
            pl.BlockSpec((bb, H + 2, WCin), lambda i: (i, 0, 0)),
            pl.BlockSpec((3, WCin, WCout), lambda i: (0, 0, 0)),
            pl.BlockSpec((1, WCout), lambda i: (0, 0)),
            pl.BlockSpec((3, WCout, WCout), lambda i: (0, 0, 0)),
            pl.BlockSpec((1, WCout), lambda i: (0, 0)),
            pl.BlockSpec((WCout, Cred), lambda i: (0, 0)),
            pl.BlockSpec((Cred, WCout), lambda i: (0, 0)),
        ],
        out_specs=pl.BlockSpec((bb, H, WCout), lambda i: (i, 0, 0)),
        scratch_shapes=[pltpu.VMEM((bb, H + 2, WCout), mm_dt)],
        compiler_params=pltpu.CompilerParams(
            dimension_semantics=("parallel",),
            # ~8 MiB actually used at test shapes; keep the 32 MiB default-ish
            # ceiling so the same sizing is safe on v7x's 64 MiB VMEM.
            vmem_limit_bytes=32 * 1024 * 1024),
        cost_estimate=cost,
    )(x_dense, t1, b1d, t2, b2d, wfc1_t, wfc2_t)

    out_nhwc = out_dense.reshape(N, H, W, Cout)
    return jnp.transpose(out_nhwc, (0, 3, 1, 2))


def ref_forward(x, params):
    """Pure-JAX reference mirroring the PyTorch forward (NCHW)."""
    w1, b1, w2, b2, fc1, fc2 = params
    dn = ('NCHW', 'OIHW', 'NCHW')
    conv = lambda v, w, pad: lax.conv_general_dilated(
        v, w, (1, 1), pad, dimension_numbers=dn)
    h1 = jax.nn.relu(conv(x, w1, 'SAME') + b1.reshape(1, -1, 1, 1))
    h2 = conv(h1, w2, 'SAME') + b2.reshape(1, -1, 1, 1)
    pooled = jnp.mean(h2, axis=(2, 3), keepdims=True)
    s = jax.nn.relu(conv(pooled, fc1, 'VALID'))
    s = jax.nn.sigmoid(conv(s, fc2, 'VALID'))
    return h2 * s


if __name__ == "__main__":
    # Small shapes consistent with the module: in_channels=4, out_channels=32
    # (SE reduction=16 -> 32 // 16 = 2 squeeze channels), 16x16 spatial.
    N, Cin, H, W = 2, 4, 16, 16
    Cout = 32
    Cred = Cout // 16

    key = jax.random.PRNGKey(0)
    kx, k1, kb1, k2, kb2, kf1, kf2 = jax.random.split(key, 7)

    x = jax.random.normal(kx, (N, Cin, H, W), jnp.float32)

    # PyTorch-shaped parameters (Conv2d weight = (out, in, kH, kW)), deterministic.
    w1 = jax.random.normal(k1, (Cout, Cin, 3, 3), jnp.float32) * 0.1
    b1 = jax.random.normal(kb1, (Cout,), jnp.float32) * 0.1
    w2 = jax.random.normal(k2, (Cout, Cout, 3, 3), jnp.float32) * 0.1
    b2 = jax.random.normal(kb2, (Cout,), jnp.float32) * 0.1
    fc1 = jax.random.normal(kf1, (Cred, Cout, 1, 1), jnp.float32) * 0.1
    fc2 = jax.random.normal(kf2, (Cout, Cred, 1, 1), jnp.float32) * 0.1
    params = (w1, b1, w2, b2, fc1, fc2)

    ref = jax.block_until_ready(ref_forward(x, params))

    # f32 matmul path: must match the f32 reference tightly.
    out = jax.block_until_ready(resnet_with_se(x, params))
    assert out.shape == (N, Cout, H, W), out.shape
    assert jnp.allclose(out, ref, rtol=1e-4, atol=1e-4), \
        float(jnp.max(jnp.abs(out - ref)))

    # bf16 matmul-operand path (f32 accumulation); looser tolerance, per the
    # perf-review note that bf16 inputs cannot meet 1e-4 against an f32 ref.
    out_bf16 = jax.block_until_ready(resnet_with_se(x, params, use_bf16=True))
    assert jnp.allclose(out_bf16, ref, rtol=1e-1, atol=1e-1), \
        float(jnp.max(jnp.abs(out_bf16 - ref)))

    print("KERNEL_OK")
</pallas_src>

<mosaic_0001>
module attributes {stable_mosaic.version = 11 : i64} {
  func.func @resnet_se_kernel(%arg0: i32, %arg1: memref<1x18x64xf32, #tpu.memory_space<vmem>>, %arg2: memref<3x64x512xf32, #tpu.memory_space<vmem>>, %arg3: memref<1x512xf32, #tpu.memory_space<vmem>>, %arg4: memref<3x512x512xf32, #tpu.memory_space<vmem>>, %arg5: memref<1x512xf32, #tpu.memory_space<vmem>>, %arg6: memref<512x2xf32, #tpu.memory_space<vmem>>, %arg7: memref<2x512xf32, #tpu.memory_space<vmem>>, %arg8: memref<1x16x512xf32, #tpu.memory_space<vmem>>, %arg9: memref<1x18x512xf32, #tpu.memory_space<vmem>>) attributes {dimension_semantics = [#tpu.dimension_semantics<parallel>], iteration_bounds = array<i64: 2>, scalar_prefetch = 0 : i64, scratch_operands = 1 : i64, tpu.core_type = #tpu.core_type<tc>, window_params = [{transform_indices = @transform_0, window_bounds = array<i64: 1, 18, 64>}, {pipeline_mode = #tpu.pipeline_mode<synchronous>, transform_indices = @transform_1, window_bounds = array<i64: 3, 64, 512>}, {pipeline_mode = #tpu.pipeline_mode<synchronous>, transform_indices = @transform_2, window_bounds = array<i64: 1, 512>}, {pipeline_mode = #tpu.pipeline_mode<synchronous>, transform_indices = @transform_3, window_bounds = array<i64: 3, 512, 512>}, {pipeline_mode = #tpu.pipeline_mode<synchronous>, transform_indices = @transform_4, window_bounds = array<i64: 1, 512>}, {pipeline_mode = #tpu.pipeline_mode<synchronous>, transform_indices = @transform_5, window_bounds = array<i64: 512, 2>}, {pipeline_mode = #tpu.pipeline_mode<synchronous>, transform_indices = @transform_6, window_bounds = array<i64: 2, 512>}, {transform_indices = @transform_7, window_bounds = array<i64: 1, 16, 512>}]} {
    %c0 = arith.constant 0 : index
    %c0_0 = arith.constant 0 : index
    %c0_1 = arith.constant 0 : index
    %0 = vector.load %arg1[%c0, %c0_0, %c0_1] : memref<1x18x64xf32, #tpu.memory_space<vmem>>, vector<1x16x64xf32>
    %1 = vector.shape_cast %0 : vector<1x16x64xf32> to vector<16x64xf32>
    %c0_2 = arith.constant 0 : index
    %c0_3 = arith.constant 0 : index
    %c0_4 = arith.constant 0 : index
    %2 = vector.load %arg2[%c0_2, %c0_3, %c0_4] : memref<3x64x512xf32, #tpu.memory_space<vmem>>, vector<1x64x512xf32>
    %3 = vector.shape_cast %2 : vector<1x64x512xf32> to vector<64x512xf32>
    %cst = arith.constant dense<0.000000e+00> : vector<16x512xf32>
    %4 = tpu.matmul %1, %3, %cst {dimension_numbers = #tpu.dot_dimension_numbers<[1], [0], [0], [1], [0, 0, 1, 1], [], []>} : vector<16x64xf32>, vector<64x512xf32>, vector<16x512xf32> -> vector<16x512xf32>
    %c0_5 = arith.constant 0 : index
    %c1 = arith.constant 1 : index
    %c0_6 = arith.constant 0 : index
    %5 = vector.load %arg1[%c0_5, %c1, %c0_6] : memref<1x18x64xf32, #tpu.memory_space<vmem>>, vector<1x16x64xf32>
    %6 = vector.shape_cast %5 : vector<1x16x64xf32> to vector<16x64xf32>
    %c1_7 = arith.constant 1 : index
    %c0_8 = arith.constant 0 : index
    %c0_9 = arith.constant 0 : index
    %7 = vector.load %arg2[%c1_7, %c0_8, %c0_9] : memref<3x64x512xf32, #tpu.memory_space<vmem>>, vector<1x64x512xf32>
    %8 = vector.shape_cast %7 : vector<1x64x512xf32> to vector<64x512xf32>
    %cst_10 = arith.constant dense<0.000000e+00> : vector<16x512xf32>
    %9 = tpu.matmul %6, %8, %cst_10 {dimension_numbers = #tpu.dot_dimension_numbers<[1], [0], [0], [1], [0, 0, 1, 1], [], []>} : vector<16x64xf32>, vector<64x512xf32>, vector<16x512xf32> -> vector<16x512xf32>
    %10 = arith.addf %4, %9 : vector<16x512xf32>
    %c0_11 = arith.constant 0 : index
    %c2 = arith.constant 2 : index
    %c0_12 = arith.constant 0 : index
    %11 = vector.load %arg1[%c0_11, %c2, %c0_12] : memref<1x18x64xf32, #tpu.memory_space<vmem>>, vector<1x16x64xf32>
    %12 = vector.shape_cast %11 : vector<1x16x64xf32> to vector<16x64xf32>
    %c2_13 = arith.constant 2 : index
    %c0_14 = arith.constant 0 : index
    %c0_15 = arith.constant 0 : index
    %13 = vector.load %arg2[%c2_13, %c0_14, %c0_15] : memref<3x64x512xf32, #tpu.memory_space<vmem>>, vector<1x64x512xf32>
    %14 = vector.shape_cast %13 : vector<1x64x512xf32> to vector<64x512xf32>
    %cst_16 = arith.constant dense<0.000000e+00> : vector<16x512xf32>
    %15 = tpu.matmul %12, %14, %cst_16 {dimension_numbers = #tpu.dot_dimension_numbers<[1], [0], [0], [1], [0, 0, 1, 1], [], []>} : vector<16x64xf32>, vector<64x512xf32>, vector<16x512xf32> -> vector<16x512xf32>
    %16 = arith.addf %10, %15 : vector<16x512xf32>
    %c0_17 = arith.constant 0 : index
    %c0_18 = arith.constant 0 : index
    %17 = vector.load %arg3[%c0_17, %c0_18] : memref<1x512xf32, #tpu.memory_space<vmem>>, vector<1x512xf32>
    %18 = vector.broadcast %17 : vector<1x512xf32> to vector<16x512xf32>
    %19 = arith.addf %16, %18 : vector<16x512xf32>
    %cst_19 = arith.constant 0.000000e+00 : f32
    %20 = vector.broadcast %cst_19 : f32 to vector<16x512xf32>
    %21 = arith.maximumf %19, %20 : vector<16x512xf32>
    %cst_20 = arith.constant 0.000000e+00 : f32
    %22 = vector.broadcast %cst_20 : f32 to vector<1x1x512xf32>
    %c0_21 = arith.constant 0 : index
    %c0_22 = arith.constant 0 : index
    %c0_23 = arith.constant 0 : index
    %23 = vector.load %arg9[%c0_21, %c0_22, %c0_23] : memref<1x18x512xf32, #tpu.memory_space<vmem>>, vector<1x1x512xf32>
    tpu.vector_store %arg9[%c0_21, %c0_22, %c0_23], %22 {strides = array<i32>} : memref<1x18x512xf32, #tpu.memory_space<vmem>>, vector<1x1x512xf32>,
    %c0_24 = arith.constant 0 : index
    %c17 = arith.constant 17 : index
    %c0_25 = arith.constant 0 : index
    %24 = vector.load %arg9[%c0_24, %c17, %c0_25] : memref<1x18x512xf32, #tpu.memory_space<vmem>>, vector<1x1x512xf32>
    tpu.vector_store %arg9[%c0_24, %c17, %c0_25], %22 {strides = array<i32>} : memref<1x18x512xf32, #tpu.memory_space<vmem>>, vector<1x1x512xf32>,
    %25 = vector.shape_cast %21 : vector<16x512xf32> to vector<1x16x512xf32>
    %c0_26 = arith.constant 0 : index
    %c1_27 = arith.constant 1 : index
    %c0_28 = arith.constant 0 : index
    %26 = vector.load %arg9[%c0_26, %c1_27, %c0_28] : memref<1x18x512xf32, #tpu.memory_space<vmem>>, vector<1x16x512xf32>
    tpu.vector_store %arg9[%c0_26, %c1_27, %c0_28], %25 {strides = array<i32>} : memref<1x18x512xf32, #tpu.memory_space<vmem>>, vector<1x16x512xf32>,
    %c0_29 = arith.constant 0 : index
    %c0_30 = arith.constant 0 : index
    %c0_31 = arith.constant 0 : index
    %27 = vector.load %arg9[%c0_29, %c0_30, %c0_31] : memref<1x18x512xf32, #tpu.memory_space<vmem>>, vector<1x16x512xf32>
    %28 = vector.shape_cast %27 : vector<1x16x512xf32> to vector<16x512xf32>
    %c0_32 = arith.constant 0 : index
    %c0_33 = arith.constant 0 : index
    %c0_34 = arith.constant 0 : index
    %29 = vector.load %arg4[%c0_32, %c0_33, %c0_34] : memref<3x512x512xf32, #tpu.memory_space<vmem>>, vector<1x512x512xf32>
    %30 = vector.shape_cast %29 : vector<1x512x512xf32> to vector<512x512xf32>
    %cst_35 = arith.constant dense<0.000000e+00> : vector<16x512xf32>
    %31 = tpu.matmul %28, %30, %cst_35 {dimension_numbers = #tpu.dot_dimension_numbers<[1], [0], [0], [1], [0, 0, 1, 1], [], []>} : vector<16x512xf32>, vector<512x512xf32>, vector<16x512xf32> -> vector<16x512xf32>
    %c0_36 = arith.constant 0 : index
    %c1_37 = arith.constant 1 : index
    %c0_38 = arith.constant 0 : index
    %32 = vector.load %arg9[%c0_36, %c1_37, %c0_38] : memref<1x18x512xf32, #tpu.memory_space<vmem>>, vector<1x16x512xf32>
    %33 = vector.shape_cast %32 : vector<1x16x512xf32> to vector<16x512xf32>
    %c1_39 = arith.constant 1 : index
    %c0_40 = arith.constant 0 : index
    %c0_41 = arith.constant 0 : index
    %34 = vector.load %arg4[%c1_39, %c0_40, %c0_41] : memref<3x512x512xf32, #tpu.memory_space<vmem>>, vector<1x512x512xf32>
    %35 = vector.shape_cast %34 : vector<1x512x512xf32> to vector<512x512xf32>
    %cst_42 = arith.constant dense<0.000000e+00> : vector<16x512xf32>
    %36 = tpu.matmul %33, %35, %cst_42 {dimension_numbers = #tpu.dot_dimension_numbers<[1], [0], [0], [1], [0, 0, 1, 1], [], []>} : vector<16x512xf32>, vector<512x512xf32>, vector<16x512xf32> -> vector<16x512xf32>
    %37 = arith.addf %31, %36 : vector<16x512xf32>
    %c0_43 = arith.constant 0 : index
    %c2_44 = arith.constant 2 : index
    %c0_45 = arith.constant 0 : index
    %38 = vector.load %arg9[%c0_43, %c2_44, %c0_45] : memref<1x18x512xf32, #tpu.memory_space<vmem>>, vector<1x16x512xf32>
    %39 = vector.shape_cast %38 : vector<1x16x512xf32> to vector<16x512xf32>
    %c2_46 = arith.constant 2 : index
    %c0_47 = arith.constant 0 : index
    %c0_48 = arith.constant 0 : index
    %40 = vector.load %arg4[%c2_46, %c0_47, %c0_48] : memref<3x512x512xf32, #tpu.memory_space<vmem>>, vector<1x512x512xf32>
    %41 = vector.shape_cast %40 : vector<1x512x512xf32> to vector<512x512xf32>
    %cst_49 = arith.constant dense<0.000000e+00> : vector<16x512xf32>
    %42 = tpu.matmul %39, %41, %cst_49 {dimension_numbers = #tpu.dot_dimension_numbers<[1], [0], [0], [1], [0, 0, 1, 1], [], []>} : vector<16x512xf32>, vector<512x512xf32>, vector<16x512xf32> -> vector<16x512xf32>
    %43 = arith.addf %37, %42 : vector<16x512xf32>
    %c0_50 = arith.constant 0 : index
    %c0_51 = arith.constant 0 : index
    %44 = vector.load %arg5[%c0_50, %c0_51] : memref<1x512xf32, #tpu.memory_space<vmem>>, vector<1x512xf32>
    %45 = vector.broadcast %44 : vector<1x512xf32> to vector<16x512xf32>
    %46 = arith.addf %43, %45 : vector<16x512xf32>
    %47 = vector.shape_cast %46 : vector<16x512xf32> to vector<1x16x512xf32>
    %cst_52 = arith.constant dense<0.000000e+00> : vector<1x512xf32>
    %48 = vector.multi_reduction <add>, %47, %cst_52 [1] : vector<1x16x512xf32> to vector<1x512xf32>
    %c0_53 = arith.constant 0 : index
    %c0_54 = arith.constant 0 : index
    %49 = vector.load %arg6[%c0_53, %c0_54] : memref<512x2xf32, #tpu.memory_space<vmem>>, vector<512x2xf32>
    %cst_55 = arith.constant dense<0.000000e+00> : vector<1x2xf32>
    %50 = tpu.matmul %48, %49, %cst_55 {dimension_numbers = #tpu.dot_dimension_numbers<[1], [0], [0], [1], [0, 0, 1, 1], [], []>} : vector<1x512xf32>, vector<512x2xf32>, vector<1x2xf32> -> vector<1x2xf32>
    %cst_56 = arith.constant 0.000000e+00 : f32
    %51 = vector.broadcast %cst_56 : f32 to vector<1x2xf32>
    %52 = arith.maximumf %50, %51 : vector<1x2xf32>
    %c0_57 = arith.constant 0 : index
    %c0_58 = arith.constant 0 : index
    %53 = vector.load %arg7[%c0_57, %c0_58] : memref<2x512xf32, #tpu.memory_space<vmem>>, vector<2x512xf32>
    %cst_59 = arith.constant dense<0.000000e+00> : vector<1x512xf32>
    %54 = tpu.matmul %52, %53, %cst_59 {dimension_numbers = #tpu.dot_dimension_numbers<[1], [0], [0], [1], [0, 0, 1, 1], [], []>} : vector<1x2xf32>, vector<2x512xf32>, vector<1x512xf32> -> vector<1x512xf32>
    %55 = arith.negf %54 : vector<1x512xf32>
    %56 = math.exp %55 : vector<1x512xf32>
    %cst_60 = arith.constant 1.000000e+00 : f32
    %57 = vector.broadcast %cst_60 : f32 to vector<1x512xf32>
    %58 = arith.addf %57, %56 : vector<1x512xf32>
    %59 = arith.divf %57, %58 : vector<1x512xf32>
    %60 = vector.shape_cast %59 : vector<1x512xf32> to vector<1x1x512xf32>
    %61 = vector.broadcast %60 : vector<1x1x512xf32> to vector<1x16x512xf32>
    %62 = arith.mulf %47, %61 : vector<1x16x512xf32>
    %c0_61 = arith.constant 0 : index
    %c0_62 = arith.constant 0 : index
    %c0_63 = arith.constant 0 : index
    %63 = vector.load %arg8[%c0_61, %c0_62, %c0_63] : memref<1x16x512xf32, #tpu.memory_space<vmem>>, vector<1x16x512xf32>
    tpu.vector_store %arg8[%c0_61, %c0_62, %c0_63], %62 {strides = array<i32>} : memref<1x16x512xf32, #tpu.memory_space<vmem>>, vector<1x16x512xf32>,
    return
  }
  func.func @transform_0(%arg0: i32) -> (i32, i32, i32) {
    %c0_i32 = arith.constant 0 : i32
    %c0_i32_0 = arith.constant 0 : i32
    %c0_i32_1 = arith.constant 0 : i32
    return %arg0, %c0_i32, %c0_i32_0 : i32, i32, i32
  }
  func.func @transform_1(%arg0: i32) -> (i32, i32, i32) {
    %c0_i32 = arith.constant 0 : i32
    %c0_i32_0 = arith.constant 0 : i32
    %c0_i32_1 = arith.constant 0 : i32
    %c0_i32_2 = arith.constant 0 : i32
    return %c0_i32, %c0_i32_0, %c0_i32_1 : i32, i32, i32
  }
  func.func @transform_2(%arg0: i32) -> (i32, i32) {
    %c0_i32 = arith.constant 0 : i32
    %c0_i32_0 = arith.constant 0 : i32
    %c0_i32_1 = arith.constant 0 : i32
    return %c0_i32, %c0_i32_0 : i32, i32
  }
  func.func @transform_3(%arg0: i32) -> (i32, i32, i32) {
    %c0_i32 = arith.constant 0 : i32
    %c0_i32_0 = arith.constant 0 : i32
    %c0_i32_1 = arith.constant 0 : i32
    %c0_i32_2 = arith.constant 0 : i32
    return %c0_i32, %c0_i32_0, %c0_i32_1 : i32, i32, i32
  }
  func.func @transform_4(%arg0: i32) -> (i32, i32) {
    %c0_i32 = arith.constant 0 : i32
    %c0_i32_0 = arith.constant 0 : i32
    %c0_i32_1 = arith.constant 0 : i32
    return %c0_i32, %c0_i32_0 : i32, i32
  }
  func.func @transform_5(%arg0: i32) -> (i32, i32) {
    %c0_i32 = arith.constant 0 : i32
    %c0_i32_0 = arith.constant 0 : i32
    %c0_i32_1 = arith.constant 0 : i32
    return %c0_i32, %c0_i32_0 : i32, i32
  }
  func.func @transform_6(%arg0: i32) -> (i32, i32) {
    %c0_i32 = arith.constant 0 : i32
    %c0_i32_0 = arith.constant 0 : i32
    %c0_i32_1 = arith.constant 0 : i32
    return %c0_i32, %c0_i32_0 : i32, i32
  }
  func.func @transform_7(%arg0: i32) -> (i32, i32, i32) {
    %c0_i32 = arith.constant 0 : i32
    %c0_i32_0 = arith.constant 0 : i32
    %c0_i32_1 = arith.constant 0 : i32
    return %arg0, %c0_i32, %c0_i32_0 : i32, i32, i32
  }
}

</mosaic_0001>

<bundles_post_ra>
// kernel: tpu_custom_call.1
= control target key start
LH: loop header
LB: loop body
LE: loop exit
PB: predicated region body
PF: predicated region fallthrough
CT: control target
= control target key end

     0   :  { %s5541_s0 = inlined_call_operand.vmem [shape: f32[2,18,64], index: 0, kind: input, shape index: {}]   ;;  %s5542_s1 = inlined_call_operand.hbm [shape: f32[3,64,512], index: 1, kind: input, shape index: {}]   ;;  %s5543_s2 = inlined_call_operand.hbm [shape: f32[1,512], index: 2, kind: input, shape index: {}]   ;;  %s5544_s3 = inlined_call_operand.hbm [shape: f32[3,512,512], index: 3, kind: input, shape index: {}]   ;;  %s5545_s4 = inlined_call_operand.hbm [shape: f32[1,512], index: 4, kind: input, shape index: {}]   ;;  %s5546_s5 = inlined_call_operand.vmem [shape: f32[512,2], index: 5, kind: input, shape index: {}]   ;;  %s5547_s6 = inlined_call_operand.hbm [shape: f32[2,512], index: 6, kind: input, shape index: {}]   ;;  %s5548_s7 = inlined_call_operand.hbm [shape: f32[2,16,512], index: 7, kind: output, shape index: {}]  }
   0x1   :  { %5555 = sst [smem:[#allocation20_spill]] %s5543_s2 }
   0x2   :  { %5556 = sst [smem:[#allocation21_spill]] %s5545_s4 }
   0x3   :  { %12 = vsyncpa [#allocation4], 0 }
   0x4   :  { %13 = vsyncpa [#allocation7], 0 }
   0x5   :  { %14 = vsyncpa [#allocation10], 0 }
   0x6   :  { %15 = vsyncpa [#allocation5], 0 }
   0x7   :  { %17 = vsyncpa [#allocation5 + $0x1], 0  ;;  %s4936_s24 = smov 0   ;;  %s4938_s25 = smov 0  }
   0x8   :  { %s4940_s26 = smov 0   ;;  %s4942_s27 = smov 0  }
   0x9 LB: > { %5557 = sst [smem:[#allocation17_spill]] %s4878_s26  ;;  %s4957_s28 = sadd.s32 4294967295, %s4882_s27   ;;  %s4882_s27 = sphi %s4942_s27, %s5576_s27   ;;  %s4878_s26 = sphi %s4940_s26, %s5578_s26   ;;  %s4874_s25 = sphi %s4938_s25, %s5580_s25   ;;  %s4870_s24 = sphi %s4936_s24, %s5579_s24  }
   0xa   : > { %s3452_s29 = sadd.s32 4294967294, %s4882_s27   ;;  %s4961_s30 = sadd.s32 1, %s4882_s27  }
   0xb   : > { %5558 = sst [smem:[#allocation18_spill]] %s4961_s30  ;;  %s182_s8 = sadd.s32 1, %s4878_s26 }
   0xc   : > { %s179_s9 = ssub.s32 %s4882_s27, %s4961_s30  ;;  %p192_p0 = scmp.ne.s32.totalorder %s4878_s26, %s4874_s25 }
   0xd   : > { %p180_p1 = scmp.eq.s32.totalorder %s179_s9, 0  ;;  %p193_p2 = scmp.eq.s32.totalorder %s4957_s28, 1 }
   0xe   : > { %p198_p3 = scmp.ne.s32.totalorder %s4874_s25, %s4870_s24  ;;  %p199_p4 = scmp.eq.s32.totalorder %s3452_s29, 1 }
   0xf   : > { %s4972_s10 = scalar_select %p180_p1, %s4878_s26, %s182_s8  }
  0x10   : > { %p4974_p5 = por %p193_p2, %p192_p0  ;;  %p4978_p6 = por %p199_p4, %p198_p3 }
  0x11   : > { %5559 = sst [smem:[#allocation19_spill]] %s4972_s10  ;;  %p3453_p7 = scmp.ge.s32.totalorder %s4882_s27, 1 }
  0x12   : > { %s5560_s11 = scalar_select %p4974_p5, 1, 0 }
  0x13   : > { %s5561_s12 = scalar_select %p4978_p6, 1, 0 }
  0x14   : > { %p206_p8 = scmp.lt.s32.totalorder %s4882_s27, 3  ;;  %p5549_p9 = scmp.eq.s32.totalorder %s4957_s28, 0 }
  0x15   : > { %s4884_s14 = smov [#allocation6]   ;;  %s4885_s16 = smov [#allocation9]  }
  0x16   : > { %p4985_p10 = pnand %p3453_p7, %p206_p8  ;;  %s232_s15 = sshll.u32 %s4884_s14, 4  ;;  %s233_s15 = int_to_ptr.vmem [resolvable:$true] %s232_s15 }
  0x17   : > { %s256_s17 = sshll.u32 %s4885_s16, 4  ;;  %s4886_s19 = smov [#allocation3]   ;;  %s4997_s17 = int_to_ptr.vmem [resolvable:$true] %s256_s17 }
  0x18   : > { %s5562_s13 = scalar_select %p4985_p10, 1, 0 }
  0x19   : > { %p4573_p11 = pneg %p4985_p10  ;;  %s218_s20 = sshll.u32 %s4886_s19, 4  ;;  %s4999_s20 = int_to_ptr.vmem [resolvable:$true] %s218_s20 }
  0x1a   : > { %s5564_s2 = sld [smem:[#allocation20_spill]] }
  0x1b   : > { %p4993_p12 = pnand %p5549_p9, %p4573_p11 }
  0x1d   : > { %p5009_p0 = pneg %p4993_p12 }
  0x20   : > { %s4668_s23 = scalar_lea.hbm %s5564_s2, 64 }
  0x21   : > { %p4669_p13 = scmp.ne.s32.totalorder %s5564_s2, %s4668_s23  ;;  %p4675_p3 = scmp.lt.u32.totalorder %s4668_s23, %s5564_s2 }
  0x23   : > { %p4671_p1 = pnand %p5009_p0, %p4669_p13 }
  0x25   : > { %p4672_p2 = pneg %p4671_p1 }
  0x27   : > { %p4677_p4 = pnand %p4675_p3, %p4672_p2 }
  0x29   : > { %4680 = shalt.err (!%p4677_p4)
}
  0x2a   : > { %s4681_s19 = scalar_lea.vmem %s233_s15, 64  ;;  %p4689_p9 = scmp.lt.s32.totalorder %s233_s15, %s233_s15 }
  0x2b   : > { %p4682_p7 = scmp.ne.s32.totalorder %s233_s15, %s4681_s19  ;;  %p4690_p6 = scmp.lt.s32.totalorder %s4681_s19, %s4681_s19 }
  0x2d   : > { %p4684_p8 = pnand %p4682_p7, %p5009_p0  ;;  %p4691_p5 = por %p4690_p6, %p4689_p9 }
  0x2f   : > { %p4685_p11 = pneg %p4684_p8 }
  0x31   : > { %p4692_p10 = pnand %p4691_p5, %p4685_p11 }
  0x33   : > { %4695 = shalt.err (!%p4692_p10)
}
  0x34   : > { %4579 = dma.hbm_to_vmem [thread:$0]  (!%p4993_p12), %s5564_s2, 64, %s233_s15, [#allocation7]  }
  0x35   : > { %s5566_s4 = sld [smem:[#allocation21_spill]] }
  0x3b   : > { %s4696_s8 = scalar_lea.hbm %s5566_s4, 64 }
  0x3c   : > { %p4697_p13 = scmp.ne.s32.totalorder %s5566_s4, %s4696_s8  ;;  %p4703_p5 = scmp.lt.u32.totalorder %s4696_s8, %s5566_s4 }
  0x3e   : > { %p4699_p1 = pnand %p4697_p13, %p5009_p0 }
  0x40   : > { %p4700_p6 = pneg %p4699_p1 }
  0x42   : > { %p4705_p9 = pnand %p4703_p5, %p4700_p6 }
  0x44   : > { %4708 = shalt.err (!%p4705_p9)
}
  0x45   : > { %s4709_s15 = scalar_lea.vmem %s4997_s17, 64  ;;  %p4717_p4 = scmp.lt.s32.totalorder %s4997_s17, %s4997_s17 }
  0x46   : > { %p4710_p10 = scmp.ne.s32.totalorder %s4997_s17, %s4709_s15  ;;  %p4718_p7 = scmp.lt.s32.totalorder %s4709_s15, %s4709_s15 }
  0x48   : > { %p4712_p2 = pnand %p4710_p10, %p5009_p0  ;;  %p4719_p8 = por %p4718_p7, %p4717_p4 }
  0x4a   : > { %p4713_p3 = pneg %p4712_p2 }
  0x4c   : > { %p4720_p11 = pnand %p4719_p8, %p4713_p3 }
  0x4e   : > { %4723 = shalt.err (!%p4720_p11)
}
  0x4f   : > { %4585 = dma.hbm_to_vmem [thread:$0]  (!%p4993_p12), %s5566_s4, 64, %s4997_s17, [#allocation10]  }
  0x50   : > { %s4724_s29 = scalar_lea.hbm %s5542_s1, 12288 }
  0x51   : > { %p4725_p13 = scmp.ne.s32.totalorder %s5542_s1, %s4724_s29  ;;  %p4731_p5 = scmp.lt.u32.totalorder %s4724_s29, %s5542_s1 }
  0x53   : > { %p4727_p1 = pnand %p4725_p13, %p5009_p0 }
  0x55   : > { %p4728_p6 = pneg %p4727_p1 }
  0x57   : > { %p4733_p9 = pnand %p4731_p5, %p4728_p6 }
  0x59   : > { %4736 = shalt.err (!%p4733_p9)
}
  0x5a   : > { %s4737_s17 = scalar_lea.vmem %s4999_s20, 12288  ;;  %p4745_p4 = scmp.lt.s32.totalorder %s4999_s20, %s4999_s20 }
  0x5b   : > { %p4738_p10 = scmp.ne.s32.totalorder %s4999_s20, %s4737_s17  ;;  %p4746_p7 = scmp.lt.s32.totalorder %s4737_s17, %s4737_s17 }
  0x5d   : > { %p4740_p2 = pnand %p4738_p10, %p5009_p0  ;;  %p4747_p8 = por %p4746_p7, %p4745_p4 }
  0x5f   : > { %p4741_p3 = pneg %p4740_p2 }
  0x61   : > { %p4748_p11 = pnand %p4747_p8, %p4741_p3 }
  0x63   : > { %4751 = shalt.err (!%p4748_p11)
}
  0x64   : > { %s4887_s15 = smov 512   ;;  %s4888_s10 = smov 32  }
  0x65   : > { %4576 = dma.hbm_to_vmem [thread:$0]  (!%p4993_p12), %s5542_s1, 12288, %s4999_s20, [#allocation4], %s4887_s15, %s4887_s15, %s4888_s10  }
  0x66   : > { %s4889_s23 = smov [#allocation8]   ;;  %s4890_s8 = smov [#allocation11]  }
  0x67   : > { %s242_s29 = sshll.u32 %s4889_s23, 4  ;;  %s270_s14 = sshll.u32 %s4890_s8, 4  ;;  %s243_s29 = int_to_ptr.vmem [resolvable:$true] %s242_s29  ;;  %s271_s14 = int_to_ptr.vmem [resolvable:$true] %s270_s14 }
  0x68   : > { %s4752_s17 = scalar_lea.hbm %s5544_s3, 98304 }
  0x69   : > { %p4753_p13 = scmp.ne.s32.totalorder %s5544_s3, %s4752_s17  ;;  %p4759_p5 = scmp.lt.u32.totalorder %s4752_s17, %s5544_s3 }
  0x6b   : > { %p4755_p1 = pnand %p4753_p13, %p5009_p0 }
  0x6d   : > { %p4756_p6 = pneg %p4755_p1 }
  0x6f   : > { %p4761_p9 = pnand %p4759_p5, %p4756_p6 }
  0x71   : > { %4764 = shalt.err (!%p4761_p9)
}
  0x72   : > { %s4765_s20 = scalar_lea.vmem %s243_s29, 98304  ;;  %p4773_p4 = scmp.lt.s32.totalorder %s243_s29, %s243_s29 }
  0x73   : > { %p4766_p10 = scmp.ne.s32.totalorder %s243_s29, %s4765_s20  ;;  %p4774_p7 = scmp.lt.s32.totalorder %s4765_s20, %s4765_s20 }
  0x75   : > { %p4768_p2 = pnand %p4766_p10, %p5009_p0  ;;  %p4775_p8 = por %p4774_p7, %p4773_p4 }
  0x77   : > { %p4769_p3 = pneg %p4768_p2 }
  0x79   : > { %p4776_p11 = pnand %p4775_p8, %p4769_p3 }
  0x7b   : > { %4779 = shalt.err (!%p4776_p11)
}
  0x7c   : > { %4582 = dma.hbm_to_vmem [thread:$0]  (!%p4993_p12), %s5544_s3, 98304, %s243_s29, [#allocation7], %s4887_s15, %s4887_s15, %s4888_s10  }
  0x7d   : > { %s4780_s21 = scalar_lea.hbm %s5547_s6, 128 }
  0x7e   : > { %p4781_p13 = scmp.ne.s32.totalorder %s5547_s6, %s4780_s21  ;;  %p4787_p5 = scmp.lt.u32.totalorder %s4780_s21, %s5547_s6 }
  0x80   : > { %p4783_p1 = pnand %p4781_p13, %p5009_p0 }
  0x82   : > { %p4784_p6 = pneg %p4783_p1 }
  0x84   : > { %p4789_p9 = pnand %p4787_p5, %p4784_p6 }
  0x86   : > { %4792 = shalt.err (!%p4789_p9)
}
  0x87   : > { %s4793_s19 = scalar_lea.vmem %s271_s14, 128  ;;  %p4801_p4 = scmp.lt.s32.totalorder %s271_s14, %s271_s14 }
  0x88   : > { %p4794_p10 = scmp.ne.s32.totalorder %s271_s14, %s4793_s19  ;;  %p4802_p7 = scmp.lt.s32.totalorder %s4793_s19, %s4793_s19 }
  0x8a   : > { %p4796_p2 = pnand %p4794_p10, %p5009_p0  ;;  %p4803_p8 = por %p4802_p7, %p4801_p4 }
  0x8c   : > { %p4797_p3 = pneg %p4796_p2 }
  0x8e   : > { %p4804_p11 = pnand %p4803_p8, %p4797_p3 }
  0x90   : > { %4807 = shalt.err (!%p4804_p11)
}
  0x91   : > { %4588 = dma.hbm_to_vmem [thread:$0]  (!%p4993_p12), %s5547_s6, 128, %s271_s14, [#allocation10]  }
  0x92   : > { %p5567_p13 = scmp.ne.s32.totalorder %s5562_s13, 0 }
  0x93   : > { %p5568_p1 = scmp.eq.s32.totalorder (!%p5567_p13), %s4957_s28, 0 }
  0x94   : > { %291 = sbr.rel (%p5567_p13) target bundleno = 1483 (0x5cb), region = 48 }
  0x9b   : > { %4853 = dma.done.wait (%p5568_p1), [#allocation4], 12288   ;;  %p5569_p0 = pmov %p5568_p1 }
  0x9d   : > { %4855 = vsyncadd (%p5569_p0), [#allocation4], 4294955008  ;;  %p5570_p6 = pmov %p5569_p0 }
  0x9e   : > { %p5571_p5 = pmov %p5569_p0 }
  0x9f   : > { %4857 = dma.done.wait (%p5570_p6), [#allocation7], 98368  }
  0xa0   : > { %4859 = vsyncadd (%p5571_p5), [#allocation7], 4294868928  ;;  %p5572_p9 = pmov %p5569_p0 }
  0xa1   : > { %p5573_p12 = pmov %p5569_p0 }
  0xa2   : > { %4861 = dma.done.wait (%p5572_p9), [#allocation10], 192  }
  0xa3   : > { %4863 = vsyncadd (%p5573_p12), [#allocation10], 4294967104  ;;  %v4891_v0 = vmov 0.0   ;;  %v382_v1 = vld [vmem:[#allocation3 + $0x108] sm:$0xff]  ;;  %v381_v3 = vld [vmem:[#allocation3 + $0x100] sm:$0xff]  ;;  %p339_p10 = scmp.lt.s32.totalorder %s4957_s28, 1 }
  0xa4   : > { %484 = vmatprep.mubr.f32.mxu0 %v4891_v0  ;;  %561 = vmatprep.mubr.f32.mxu1 %v4891_v0  ;;  %v386_v2 = vld [vmem:[#allocation3 + $0x128] sm:$0xff]  ;;  %v385_v5 = vld [vmem:[#allocation3 + $0x120] sm:$0xff]  ;;  %v384_v26 = vld [vmem:[#allocation3 + $0x118] sm:$0xff]  ;;  %vm413_vm0 = vcmask 523264   ;;  %vm992_vm2 = vcmask 1040384   ;;  %vm1570_vm3 = vcmask 1046528  }
  0xa5   : > { %v3566_v4 = vpack.c.bf16 %v386_v2, %v382_v1  ;;  %v390_v6 = vld [vmem:[#allocation3 + $0x148] sm:$0xff]  ;;  %v3568_v8 = vpack.c.bf16 %v385_v5, %v381_v3  ;;  %v389_v10 = vld [vmem:[#allocation3 + $0x140] sm:$0xff]  ;;  %s340_s13 = scalar_select %p339_p10, %s4957_s28, 1  ;;  %v388_v27 = vld [vmem:[#allocation3 + $0x138] sm:$0xff]  ;;  %vm2488_vm4 = vcmask 1045504   ;;  %vm3119_vm5 = vcmask 1041408  }
  0xa6   : > { %v394_v7 = vld [vmem:[#allocation3 + $0x168] sm:$0xff]  ;;  %v393_v11 = vld [vmem:[#allocation3 + $0x160] sm:$0xff]  ;;  %v383_v28 = vld [vmem:[#allocation3 + $0x110] sm:$0xff]  ;;  %v3582_v30 = vpack.c.bf16 %v388_v27, %v384_v26  ;;  %vm3115_vm6 = vcmask 15360   ;;  %s3495_s9 = sshll.u32 %s4957_s28, 10  ;;  %p5574_p3 = scmp.ne.s32.totalorder %s5560_s11, 0 }
  0xa7   : > { %v3570_v9 = vpack.c.bf16 %v394_v7, %v390_v6  ;;  %v398_v12 = vld [vmem:[#allocation3 + $0x188] sm:$0xff]  ;;  %3567 = vmatprep.subr.bf16.mxu0 %v3566_v4  ;;  %v3572_v14 = vpack.c.bf16 %v393_v11, %v389_v10  ;;  %v397_v16 = vld [vmem:[#allocation3 + $0x180] sm:$0xff]  ;;  %s4550_s18 = smul.u32 24, %s340_s13  ;;  %v387_v29 = vld [vmem:[#allocation3 + $0x130] sm:$0xff]  ;;  %s336_s13 = sand.u32 1, %s4874_s25  }
  0xa8   : > { %v402_v13 = vld [vmem:[#allocation3 + $0x1a8] sm:$0xff]  ;;  %3569 = vmatpush1.bf16.msra.mxu0 %v3568_v8  ;;  %v401_v17 = vld [vmem:[#allocation3 + $0x1a0] sm:$0xff]  ;;  %v3584_v31 = vpack.c.bf16 %v387_v29, %v383_v28  ;;  %v392_v35 = vld [vmem:[#allocation3 + $0x158] sm:$0xff]  ;;  %3583 = vmatprep.subr.bf16.mxu1 %v3582_v30  ;;  %s5492_s20 = scalar_lea.hbm %s5548_s7, %s3495_s9  ;;  %s5500_s2 = scalar_lea.sflag [#allocation5], %s336_s13 }
  0xa9   : > { %3571 = vmatprep.subr.bf16.mxu0 %v3570_v9  ;;  %v3574_v15 = vpack.c.bf16 %v402_v13, %v398_v12  ;;  %v406_v18 = vld [vmem:[#allocation3 + $0x1c8] sm:$0xff]  ;;  %v3576_v20 = vpack.c.bf16 %v401_v17, %v397_v16  ;;  %v405_v21 = vld [vmem:[#allocation3 + $0x1c0] sm:$0xff]  ;;  %s5130_s14 = scalar_lea.vmem %s5541_s0, %s4550_s18  ;;  %v396_v37 = vld [vmem:[#allocation3 + $0x178] sm:$0xff]  ;;  %s3466_s18 = sshll.u32 %s336_s13, 6 }
  0xaa   : > { %v410_v19 = vld [vmem:[#allocation3 + $0x1e8] sm:$0xff]  ;;  %v409_v22 = vld [vmem:[#allocation3 + $0x1e0] sm:$0xff]  ;;  %v391_v38 = vld [vmem:[#allocation3 + $0x150] sm:$0xff]  ;;  %3585 = vmatpush1.bf16.msra.mxu1 %v3584_v31  ;;  %v3586_v42 = vpack.c.bf16 %v396_v37, %v392_v35  ;;  %s338_s29 = scalar_lea.vmem [#allocation12], %s3466_s18  ;;  %s4893_s26 = smov [#allocation12]  }
  0xab   : > { %v3578_v23 = vpack.c.bf16 %v410_v19, %v406_v18  ;;  %v347_v24 = vld [vmem:[#allocation3 + $0x8] sm:$0xff]  ;;  %v3580_v32 = vpack.c.bf16 %v409_v22, %v405_v21  ;;  %v346_v33 = vld [vmem:[#allocation3] sm:$0xff]  ;;  %v395_v39 = vld [vmem:[#allocation3 + $0x170] sm:$0xff]  ;;  %s4812_s30 = sshll.u32 %s4893_s26, 4  ;;  %s4813_s30 = int_to_ptr.vmem [resolvable:$false] %s4812_s30 }
  0xac   : > { %3573 = vmatpush1.bf16.msra.mxu0 %v3572_v14  ;;  %v351_v25 = vld [vmem:[#allocation3 + $0x28] sm:$0xff]  ;;  %v350_v34 = vld [vmem:[#allocation3 + $0x20] sm:$0xff]  ;;  %v3588_v43 = vpack.c.bf16 %v395_v39, %v391_v38  ;;  %v5133_v44 = vld [vmem:[%s5130_s14 + $0x1] sm:$0xff]  ;;  %3587 = vmatprep.subr.bf16.mxu1 %v3586_v42  ;;  %s4814_s21 = scalar_lea.vmem %s4813_s30, 2048 }
  0xad   : > { %3575 = vmatprep.subr.bf16.mxu0 %v3574_v15  ;;  %v3598_v36 = vpack.c.bf16 %v351_v25, %v347_v24  ;;  %v355_v40 = vld [vmem:[#allocation3 + $0x48] sm:$0xff]  ;;  %v400_v45 = vld [vmem:[#allocation3 + $0x198] sm:$0xff]  ;;  %v3600_v46 = vpack.c.bf16 %v350_v34, %v346_v33  ;;  %v399_v48 = vld [vmem:[#allocation3 + $0x190] sm:$0xff] }
  0xae   : > { %v359_v41 = vld [vmem:[#allocation3 + $0x68] sm:$0xff]  ;;  %v404_v47 = vld [vmem:[#allocation3 + $0x1b8] sm:$0xff]  ;;  %v403_v49 = vld [vmem:[#allocation3 + $0x1b0] sm:$0xff]  ;;  %3589 = vmatpush1.bf16.msra.mxu1 %v3588_v43 }
  0xaf   : > { %v3602_v50 = vpack.c.bf16 %v359_v41, %v355_v40  ;;  %v354_v51 = vld [vmem:[#allocation3 + $0x40] sm:$0xff]  ;;  %v363_v53 = vld [vmem:[#allocation3 + $0x88] sm:$0xff]  ;;  %v3590_v54 = vpack.c.bf16 %v404_v47, %v400_v45  ;;  %v3592_v56 = vpack.c.bf16 %v403_v49, %v399_v48  ;;  %v408_v57 = vld [vmem:[#allocation3 + $0x1d8] sm:$0xff] }
  0xb0   : > { %3577 = vmatpush1.bf16.msra.mxu0 %v3576_v20  ;;  %v358_v52 = vld [vmem:[#allocation3 + $0x60] sm:$0xff]  ;;  %v367_v55 = vld [vmem:[#allocation3 + $0xa8] sm:$0xff]  ;;  %v412_v58 = vld [vmem:[#allocation3 + $0x1f8] sm:$0xff] }
  0xb1   : > { %3579 = vmatprep.subr.bf16.mxu0 %v3578_v23  ;;  %3591 = vmatprep.subr.bf16.mxu1 %v3590_v54  ;;  %v3594_v59 = vpack.c.bf16 %v412_v58, %v408_v57  ;;  %v407_v60 = vld [vmem:[#allocation3 + $0x1d0] sm:$0xff]  ;;  %v3604_v62 = vpack.c.bf16 %v358_v52, %v354_v51  ;;  %v362_v63 = vld [vmem:[#allocation3 + $0x80] sm:$0xff]  ;;  %v3606_v2 = vpack.c.bf16 %v367_v55, %v363_v53  ;;  %v349_v4 = vld [vmem:[#allocation3 + $0x18] sm:$0xff] }
  0xb2   : > { %v411_v61 = vld [vmem:[#allocation3 + $0x1f0] sm:$0xff]  ;;  %v379_v1 = vld [vmem:[%s5130_s14 + $0x9] sm:$0xff]  ;;  %v371_v6 = vld [vmem:[#allocation3 + $0xc8] sm:$0xff]  ;;  %3593 = vmatpush1.bf16.msra.mxu1 %v3592_v56 }
  0xb3   : > { %v366_v3 = vld [vmem:[#allocation3 + $0xa0] sm:$0xff]  ;;  %v353_v5 = vld [vmem:[#allocation3 + $0x38] sm:$0xff]  ;;  %v375_v7 = vld [vmem:[#allocation3 + $0xe8] sm:$0xff]  ;;  %v3596_v8 = vpack.c.bf16 %v411_v61, %v407_v60  ;;  %3595 = vmatprep.subr.bf16.mxu1 %v3594_v59 }
  0xb4   : > { %3581 = vmatpush1.bf16.msra.mxu0 %v3580_v32  ;;  %v3614_v9 = vpack.c.bf16 %v353_v5, %v349_v4  ;;  %v348_v10 = vld [vmem:[#allocation3 + $0x10] sm:$0xff]  ;;  %v3608_v12 = vpack.c.bf16 %v366_v3, %v362_v63  ;;  %v357_v13 = vld [vmem:[#allocation3 + $0x58] sm:$0xff]  ;;  %v3610_v15 = vpack.c.bf16 %v375_v7, %v371_v6  ;;  %v370_v16 = vld [vmem:[#allocation3 + $0xc0] sm:$0xff] }
  0xb5   : > { %3599 = vmatprep.subr.bf16.mxu0 %v3598_v36  ;;  %v352_v11 = vld [vmem:[#allocation3 + $0x30] sm:$0xff]  ;;  %v361_v14 = vld [vmem:[#allocation3 + $0x78] sm:$0xff]  ;;  %v374_v17 = vld [vmem:[#allocation3 + $0xe0] sm:$0xff] }
  0xb6   : > { %v738_v18 = vld [vmem:[#allocation3 + $0x208] sm:$0xff]  ;;  %3597 = vmatpush1.bf16.msra.mxu1 %v3596_v8  ;;  %v3616_v20 = vpack.c.bf16 %v352_v11, %v348_v10  ;;  %v3618_v21 = vpack.c.bf16 %v361_v14, %v357_v13  ;;  %v356_v22 = vld [vmem:[#allocation3 + $0x50] sm:$0xff]  ;;  %v3612_v24 = vpack.c.bf16 %v374_v17, %v370_v16  ;;  %v365_v25 = vld [vmem:[#allocation3 + $0x98] sm:$0xff] }
  0xb7   : > { %3468 = vmatmul.mubr.msk.f32.vlgmr.msra.gmra.mrb[0].mxu0 %vm413_vm0, %v5133_v44  ;;  %v742_v19 = vld [vmem:[#allocation3 + $0x228] sm:$0xff]  ;;  %3615 = vmatprep.subr.bf16.mxu1 %v3614_v9  ;;  %v360_v23 = vld [vmem:[#allocation3 + $0x70] sm:$0xff]  ;;  %v369_v26 = vld [vmem:[#allocation3 + $0xb8] sm:$0xff] }
  0xb8   : > { %3601 = vmatpush1.bf16.msra.mxu0 %v3600_v46  ;;  %490 = vmatprep.mubr.f32.mxu0 %v4891_v0  ;;  %v3630_v27 = vpack.c.bf16 %v742_v19, %v738_v18  ;;  %v737_v28 = vld [vmem:[#allocation3 + $0x200] sm:$0xff]  ;;  %v746_v30 = vld [vmem:[#allocation3 + $0x248] sm:$0xff]  ;;  %v3620_v32 = vpack.c.bf16 %v360_v23, %v356_v22  ;;  %v3622_v33 = vpack.c.bf16 %v369_v26, %v365_v25  ;;  %v364_v34 = vld [vmem:[#allocation3 + $0x90] sm:$0xff] }
  0xb9   : > { %3603 = vmatprep.subr.bf16.mxu0 %v3602_v50  ;;  %v741_v29 = vld [vmem:[#allocation3 + $0x220] sm:$0xff]  ;;  %3470 = vmatmul.mubr.msk.f32.vlgmr.msra.gmra.mrb[0].mxu1 %vm413_vm0, %v5133_v44  ;;  %v750_v31 = vld [vmem:[#allocation3 + $0x268] sm:$0xff]  ;;  %v368_v35 = vld [vmem:[#allocation3 + $0xb0] sm:$0xff] }
  0xba   : > { %3617 = vmatpush1.bf16.msra.mxu1 %v3616_v20  ;;  %567 = vmatprep.mubr.f32.mxu1 %v4891_v0  ;;  %v344_v36 = vld [vmem:[%s5130_s14] sm:$0xff]  ;;  %v3632_v37 = vpack.c.bf16 %v741_v29, %v737_v28  ;;  %v373_v38 = vld [vmem:[#allocation3 + $0xd8] sm:$0xff]  ;;  %v3634_v40 = vpack.c.bf16 %v750_v31, %v746_v30  ;;  %v745_v41 = vld [vmem:[#allocation3 + $0x240] sm:$0xff]  ;;  %v3624_v45 = vpack.c.bf16 %v368_v35, %v364_v34 }
  0xbb   : > { %3469 = vmatmul.mubr.msk.f32.gmra.mrb[2].mxu0 %vm413_vm0, %v379_v1  ;;  %3619 = vmatprep.subr.bf16.mxu1 %v3618_v21  ;;  %v377_v39 = vld [vmem:[#allocation3 + $0xf8] sm:$0xff]  ;;  %v749_v42 = vld [vmem:[#allocation3 + $0x260] sm:$0xff]  ;;  %v754_v43 = vld [vmem:[#allocation3 + $0x288] sm:$0xff] }
  0xbc   : > { %3605 = vmatpush1.bf16.msra.mxu0 %v3604_v62  ;;  %644 = vmatprep.mubr.f32.mxu0 %v4891_v0  ;;  %v758_v44 = vld [vmem:[#allocation3 + $0x2a8] sm:$0xff]  ;;  %v3626_v46 = vpack.c.bf16 %v377_v39, %v373_v38  ;;  %v372_v47 = vld [vmem:[#allocation3 + $0xd0] sm:$0xff]  ;;  %v3636_v49 = vpack.c.bf16 %v749_v42, %v745_v41  ;;  %v345_v50 = vld [vmem:[%s5130_s14 + $0x8] sm:$0xff] }
  0xbd   : > { %3607 = vmatprep.subr.bf16.mxu0 %v3606_v2  ;;  %3471 = vmatmul.mubr.msk.f32.gmra.mrb[2].mxu1 %vm413_vm0, %v379_v1  ;;  %v376_v48 = vld [vmem:[#allocation3 + $0xf0] sm:$0xff]  ;;  %v740_v51 = vld [vmem:[#allocation3 + $0x218] sm:$0xff]  ;;  %v3638_v53 = vpack.c.bf16 %v758_v44, %v754_v43  ;;  %v753_v54 = vld [vmem:[#allocation3 + $0x280] sm:$0xff] }
  0xbe   : > { %3621 = vmatpush1.bf16.msra.mxu1 %v3620_v32  ;;  %721 = vmatprep.mubr.f32.mxu1 %v4891_v0  ;;  %v744_v52 = vld [vmem:[#allocation3 + $0x238] sm:$0xff]  ;;  %v757_v55 = vld [vmem:[#allocation3 + $0x2a0] sm:$0xff]  ;;  %v762_v56 = vld [vmem:[#allocation3 + $0x2c8] sm:$0xff]  ;;  %v3628_v58 = vpack.c.bf16 %v376_v48, %v372_v47 }
  0xbf   : > { %3623 = vmatprep.subr.bf16.mxu1 %v3622_v33  ;;  %v766_v57 = vld [vmem:[#allocation3 + $0x2e8] sm:$0xff]  ;;  %v3646_v59 = vpack.c.bf16 %v744_v52, %v740_v51  ;;  %v739_v60 = vld [vmem:[#allocation3 + $0x210] sm:$0xff]  ;;  %v3640_v62 = vpack.c.bf16 %v757_v55, %v753_v54  ;;  %v748_v63 = vld [vmem:[#allocation3 + $0x258] sm:$0xff] }
  0xc0   : > { %3609 = vmatpush1.bf16.msra.mxu0 %v3608_v12  ;;  %v743_v61 = vld [vmem:[#allocation3 + $0x230] sm:$0xff]  ;;  %v752_v1 = vld [vmem:[#allocation3 + $0x278] sm:$0xff]  ;;  %v3642_v2 = vpack.c.bf16 %v766_v57, %v762_v56  ;;  %v761_v3 = vld [vmem:[#allocation3 + $0x2c0] sm:$0xff] }
  0xc1   : > { %3611 = vmatprep.subr.bf16.mxu0 %v3610_v15  ;;  %v765_v4 = vld [vmem:[#allocation3 + $0x2e0] sm:$0xff]  ;;  %v3648_v5 = vpack.c.bf16 %v743_v61, %v739_v60  ;;  %v1303_v6 = vld [vmem:[#allocation8 + $0x808] sm:$0xff]  ;;  %v3650_v8 = vpack.c.bf16 %v752_v1, %v748_v63  ;;  %v756_v12 = vld [vmem:[#allocation3 + $0x298] sm:$0xff] }
  0xc2   : > { %3625 = vmatpush1.bf16.msra.mxu1 %v3624_v45  ;;  %v1307_v7 = vld [vmem:[#allocation8 + $0x828] sm:$0xff]  ;;  %v3644_v11 = vpack.c.bf16 %v765_v4, %v761_v3  ;;  %v760_v13 = vld [vmem:[#allocation3 + $0x2b8] sm:$0xff]  ;;  %v1302_v15 = vld [vmem:[#allocation8 + $0x800] sm:$0xff] }
  0xc3   : > { %3627 = vmatprep.subr.bf16.mxu1 %v3626_v46  ;;  %v747_v9 = vld [vmem:[#allocation3 + $0x250] sm:$0xff]  ;;  %v3662_v14 = vpack.c.bf16 %v1307_v7, %v1303_v6  ;;  %v1306_v16 = vld [vmem:[#allocation8 + $0x820] sm:$0xff]  ;;  %v3654_v20 = vpack.c.bf16 %v760_v13, %v756_v12  ;;  %v768_v25 = vld [vmem:[#allocation3 + $0x2f8] sm:$0xff] }
  0xc4   : > { %3613 = vmatpush1.bf16.msra.mxu0 %v3612_v24  ;;  %v751_v10 = vld [vmem:[#allocation3 + $0x270] sm:$0xff]  ;;  %v764_v24 = vld [vmem:[#allocation3 + $0x2d8] sm:$0xff]  ;;  %v3664_v26 = vpack.c.bf16 %v1306_v16, %v1302_v15  ;;  %v1310_v28 = vld [vmem:[#allocation8 + $0x840] sm:$0xff] }
  0xc5   : > { %3631 = vmatprep.subr.bf16.mxu0 %v3630_v27  ;;  %v3652_v17 = vpack.c.bf16 %v751_v10, %v747_v9  ;;  %v1311_v18 = vld [vmem:[#allocation8 + $0x848] sm:$0xff]  ;;  %v1314_v29 = vld [vmem:[#allocation8 + $0x860] sm:$0xff]  ;;  %v3658_v33 = vpack.c.bf16 %v768_v25, %v764_v24  ;;  %v1309_v38 = vld [vmem:[#allocation8 + $0x838] sm:$0xff] }
  0xc6   : > { %3629 = vmatpush1.bf16.msra.mxu1 %v3628_v58  ;;  %v1315_v19 = vld [vmem:[#allocation8 + $0x868] sm:$0xff]  ;;  %v3668_v39 = vpack.c.bf16 %v1314_v29, %v1310_v28  ;;  %v1318_v41 = vld [vmem:[#allocation8 + $0x880] sm:$0xff]  ;;  %v1304_v47 = vld [vmem:[#allocation8 + $0x810] sm:$0xff] }
  0xc7   : > { %3472 = vmatmul.mubr.msk.f32.vlgmr.msra.gmra.mrb[0].mxu0 %vm413_vm0, %v344_v36  ;;  %3647 = vmatprep.subr.bf16.mxu1 %v3646_v59  ;;  %v755_v21 = vld [vmem:[#allocation3 + $0x290] sm:$0xff]  ;;  %v3666_v27 = vpack.c.bf16 %v1315_v19, %v1311_v18  ;;  %v1322_v42 = vld [vmem:[#allocation8 + $0x8a0] sm:$0xff]  ;;  %v1321_v61 = vld [vmem:[#allocation8 + $0x898] sm:$0xff] }
  0xc8   : > { %3633 = vmatpush1.bf16.msra.mxu0 %v3632_v37  ;;  %650 = vmatprep.mubr.f32.mxu0 %v4891_v0  ;;  %v759_v22 = vld [vmem:[#allocation3 + $0x2b0] sm:$0xff]  ;;  %v1305_v37 = vld [vmem:[#allocation8 + $0x818] sm:$0xff]  ;;  %v3672_v51 = vpack.c.bf16 %v1322_v42, %v1318_v41  ;;  %v1330_v54 = vld [vmem:[#allocation8 + $0x8e0] sm:$0xff] }
  0xc9   : > { %3635 = vmatprep.subr.bf16.mxu0 %v3634_v40  ;;  %3474 = vmatmul.mubr.msk.f32.vlgmr.msra.gmra.mrb[0].mxu1 %vm413_vm0, %v344_v36  ;;  %v734_v23 = vld [vmem:[%s5130_s14 + $0x2] sm:$0xff]  ;;  %v3656_v30 = vpack.c.bf16 %v759_v22, %v755_v21  ;;  %v735_v36 = vld [vmem:[%s5130_s14 + $0xa] sm:$0xff]  ;;  %v3790_v46 = vpack.c.bf16 %v1309_v38, %v1305_v37  ;;  %v1338_v3 = vld [vmem:[#allocation8 + $0x920] sm:$0xff]  ;;  %s3340_s14 = sshll.u32 %s338_s29, 4  ;;  %s5494_s14 = int_to_ptr.vmem [resolvable:$true] %s3340_s14 }
  0xca   : > { %3649 = vmatpush1.bf16.msra.mxu1 %v3648_v5  ;;  %727 = vmatprep.mubr.f32.mxu1 %v4891_v0  ;;  %v1319_v31 = vld [vmem:[#allocation8 + $0x888] sm:$0xff]  ;;  %v1308_v48 = vld [vmem:[#allocation8 + $0x830] sm:$0xff]  ;;  %v1329_v10 = vld [vmem:[#allocation8 + $0x8d8] sm:$0xff]  ;;  %s4808_s4 = scalar_lea.vmem %s5494_s14, 1024  ;;  %p4815_p8 = scmp.lt.s32.totalorder %s5494_s14, %s4813_s30 }
  0xcb   : > { %3473 = vmatmul.mubr.msk.f32.gmra.mrb[2].mxu0 %vm413_vm0, %v345_v50  ;;  %3651 = vmatprep.subr.bf16.mxu1 %v3650_v8  ;;  %v1323_v32 = vld [vmem:[#allocation8 + $0x8a8] sm:$0xff]  ;;  %v3792_v55 = vpack.c.bf16 %v1308_v48, %v1304_v47  ;;  %v1312_v59 = vld [vmem:[#allocation8 + $0x850] sm:$0xff]  ;;  %v1346_v15 = vld [vmem:[#allocation8 + $0x960] sm:$0xff]  ;;  %p4809_p2 = scmp.ne.s32.totalorder %s5494_s14, %s4808_s4  ;;  %p4816_p11 = scmp.lt.s32.totalorder %s4814_s21, %s4808_s4 }
  0xcc   : > { %3637 = vmatpush1.bf16.msra.mxu0 %v3636_v49  ;;  %839 = vmatprep.mubr.f32.mxu0 %v4891_v0  ;;  %v763_v34 = vld [vmem:[#allocation3 + $0x2d0] sm:$0xff]  ;;  %v3670_v40 = vpack.c.bf16 %v1323_v32, %v1319_v31  ;;  %v1313_v49 = vld [vmem:[#allocation8 + $0x858] sm:$0xff]  ;;  %v1358_v38 = vld [vmem:[#allocation8 + $0x9c0] sm:$0xff] }
  0xcd   : > { %3639 = vmatprep.subr.bf16.mxu0 %v3638_v53  ;;  %3475 = vmatmul.mubr.msk.f32.gmra.mrb[2].mxu1 %vm413_vm0, %v345_v50  ;;  %v767_v35 = vld [vmem:[#allocation3 + $0x2f0] sm:$0xff]  ;;  %v1317_v50 = vld [vmem:[#allocation8 + $0x878] sm:$0xff]  ;;  %v1326_v53 = vld [vmem:[#allocation8 + $0x8c0] sm:$0xff]  ;;  %p4810_p4 = pnand %p4809_p2, %p5574_p3  ;;  %p4817_p13 = por %p4816_p11, %p4815_p8 }
  0xce   : > { %3653 = vmatpush1.bf16.msra.mxu1 %v3652_v17  ;;  %916 = vmatprep.mubr.f32.mxu1 %v4891_v0  ;;  %v3660_v43 = vpack.c.bf16 %v767_v35, %v763_v34  ;;  %v1327_v44 = vld [vmem:[#allocation8 + $0x8c8] sm:$0xff]  ;;  %v3794_v58 = vpack.c.bf16 %v1317_v50, %v1313_v49  ;;  %v1316_v60 = vld [vmem:[#allocation8 + $0x870] sm:$0xff]  ;;  %v3676_v63 = vpack.c.bf16 %v1330_v54, %v1326_v53  ;;  %v1337_v22 = vld [vmem:[#allocation8 + $0x918] sm:$0xff] }
  0xcf   : > { %3655 = vmatprep.subr.bf16.mxu1 %v3654_v20  ;;  %v1331_v45 = vld [vmem:[#allocation8 + $0x8e8] sm:$0xff]  ;;  %v3796_v4 = vpack.c.bf16 %v1316_v60, %v1312_v59  ;;  %v1320_v8 = vld [vmem:[#allocation8 + $0x890] sm:$0xff]  ;;  %v1345_v34 = vld [vmem:[#allocation8 + $0x958] sm:$0xff]  ;;  %p4811_p7 = pneg %p4810_p4 }
  0xd0   : > { %3641 = vmatpush1.bf16.msra.mxu0 %v3640_v62  ;;  %v3674_v52 = vpack.c.bf16 %v1331_v45, %v1327_v44  ;;  %v1335_v56 = vld [vmem:[#allocation8 + $0x908] sm:$0xff]  ;;  %v1325_v62 = vld [vmem:[#allocation8 + $0x8b8] sm:$0xff]  ;;  %v1324_v9 = vld [vmem:[#allocation8 + $0x8b0] sm:$0xff] }
  0xd1   : > { %3643 = vmatprep.subr.bf16.mxu0 %v3642_v2  ;;  %v1339_v57 = vld [vmem:[#allocation8 + $0x928] sm:$0xff]  ;;  %v1334_v2 = vld [vmem:[#allocation8 + $0x900] sm:$0xff]  ;;  %v3798_v7 = vpack.c.bf16 %v1325_v62, %v1321_v61  ;;  %v3800_v16 = vpack.c.bf16 %v1324_v9, %v1320_v8  ;;  %v1328_v20 = vld [vmem:[#allocation8 + $0x8d0] sm:$0xff]  ;;  %p4818_p1 = pnand %p4817_p13, %p4811_p7 }
  0xd2   : > { %3657 = vmatpush1.bf16.msra.mxu1 %v3656_v30  ;;  %v3678_v1 = vpack.c.bf16 %v1339_v57, %v1335_v56  ;;  %v1343_v5 = vld [vmem:[#allocation8 + $0x948] sm:$0xff]  ;;  %v3680_v12 = vpack.c.bf16 %v1338_v3, %v1334_v2  ;;  %v1332_v21 = vld [vmem:[#allocation8 + $0x8f0] sm:$0xff]  ;;  %v1349_v35 = vld [vmem:[#allocation8 + $0x978] sm:$0xff] }
  0xd3   : > { %3659 = vmatprep.subr.bf16.mxu1 %v3658_v33  ;;  %v1347_v6 = vld [vmem:[#allocation8 + $0x968] sm:$0xff]  ;;  %v3804_v28 = vpack.c.bf16 %v1332_v21, %v1328_v20  ;;  %v1336_v32 = vld [vmem:[#allocation8 + $0x910] sm:$0xff]  ;;  %v1357_v47 = vld [vmem:[#allocation8 + $0x9b8] sm:$0xff] }
  0xd4   : > { %3645 = vmatpush1.bf16.msra.mxu0 %v3644_v11  ;;  %v1333_v11 = vld [vmem:[#allocation8 + $0x8f8] sm:$0xff]  ;;  %v3682_v13 = vpack.c.bf16 %v1347_v6, %v1343_v5  ;;  %v1351_v17 = vld [vmem:[#allocation8 + $0x988] sm:$0xff]  ;;  %v1340_v33 = vld [vmem:[#allocation8 + $0x930] sm:$0xff] }
  0xd5   : > { %3663 = vmatprep.subr.bf16.mxu0 %v3662_v14  ;;  %v1342_v14 = vld [vmem:[#allocation8 + $0x940] sm:$0xff]  ;;  %v1355_v18 = vld [vmem:[#allocation8 + $0x9a8] sm:$0xff]  ;;  %v3802_v19 = vpack.c.bf16 %v1333_v11, %v1329_v10  ;;  %v1344_v44 = vld [vmem:[#allocation8 + $0x950] sm:$0xff] }
  0xd6   : > { %3661 = vmatpush1.bf16.msra.mxu1 %v3660_v43  ;;  %v3684_v24 = vpack.c.bf16 %v1346_v15, %v1342_v14  ;;  %v3686_v25 = vpack.c.bf16 %v1355_v18, %v1351_v17  ;;  %v1359_v29 = vld [vmem:[#allocation8 + $0x9c8] sm:$0xff]  ;;  %v3810_v43 = vpack.c.bf16 %v1349_v35, %v1345_v34  ;;  %v1348_v45 = vld [vmem:[#allocation8 + $0x970] sm:$0xff]  ;;  %v1366_v50 = vld [vmem:[#allocation8 + $0xa00] sm:$0xff] }
  0xd7   : > { %3476 = vmatmul.mubr.msk.f32.vlgmr.msra.gmra.mrb[0].mxu0 %vm413_vm0, %v734_v23  ;;  %3791 = vmatprep.subr.bf16.mxu1 %v3790_v46  ;;  %v1363_v30 = vld [vmem:[#allocation8 + $0x9e8] sm:$0xff]  ;;  %v1353_v46 = vld [vmem:[#allocation8 + $0x998] sm:$0xff]  ;;  %v1352_v56 = vld [vmem:[#allocation8 + $0x990] sm:$0xff] }
  0xd8   : > { %845 = vmatprep.mubr.f32.mxu0 %v4891_v0  ;;  %3665 = vmatpush1.bf16.msra.mxu0 %v3664_v26  ;;  %v1350_v26 = vld [vmem:[#allocation8 + $0x980] sm:$0xff]  ;;  %v3690_v37 = vpack.c.bf16 %v1363_v30, %v1359_v29  ;;  %v1367_v41 = vld [vmem:[#allocation8 + $0xa08] sm:$0xff]  ;;  %v1356_v57 = vld [vmem:[#allocation8 + $0x9b0] sm:$0xff] }
  0xd9   : > { %3667 = vmatprep.subr.bf16.mxu0 %v3666_v27  ;;  %3478 = vmatmul.mubr.msk.f32.vlgmr.msra.gmra.mrb[0].mxu1 %vm413_vm0, %v734_v23  ;;  %v1341_v23 = vld [vmem:[#allocation8 + $0x938] sm:$0xff]  ;;  %v1354_v27 = vld [vmem:[#allocation8 + $0x9a0] sm:$0xff]  ;;  %v1371_v42 = vld [vmem:[#allocation8 + $0xa28] sm:$0xff] }
  0xda   : > { %922 = vmatprep.mubr.f32.mxu1 %v4891_v0  ;;  %3793 = vmatpush1.bf16.msra.mxu1 %v3792_v55  ;;  %v3806_v31 = vpack.c.bf16 %v1341_v23, %v1337_v22  ;;  %v3694_v49 = vpack.c.bf16 %v1371_v42, %v1367_v41  ;;  %v1375_v53 = vld [vmem:[#allocation8 + $0xa48] sm:$0xff]  ;;  %v3814_v55 = vpack.c.bf16 %v1357_v47, %v1353_v46  ;;  %v1365_v59 = vld [vmem:[#allocation8 + $0x9f8] sm:$0xff]  ;;  %v1374_v62 = vld [vmem:[#allocation8 + $0xa40] sm:$0xff] }
  0xdb   : > { %3477 = vmatmul.mubr.msk.f32.gmra.mrb[2].mxu0 %vm413_vm0, %v735_v36  ;;  %3795 = vmatprep.subr.bf16.mxu1 %v3794_v58  ;;  %v1379_v54 = vld [vmem:[#allocation8 + $0xa68] sm:$0xff]  ;;  %v1361_v58 = vld [vmem:[#allocation8 + $0x9d8] sm:$0xff]  ;;  %v1360_v3 = vld [vmem:[#allocation8 + $0x9d0] sm:$0xff] }
  0xdc   : > { %3669 = vmatpush1.bf16.msra.mxu0 %v3668_v39  ;;  %v1362_v39 = vld [vmem:[#allocation8 + $0x9e0] sm:$0xff]  ;;  %v3698_v61 = vpack.c.bf16 %v1379_v54, %v1375_v53  ;;  %v3818_v2 = vpack.c.bf16 %v1365_v59, %v1361_v58  ;;  %v1369_v5 = vld [vmem:[#allocation8 + $0xa18] sm:$0xff]  ;;  %v1368_v10 = vld [vmem:[#allocation8 + $0xa10] sm:$0xff] }
  0xdd   : > { %3671 = vmatprep.subr.bf16.mxu0 %v3670_v40  ;;  %3479 = vmatmul.mubr.msk.f32.gmra.mrb[2].mxu1 %vm413_vm0, %v735_v36  ;;  %v3688_v36 = vpack.c.bf16 %v1354_v27, %v1350_v26  ;;  %v3808_v40 = vpack.c.bf16 %v1340_v33, %v1336_v32  ;;  %v3692_v48 = vpack.c.bf16 %v1362_v39, %v1358_v38  ;;  %v1373_v6 = vld [vmem:[#allocation8 + $0xa38] sm:$0xff]  ;;  %v1372_v11 = vld [vmem:[#allocation8 + $0xa30] sm:$0xff]  ;;  %v1387_v20 = vld [vmem:[#allocation8 + $0xaa8] sm:$0xff] }
  0xde   : > { %3797 = vmatpush1.bf16.msra.mxu1 %v3796_v4  ;;  %v1364_v4 = vld [vmem:[#allocation8 + $0x9f0] sm:$0xff]  ;;  %v3822_v9 = vpack.c.bf16 %v1373_v6, %v1369_v5  ;;  %v3824_v14 = vpack.c.bf16 %v1372_v11, %v1368_v10  ;;  %v1385_v21 = vld [vmem:[#allocation8 + $0xa98] sm:$0xff]  ;;  %v1395_v32 = vld [vmem:[#allocation8 + $0xae8] sm:$0xff] }
  0xdf   : > { %3799 = vmatprep.subr.bf16.mxu1 %v3798_v7  ;;  %v3820_v8 = vpack.c.bf16 %v1364_v4, %v1360_v3  ;;  %v1380_v17 = vld [vmem:[#allocation8 + $0xa70] sm:$0xff]  ;;  %v1389_v23 = vld [vmem:[#allocation8 + $0xab8] sm:$0xff]  ;;  %v1415_v5 = vld [vmem:[#allocation8 + $0xb88] sm:$0xff] }
  0xe0   : > { %3673 = vmatpush1.bf16.msra.mxu0 %v3672_v51  ;;  %v1370_v51 = vld [vmem:[#allocation8 + $0xa20] sm:$0xff]  ;;  %v3830_v26 = vpack.c.bf16 %v1389_v23, %v1385_v21  ;;  %v1388_v29 = vld [vmem:[#allocation8 + $0xab0] sm:$0xff]  ;;  %v1393_v33 = vld [vmem:[#allocation8 + $0xad8] sm:$0xff] }
  0xe1   : > { %3675 = vmatprep.subr.bf16.mxu0 %v3674_v52  ;;  %v3812_v52 = vpack.c.bf16 %v1348_v45, %v1344_v44  ;;  %v3696_v60 = vpack.c.bf16 %v1370_v51, %v1366_v50  ;;  %v1397_v35 = vld [vmem:[#allocation8 + $0xaf8] sm:$0xff]  ;;  %v1396_v41 = vld [vmem:[#allocation8 + $0xaf0] sm:$0xff]  ;;  %v1403_v44 = vld [vmem:[#allocation8 + $0xb28] sm:$0xff] }
  0xe2   : > { %3801 = vmatpush1.bf16.msra.mxu1 %v3800_v16  ;;  %v1376_v16 = vld [vmem:[#allocation8 + $0xa50] sm:$0xff]  ;;  %v3834_v38 = vpack.c.bf16 %v1397_v35, %v1393_v33  ;;  %v1401_v45 = vld [vmem:[#allocation8 + $0xb18] sm:$0xff]  ;;  %v1419_v6 = vld [vmem:[#allocation8 + $0xba8] sm:$0xff] }
  0xe3   : > { %3803 = vmatprep.subr.bf16.mxu1 %v3802_v19  ;;  %v3828_v18 = vpack.c.bf16 %v1380_v17, %v1376_v16  ;;  %v1383_v19 = vld [vmem:[#allocation8 + $0xa88] sm:$0xff]  ;;  %v1405_v47 = vld [vmem:[#allocation8 + $0xb38] sm:$0xff]  ;;  %v1404_v53 = vld [vmem:[#allocation8 + $0xb30] sm:$0xff] }
  0xe4   : > { %3677 = vmatpush1.bf16.msra.mxu0 %v3676_v63  ;;  %v1378_v63 = vld [vmem:[#allocation8 + $0xa60] sm:$0xff]  ;;  %v3702_v22 = vpack.c.bf16 %v1387_v20, %v1383_v19  ;;  %v3838_v50 = vpack.c.bf16 %v1405_v47, %v1401_v45  ;;  %v1413_v59 = vld [vmem:[#allocation8 + $0xb78] sm:$0xff]  ;;  %v1412_v3 = vld [vmem:[#allocation8 + $0xb70] sm:$0xff] }
  0xe5   : > { %3679 = vmatprep.subr.bf16.mxu0 %v3678_v1  ;;  %v3816_v1 = vpack.c.bf16 %v1356_v57, %v1352_v56  ;;  %v3700_v7 = vpack.c.bf16 %v1378_v63, %v1374_v62  ;;  %v1411_v56 = vld [vmem:[#allocation8 + $0xb68] sm:$0xff]  ;;  %v1409_v57 = vld [vmem:[#allocation8 + $0xb58] sm:$0xff]  ;;  %v939_v62 = vlaneseq  ;;  %v1414_v10 = vld [vmem:[#allocation8 + $0xb80] sm:$0xff] }
  0xe6   : > { %3805 = vmatpush1.bf16.msra.mxu1 %v3804_v28  ;;  %v1384_v28 = vld [vmem:[#allocation8 + $0xa90] sm:$0xff]  ;;  %v3842_v63 = vpack.c.bf16 %v1413_v59, %v1409_v57  ;;  %v1418_v11 = vld [vmem:[#allocation8 + $0xba0] sm:$0xff]  ;;  %v1423_v17 = vld [vmem:[#allocation8 + $0xbc8] sm:$0xff] }
  0xe7   : > { %3807 = vmatprep.subr.bf16.mxu1 %v3806_v31  ;;  %v3832_v30 = vpack.c.bf16 %v1388_v29, %v1384_v28  ;;  %v1391_v31 = vld [vmem:[#allocation8 + $0xac8] sm:$0xff]  ;;  %vm977_vm1 = vcmp.lt.s32.totalorder %v939_v62, 512  ;;  %v1425_v19 = vld [vmem:[#allocation8 + $0xbd8] sm:$0xff]  ;;  %v1426_v23 = vld [vmem:[#allocation8 + $0xbe0] sm:$0xff]  ;;  %v5166_v35 = vshrl.u32 %v939_v62, 7 }
  0xe8   : > { %3681 = vmatpush1.bf16.msra.mxu0 %v3680_v12  ;;  %v1377_v12 = vld [vmem:[#allocation8 + $0xa58] sm:$0xff]  ;;  %v3706_v34 = vpack.c.bf16 %v1395_v32, %v1391_v31  ;;  %979 = vst.msk [vmem:[#allocation2] ss:$8 sm:$0xf] %vm977_vm1, %v4891_v0  ;;  %v1431_v29 = vld [vmem:[#allocation8 + $0xc08] sm:$0xff] }
  0xe9   : > { %3683 = vmatprep.subr.bf16.mxu0 %v3682_v13  ;;  %v1381_v13 = vld [vmem:[#allocation8 + $0xa78] sm:$0xff]  ;;  %982 = vst.msk [vmem:[#allocation2 + $0x41] ss:$8 sm:$0xf] %vm977_vm1, %v4891_v0 }
  0xea   : > { %3809 = vmatpush1.bf16.msra.mxu1 %v3808_v40  ;;  %v3826_v15 = vpack.c.bf16 %v1381_v13, %v1377_v12  ;;  %v1392_v40 = vld [vmem:[#allocation8 + $0xad0] sm:$0xff]  ;;  %v3720_v13 = vpack.c.bf16 %v1418_v11, %v1414_v10  ;;  %v1429_v21 = vld [vmem:[#allocation8 + $0xbf8] sm:$0xff]  ;;  %v1443_v11 = vld [vmem:[#allocation8 + $0xc68] sm:$0xff] }
  0xeb   : > { %3811 = vmatprep.subr.bf16.mxu1 %v3810_v43  ;;  %v3836_v42 = vpack.c.bf16 %v1396_v41, %v1392_v40  ;;  %v1399_v43 = vld [vmem:[#allocation8 + $0xb08] sm:$0xff]  ;;  %v1433_v31 = vld [vmem:[#allocation8 + $0xc18] sm:$0xff] }
  0xec   : > { %3685 = vmatpush1.bf16.msra.mxu0 %v3684_v24  ;;  %v1382_v24 = vld [vmem:[#allocation8 + $0xa80] sm:$0xff]  ;;  %v3710_v46 = vpack.c.bf16 %v1403_v44, %v1399_v43  ;;  %v1437_v33 = vld [vmem:[#allocation8 + $0xc38] sm:$0xff] }
  0xed   : > { %3687 = vmatprep.subr.bf16.mxu0 %v3686_v25  ;;  %v1386_v25 = vld [vmem:[#allocation8 + $0xaa0] sm:$0xff] }
  0xee   : > { %3813 = vmatpush1.bf16.msra.mxu1 %v3812_v52  ;;  %v3704_v27 = vpack.c.bf16 %v1386_v25, %v1382_v24  ;;  %v1400_v52 = vld [vmem:[#allocation8 + $0xb10] sm:$0xff]  ;;  %v3850_v24 = vpack.c.bf16 %v1429_v21, %v1425_v19 }
  0xef   : > { %3815 = vmatprep.subr.bf16.mxu1 %v3814_v55  ;;  %v3840_v54 = vpack.c.bf16 %v1404_v53, %v1400_v52  ;;  %v1407_v55 = vld [vmem:[#allocation8 + $0xb48] sm:$0xff] }
  0xf0   : > { %3689 = vmatpush1.bf16.msra.mxu0 %v3688_v36  ;;  %v1390_v36 = vld [vmem:[#allocation8 + $0xac0] sm:$0xff]  ;;  %v3714_v58 = vpack.c.bf16 %v1411_v56, %v1407_v55 }
  0xf1   : > { %3691 = vmatprep.subr.bf16.mxu0 %v3690_v37  ;;  %v1394_v37 = vld [vmem:[#allocation8 + $0xae0] sm:$0xff] }
  0xf2   : > { %3817 = vmatpush1.bf16.msra.mxu1 %v3816_v1  ;;  %v3708_v39 = vpack.c.bf16 %v1394_v37, %v1390_v36  ;;  %v5169_v36 = vsub.s32 0, %v5166_v35  ;;  %v937_v37 = vld [vmem:[#allocation6] sm:$0xf] }
  0xf3   : > { %3819 = vmatprep.subr.bf16.mxu1 %v3818_v2  ;;  %v1408_v2 = vld [vmem:[#allocation8 + $0xb50] sm:$0xff] }
  0xf4   : > { %3693 = vmatpush1.bf16.msra.mxu0 %v3692_v48  ;;  %v1398_v48 = vld [vmem:[#allocation8 + $0xb00] sm:$0xff]  ;;  %v3844_v4 = vpack.c.bf16 %v1412_v3, %v1408_v2 }
  0xf5   : > { %3695 = vmatprep.subr.bf16.mxu0 %v3694_v49  ;;  %v1402_v49 = vld [vmem:[#allocation8 + $0xb20] sm:$0xff] }
  0xf6   : > { %3821 = vmatpush1.bf16.msra.mxu1 %v3820_v8  ;;  %v3712_v51 = vpack.c.bf16 %v1402_v49, %v1398_v48  ;;  %v3718_v8 = vpack.c.bf16 %v1419_v6, %v1415_v5  ;;  %v953_v49 = vsub.s32 3, %v5166_v35  ;;  %v1430_v3 = vld [vmem:[#allocation8 + $0xc00] sm:$0xff]  ;;  %v1432_v6 = vld [vmem:[#allocation8 + $0xc10] sm:$0xff] }
  0xf7   : > { %3823 = vmatprep.subr.bf16.mxu1 %v3822_v9  ;;  %v1421_v9 = vld [vmem:[#allocation8 + $0xbb8] sm:$0xff] }
  0xf8   : > { %3697 = vmatpush1.bf16.msra.mxu0 %v3696_v60  ;;  %v1406_v60 = vld [vmem:[#allocation8 + $0xb40] sm:$0xff] }
  0xf9   : > { %3699 = vmatprep.subr.bf16.mxu0 %v3698_v61  ;;  %v1410_v61 = vld [vmem:[#allocation8 + $0xb60] sm:$0xff] }
  0xfa   : > { %3825 = vmatpush1.bf16.msra.mxu1 %v3824_v14  ;;  %v3716_v1 = vpack.c.bf16 %v1410_v61, %v1406_v60  ;;  %v1416_v14 = vld [vmem:[#allocation8 + $0xb90] sm:$0xff] }
  0xfb   : > { %3827 = vmatprep.subr.bf16.mxu1 %v3826_v15  ;;  %v1420_v15 = vld [vmem:[#allocation8 + $0xbb0] sm:$0xff] }
  0xfc   : > { %3701 = vmatpush1.bf16.msra.mxu0 %v3700_v7  ;;  %v1417_v7 = vld [vmem:[#allocation8 + $0xb98] sm:$0xff]  ;;  %v3848_v16 = vpack.c.bf16 %v1420_v15, %v1416_v14 }
  0xfd   : > { %3703 = vmatprep.subr.bf16.mxu0 %v3702_v22  ;;  %v3846_v12 = vpack.c.bf16 %v1421_v9, %v1417_v7  ;;  %v1422_v22 = vld [vmem:[#allocation8 + $0xbc0] sm:$0xff]  ;;  %v1436_v7 = vld [vmem:[#allocation8 + $0xc30] sm:$0xff] }
  0xfe   : > { %3829 = vmatpush1.bf16.msra.mxu1 %v3828_v18  ;;  %v1427_v18 = vld [vmem:[#allocation8 + $0xbe8] sm:$0xff]  ;;  %v3724_v25 = vpack.c.bf16 %v1426_v23, %v1422_v22  ;;  %v1438_v23 = vld [vmem:[#allocation8 + $0xc40] sm:$0xff] }
  0xff   : > { %3831 = vmatprep.subr.bf16.mxu1 %v3830_v26  ;;  %v3722_v20 = vpack.c.bf16 %v1427_v18, %v1423_v17  ;;  %v1424_v26 = vld [vmem:[#allocation8 + $0xbd0] sm:$0xff]  ;;  %v1445_v17 = vld [vmem:[#allocation8 + $0xc78] sm:$0xff] }
 0x100   : > { %3705 = vmatpush1.bf16.msra.mxu0 %v3704_v27  ;;  %v1428_v27 = vld [vmem:[#allocation8 + $0xbf0] sm:$0xff] }
 0x101   : > { %3707 = vmatprep.subr.bf16.mxu0 %v3706_v34  ;;  %v3852_v28 = vpack.c.bf16 %v1428_v27, %v1424_v26  ;;  %v3854_v34 = vpack.c.bf16 %v1437_v33, %v1433_v31  ;;  %v1444_v31 = vld [vmem:[#allocation8 + $0xc70] sm:$0xff] }
 0x102   : > { %3833 = vmatpush1.bf16.msra.mxu1 %v3832_v30  ;;  %v1435_v30 = vld [vmem:[#allocation8 + $0xc28] sm:$0xff] }
 0x103   : > { %3835 = vmatprep.subr.bf16.mxu1 %v3834_v38  ;;  %v3726_v32 = vpack.c.bf16 %v1435_v30, %v1431_v29  ;;  %v945_v38 = vsub.s32 1, %v5166_v35  ;;  %v1442_v29 = vld [vmem:[#allocation8 + $0xc60] sm:$0xff]  ;;  %v1440_v30 = vld [vmem:[#allocation8 + $0xc50] sm:$0xff] }
 0x104   : > { %3709 = vmatpush1.bf16.msra.mxu0 %v3708_v39  ;;  %v942_v39 = vrot.slane %v937_v37, %v5169_v36 }
 0x105   : > { %3711 = vmatprep.subr.bf16.mxu0 %v3710_v46  ;;  %v946_v40 = vrot.slane %v937_v37, %v945_v38  ;;  %v949_v46 = vsub.s32 2, %v5166_v35 }
 0x106   : > { %3837 = vmatpush1.bf16.msra.mxu1 %v3836_v42 }
 0x107   : > { %3839 = vmatprep.subr.bf16.mxu1 %v3838_v50  ;;  %v950_v56 = vrot.slane %v937_v37, %v949_v46 }
 0x108   : > { %3713 = vmatpush1.bf16.msra.mxu0 %v3712_v51 }
 0x109   : > { %3715 = vmatprep.subr.bf16.mxu0 %v3714_v58  ;;  %v954_v58 = vrot.slane %v937_v37, %v953_v49 }
 0x10a   : > { %3841 = vmatpush1.bf16.msra.mxu1 %v3840_v54 }
 0x10b   : > { %3843 = vmatprep.subr.bf16.mxu1 %v3842_v63 }
 0x10c   : > { %3717 = vmatpush1.bf16.msra.mxu0 %v3716_v1 }
 0x10d   : > { %3719 = vmatprep.subr.bf16.mxu0 %v3718_v8  ;;  %v1439_v8 = vld [vmem:[#allocation8 + $0xc48] sm:$0xff] }
 0x10e   : > { %3845 = vmatpush1.bf16.msra.mxu1 %v3844_v4  ;;  %v1434_v4 = vld [vmem:[#allocation8 + $0xc20] sm:$0xff] }
 0x10f   : > { %3847 = vmatprep.subr.bf16.mxu1 %v3846_v12  ;;  %v1441_v12 = vld [vmem:[#allocation8 + $0xc58] sm:$0xff]  ;;  %v3728_v27 = vpack.c.bf16 %v1434_v4, %v1430_v3  ;;  %v1459_v3 = vld [vmem:[#allocation8 + $0xce8] sm:$0xff] }
 0x110   : > { %3721 = vmatpush1.bf16.msra.mxu0 %v3720_v13  ;;  %v3858_v37 = vpack.c.bf16 %v1445_v17, %v1441_v12  ;;  %v1457_v4 = vld [vmem:[#allocation8 + $0xcd8] sm:$0xff] }
 0x111   : > { %3723 = vmatprep.subr.bf16.mxu0 %v3722_v20 }
 0x112   : > { %3849 = vmatpush1.bf16.msra.mxu1 %v3848_v16 }
 0x113   : > { %3851 = vmatprep.subr.bf16.mxu1 %v3850_v24 }
 0x114   : > { %3725 = vmatpush1.bf16.msra.mxu0 %v3724_v25 }
 0x115   : > { %3727 = vmatprep.subr.bf16.mxu0 %v3726_v32 }
 0x116   : > { %3853 = vmatpush1.bf16.msra.mxu1 %v3852_v28  ;;  %v3856_v28 = vpack.c.bf16 %v1436_v7, %v1432_v6 }
 0x117   : > { %3855 = vmatprep.subr.bf16.mxu1 %v3854_v34  ;;  %v3730_v34 = vpack.c.bf16 %v1443_v11, %v1439_v8 }
 0x1aa   : > { %v841_v41 = vpop.f32.mrb[0].mxu0 }
 0x1ab   : > { %v959_v42 = vadd.f32 %v942_v39, %v841_v41  ;;  %v843_v43 = vpop.f32.mrb[1].mxu0  ;;  %v1447_v41 = vld [vmem:[#allocation8 + $0xc88] sm:$0xff] }
 0x1ac   : > { %v960_v44 = vadd.f32 %v946_v40, %v843_v43  ;;  %v918_v61 = vpop.f32.mrb[0].mxu1 }
 0x1ad   : > { %v967_v45 = vmax.f32 %v959_v42, 0.0  ;;  %v961_v63 = vadd.f32 %v950_v56, %v918_v61  ;;  %v920_v1 = vpop.f32.mrb[1].mxu1  ;;  %v1451_v42 = vld [vmem:[#allocation8 + $0xca8] sm:$0xff] }
 0x1ae   : > { %v968_v47 = vmax.f32 %v960_v44, 0.0  ;;  %v847_v48 = vpop.f32.mrb[2].mxu0  ;;  %v962_v5 = vadd.f32 %v954_v58, %v920_v1  ;;  %v1455_v1 = vld [vmem:[#allocation8 + $0xcc8] sm:$0xff] }
 0x1af   : > { %v993_v50 = vrot.slane %v967_v45, 7  ;;  %v963_v51 = vadd.f32 %v942_v39, %v847_v48  ;;  %v849_v52 = vpop.f32.mrb[3].mxu0  ;;  %v969_v9 = vmax.f32 %v961_v63, 0.0  ;;  %v1449_v48 = vld [vmem:[#allocation8 + $0xc98] sm:$0xff]  ;;  %v1452_v63 = vld [vmem:[#allocation8 + $0xcb0] sm:$0xff]  ;;  %v3738_v12 = vpack.c.bf16 %v1459_v3, %v1455_v1 }
 0x1b0   : > { %v994_v53 = vrot.slane %v968_v47, 7  ;;  %v964_v54 = vadd.f32 %v946_v40, %v849_v52  ;;  %v970_v13 = vmax.f32 %v962_v5, 0.0  ;;  %v924_v14 = vpop.f32.mrb[2].mxu1  ;;  %v3732_v52 = vpack.c.bf16 %v1442_v29, %v1438_v23  ;;  %v1461_v5 = vld [vmem:[#allocation8 + $0xcf8] sm:$0xff]  ;;  %v1468_v29 = vld [vmem:[#allocation8 + $0xd30] sm:$0xff] }
 0x1b1   : > { %1017 = vst [vmem:[#allocation2] sm:$0xfe] %v993_v50  ;;  %v971_v55 = vmax.f32 %v963_v51, 0.0  ;;  %v995_v18 = vrot.slane %v969_v9, 7  ;;  %v965_v19 = vadd.f32 %v950_v56, %v924_v14  ;;  %v926_v20 = vpop.f32.mrb[3].mxu1  ;;  %v3734_v56 = vpack.c.bf16 %v1451_v42, %v1447_v41  ;;  %v1454_v9 = vld [vmem:[#allocation8 + $0xcc0] sm:$0xff] }
 0x1b2   : > { %1018 = vst [vmem:[#allocation2 + $0x8] sm:$0xfe] %v994_v53  ;;  %v972_v57 = vmax.f32 %v964_v54, 0.0  ;;  %v996_v24 = vrot.slane %v970_v13, 7  ;;  %v966_v25 = vadd.f32 %v954_v58, %v926_v20  ;;  %v3860_v54 = vpack.c.bf16 %v1444_v31, %v1440_v30  ;;  %v1450_v58 = vld [vmem:[#allocation8 + $0xca0] sm:$0xff]  ;;  %v1456_v14 = vld [vmem:[#allocation8 + $0xcd0] sm:$0xff] }
 0x1b3   : > { %v997_v59 = vrot.slane %v971_v55, 7  ;;  %1019 = vst [vmem:[#allocation2 + $0x10] sm:$0xfe] %v995_v18  ;;  %v973_v32 = vmax.f32 %v965_v19, 0.0  ;;  %v3866_v13 = vpack.c.bf16 %v1461_v5, %v1457_v4  ;;  %v1465_v19 = vld [vmem:[#allocation8 + $0xd18] sm:$0xff]  ;;  %v1471_v30 = vld [vmem:[#allocation8 + $0xd48] sm:$0xff] }
 0x1b4   : > { %v999_v60 = vrot.slane %v972_v57, 7  ;;  %1020 = vst [vmem:[#allocation2 + $0x18] sm:$0xfe] %v996_v24  ;;  %v974_v40 = vmax.f32 %v966_v25, 0.0  ;;  %v1446_v57 = vld [vmem:[#allocation8 + $0xc80] sm:$0xff]  ;;  %v1469_v20 = vld [vmem:[#allocation8 + $0xd38] sm:$0xff] }
 0x1b5   : > { %v5182_v62 = vsel %vm992_vm2, %v993_v50, %v997_v59  ;;  %1025 = vst [vmem:[#allocation2 + $0x40] sm:$0x1] %v997_v59  ;;  %v1001_v47 = vrot.slane %v973_v32, 7  ;;  %v1453_v50 = vld [vmem:[#allocation8 + $0xcb8] sm:$0xff]  ;;  %v3736_v7 = vpack.c.bf16 %v1450_v58, %v1446_v57  ;;  %v1466_v25 = vld [vmem:[#allocation8 + $0xd20] sm:$0xff]  ;;  %v1475_v31 = vld [vmem:[#allocation8 + $0xd68] sm:$0xff] }
 0x1b6   : > { %1021 = vst [vmem:[#allocation2 + $0x20] sm:$0xff] %v5182_v62  ;;  %v5186_v2 = vsel %vm992_vm2, %v994_v53, %v999_v60  ;;  %1026 = vst [vmem:[#allocation2 + $0x48] sm:$0x1] %v999_v60  ;;  %v1572_v26 = vrot.slane %v5182_v62, 1  ;;  %v1003_v53 = vrot.slane %v974_v40, 7  ;;  %v3862_v61 = vpack.c.bf16 %v1453_v50, %v1449_v48  ;;  %v1448_v62 = vld [vmem:[#allocation8 + $0xc90] sm:$0xff] }
 0x1b7   : > { %1022 = vst [vmem:[#allocation2 + $0x28] sm:$0xff] %v5186_v2  ;;  %v1575_v22 = vrot.slane %v5186_v2, 1  ;;  %v5194_v55 = vsel %vm992_vm2, %v995_v18, %v1001_v47  ;;  %1027 = vst [vmem:[#allocation2 + $0x50] sm:$0x1] %v1001_v47  ;;  %v3864_v8 = vpack.c.bf16 %v1452_v63, %v1448_v62  ;;  %v1467_v18 = vld [vmem:[#allocation8 + $0xd28] sm:$0xff]  ;;  %v1473_v32 = vld [vmem:[#allocation8 + $0xd58] sm:$0xff]  ;;  %v3746_v41 = vpack.c.bf16 %v1475_v31, %v1471_v30 }
 0x1b8   : > { %v1293_v10 = vld [vmem:[#allocation2] sm:$0xfe]  ;;  %1023 = vst [vmem:[#allocation2 + $0x30] sm:$0xff] %v5194_v55  ;;  %v5199_v60 = vsel %vm992_vm2, %v996_v24, %v1003_v53  ;;  %1028 = vst [vmem:[#allocation2 + $0x58] sm:$0x1] %v1003_v53  ;;  %v1483_v47 = vld [vmem:[#allocation8 + $0xda8] sm:$0xff] }
 0x1b9   : > { %v1294_v15 = vld [vmem:[#allocation2 + $0x8] sm:$0xfe]  ;;  %v1571_v16 = vrot.slane %v1293_v10, 1  ;;  %1024 = vst [vmem:[#allocation2 + $0x38] sm:$0xff] %v5199_v60  ;;  %v1581_v6 = vrot.slane %v5199_v60, 1  ;;  %v1481_v48 = vld [vmem:[#allocation8 + $0xd98] sm:$0xff] }
 0x1ba   : > { %v1574_v21 = vrot.slane %v1294_v15, 1  ;;  %v1458_v10 = vld [vmem:[#allocation8 + $0xce0] sm:$0xff]  ;;  %v1460_v15 = vld [vmem:[#allocation8 + $0xcf0] sm:$0xff]  ;;  %v1485_v50 = vld [vmem:[#allocation8 + $0xdb8] sm:$0xff] }
 0x1bb   : > { %v1573_v43 = vsel %vm1570_vm3, %v1571_v16, %v1572_v26  ;;  %v1296_v11 = vld [vmem:[#allocation2 + $0x18] sm:$0xfe]  ;;  %v1463_v16 = vld [vmem:[#allocation8 + $0xd08] sm:$0xff]  ;;  %v3868_v23 = vpack.c.bf16 %v1460_v15, %v1456_v14  ;;  %v1462_v24 = vld [vmem:[#allocation8 + $0xd00] sm:$0xff]  ;;  %v3878_v57 = vpack.c.bf16 %v1485_v50, %v1481_v48 }
 0x1bc   : > { %v1576_v33 = vsel %vm1570_vm3, %v1574_v21, %v1575_v22  ;;  %v1297_v39 = vld [vmem:[#allocation2 + $0x40] sm:$0x1]  ;;  %v1580_v17 = vrot.slane %v1296_v11, 1  ;;  %v1474_v40 = vld [vmem:[#allocation8 + $0xd60] sm:$0xff]  ;;  %v1480_v58 = vld [vmem:[#allocation8 + $0xd90] sm:$0xff] }
 0x1bd   : > { %1663 = vmatprep.mubr.f32.mxu0 %v1576_v33  ;;  %1817 = vmatprep.mubr.f32.mxu1 %v1576_v33  ;;  %v1298_v44 = vld [vmem:[#allocation2 + $0x48] sm:$0x1]  ;;  %v1583_v45 = vrot.slane %v1297_v39, 1  ;;  %v1477_v33 = vld [vmem:[#allocation8 + $0xd78] sm:$0xff]  ;;  %v1491_v62 = vld [vmem:[#allocation8 + $0xde8] sm:$0xff] }
 0x1be   : > { %1664 = vmatmul.mubr.f32.vlgmr.msra.gmra.mrb[4].mxu0 %v1573_v43  ;;  %1818 = vmatmul.mubr.f32.vlgmr.msra.gmra.mrb[4].mxu1 %v1573_v43  ;;  %v1585_v51 = vrot.slane %v1298_v44, 1  ;;  %v1582_v21 = vsel %vm1570_vm3, %v1580_v17, %v1581_v6  ;;  %v1470_v39 = vld [vmem:[#allocation8 + $0xd40] sm:$0xff]  ;;  %v3874_v42 = vpack.c.bf16 %v1477_v33, %v1473_v32  ;;  %v1472_v43 = vld [vmem:[#allocation8 + $0xd50] sm:$0xff]  ;;  %v1489_v63 = vld [vmem:[#allocation8 + $0xdd8] sm:$0xff] }
 0x1bf   : > { %3729 = vmatpush1.bf16.msra.mxu0 %v3728_v27  ;;  %3857 = vmatpush1.bf16.msra.mxu1 %v3856_v28  ;;  %v1584_v2 = vsel %vm1570_vm3, %v1572_v26, %v1583_v45  ;;  %v3742_v26 = vpack.c.bf16 %v1467_v18, %v1463_v16  ;;  %v3870_v27 = vpack.c.bf16 %v1469_v20, %v1465_v19  ;;  %v1464_v28 = vld [vmem:[#allocation8 + $0xd10] sm:$0xff]  ;;  %v1479_v45 = vld [vmem:[#allocation8 + $0xd88] sm:$0xff]  ;;  %v1478_v53 = vld [vmem:[#allocation8 + $0xd80] sm:$0xff] }
 0x1c0   : > { %v1586_v59 = vsel %vm1570_vm3, %v1575_v22, %v1585_v51  ;;  %3731 = vmatprep.subr.bf16.mxu0 %v3730_v34  ;;  %3859 = vmatprep.subr.bf16.mxu1 %v3858_v37  ;;  %v3740_v22 = vpack.c.bf16 %v1458_v10, %v1454_v9  ;;  %v3744_v34 = vpack.c.bf16 %v1466_v25, %v1462_v24  ;;  %v1476_v44 = vld [vmem:[#allocation8 + $0xd70] sm:$0xff]  ;;  %v1493_v1 = vld [vmem:[#allocation8 + $0xdf8] sm:$0xff]  ;;  %v1486_v4 = vld [vmem:[#allocation8 + $0xdc0] sm:$0xff] }
 0x1c1   : > { %1669 = vmatprep.mubr.f32.mxu0 %v1586_v59  ;;  %1823 = vmatprep.mubr.f32.mxu1 %v1586_v59  ;;  %v3872_v37 = vpack.c.bf16 %v1468_v29, %v1464_v28  ;;  %v3748_v51 = vpack.c.bf16 %v1474_v40, %v1470_v39  ;;  %v1484_v59 = vld [vmem:[#allocation8 + $0xdb0] sm:$0xff]  ;;  %v1490_v5 = vld [vmem:[#allocation8 + $0xde0] sm:$0xff]  ;;  %v1495_v11 = vld [vmem:[#allocation8 + $0xe08] sm:$0xff] }
 0x1c2   : > { %1670 = vmatmul.mubr.f32.gmra.mrb[6].mxu0 %v1584_v2  ;;  %1824 = vmatmul.mubr.f32.gmra.mrb[6].mxu1 %v1584_v2  ;;  %v3880_v3 = vpack.c.bf16 %v1484_v59, %v1480_v58  ;;  %v1488_v9 = vld [vmem:[#allocation8 + $0xdd0] sm:$0xff]  ;;  %v1501_v14 = vld [vmem:[#allocation8 + $0xe38] sm:$0xff]  ;;  %v3756_v15 = vpack.c.bf16 %v1490_v5, %v1486_v4  ;;  %v1494_v17 = vld [vmem:[#allocation8 + $0xe00] sm:$0xff] }
 0x1c3   : > { %3733 = vmatpush1.bf16.msra.mxu0 %v3732_v52  ;;  %3861 = vmatpush1.bf16.msra.mxu1 %v3860_v54  ;;  %v3876_v52 = vpack.c.bf16 %v1476_v44, %v1472_v43  ;;  %v1482_v54 = vld [vmem:[#allocation8 + $0xda0] sm:$0xff]  ;;  %v1492_v10 = vld [vmem:[#allocation8 + $0xdf0] sm:$0xff]  ;;  %v1507_v24 = vld [vmem:[#allocation8 + $0xe68] sm:$0xff] }
 0x1c4   : > { %3735 = vmatprep.subr.bf16.mxu0 %v3734_v56  ;;  %3863 = vmatprep.subr.bf16.mxu1 %v3862_v61  ;;  %v3750_v56 = vpack.c.bf16 %v1483_v47, %v1479_v45  ;;  %v1487_v61 = vld [vmem:[#allocation8 + $0xdc8] sm:$0xff]  ;;  %v3752_v2 = vpack.c.bf16 %v1482_v54, %v1478_v53  ;;  %v3884_v16 = vpack.c.bf16 %v1492_v10, %v1488_v9  ;;  %v1498_v18 = vld [vmem:[#allocation8 + $0xe20] sm:$0xff]  ;;  %v1505_v25 = vld [vmem:[#allocation8 + $0xe58] sm:$0xff] }
 0x1c5   : > { %1740 = vmatprep.mubr.f32.mxu0 %v1582_v21  ;;  %1894 = vmatprep.mubr.f32.mxu1 %v1582_v21  ;;  %v1496_v21 = vld [vmem:[#allocation8 + $0xe10] sm:$0xff]  ;;  %v1502_v29 = vld [vmem:[#allocation8 + $0xe40] sm:$0xff]  ;;  %v1515_v39 = vld [vmem:[#allocation8 + $0xea8] sm:$0xff] }
 0x1c6   : > { %v1506_v30 = vld [vmem:[#allocation8 + $0xe60] sm:$0xff]  ;;  %v1504_v33 = vld [vmem:[#allocation8 + $0xe50] sm:$0xff]  ;;  %v1513_v40 = vld [vmem:[#allocation8 + $0xe98] sm:$0xff] }
 0x1c7   : > { %3737 = vmatpush1.bf16.msra.mxu0 %v3736_v7  ;;  %3865 = vmatpush1.bf16.msra.mxu1 %v3864_v8  ;;  %v3754_v7 = vpack.c.bf16 %v1491_v62, %v1487_v61  ;;  %v3882_v8 = vpack.c.bf16 %v1493_v1, %v1489_v63  ;;  %v1510_v44 = vld [vmem:[#allocation8 + $0xe80] sm:$0xff]  ;;  %v1512_v50 = vld [vmem:[#allocation8 + $0xe90] sm:$0xff]  ;;  %v1523_v53 = vld [vmem:[#allocation8 + $0xee8] sm:$0xff] }
 0x1c8   : > { %3739 = vmatprep.subr.bf16.mxu0 %v3738_v12  ;;  %3867 = vmatprep.subr.bf16.mxu1 %v3866_v13  ;;  %v1499_v12 = vld [vmem:[#allocation8 + $0xe28] sm:$0xff]  ;;  %v1497_v13 = vld [vmem:[#allocation8 + $0xe18] sm:$0xff]  ;;  %v1514_v45 = vld [vmem:[#allocation8 + $0xea0] sm:$0xff] }
 0x1c9   : > { %v3758_v19 = vpack.c.bf16 %v1499_v12, %v1495_v11  ;;  %v3886_v20 = vpack.c.bf16 %v1501_v14, %v1497_v13  ;;  %v1521_v54 = vld [vmem:[#allocation8 + $0xed8] sm:$0xff]  ;;  %v1518_v59 = vld [vmem:[#allocation8 + $0xec0] sm:$0xff]  ;;  %v1520_v1 = vld [vmem:[#allocation8 + $0xed0] sm:$0xff] }
 0x1ca   : > { %v1522_v61 = vld [vmem:[#allocation8 + $0xee0] sm:$0xff]  ;;  %v1531_v4 = vld [vmem:[#allocation8 + $0xf28] sm:$0xff]  ;;  %v1529_v5 = vld [vmem:[#allocation8 + $0xf18] sm:$0xff] }
 0x1cb   : > { %3741 = vmatpush1.bf16.msra.mxu0 %v3740_v22  ;;  %3869 = vmatpush1.bf16.msra.mxu1 %v3868_v23  ;;  %v1500_v22 = vld [vmem:[#allocation8 + $0xe30] sm:$0xff]  ;;  %v1503_v23 = vld [vmem:[#allocation8 + $0xe48] sm:$0xff]  ;;  %v1526_v10 = vld [vmem:[#allocation8 + $0xf00] sm:$0xff] }
 0x1cc   : > { %3743 = vmatprep.subr.bf16.mxu0 %v3742_v26  ;;  %3871 = vmatprep.subr.bf16.mxu1 %v3870_v27  ;;  %v1509_v26 = vld [vmem:[#allocation8 + $0xe78] sm:$0xff]  ;;  %v3760_v27 = vpack.c.bf16 %v1498_v18, %v1494_v17  ;;  %v3888_v28 = vpack.c.bf16 %v1500_v22, %v1496_v21  ;;  %v3762_v31 = vpack.c.bf16 %v1507_v24, %v1503_v23  ;;  %v1530_v11 = vld [vmem:[#allocation8 + $0xf20] sm:$0xff]  ;;  %v1528_v14 = vld [vmem:[#allocation8 + $0xf10] sm:$0xff] }
 0x1cd   : > { %v3890_v32 = vpack.c.bf16 %v1509_v26, %v1505_v25  ;;  %v1539_v17 = vld [vmem:[#allocation8 + $0xf68] sm:$0xff]  ;;  %v1537_v18 = vld [vmem:[#allocation8 + $0xf58] sm:$0xff]  ;;  %v1534_v22 = vld [vmem:[#allocation8 + $0xf40] sm:$0xff] }
 0x1ce   : > { %v1538_v23 = vld [vmem:[#allocation8 + $0xf60] sm:$0xff]  ;;  %v1536_v26 = vld [vmem:[#allocation8 + $0xf50] sm:$0xff] }
 0x1cf   : > { %3745 = vmatpush1.bf16.msra.mxu0 %v3744_v34  ;;  %3873 = vmatpush1.bf16.msra.mxu1 %v3872_v37  ;;  %v1508_v34 = vld [vmem:[#allocation8 + $0xe70] sm:$0xff]  ;;  %v1511_v37 = vld [vmem:[#allocation8 + $0xe88] sm:$0xff] }
 0x1d0   : > { %3747 = vmatprep.subr.bf16.mxu0 %v3746_v41  ;;  %3875 = vmatprep.subr.bf16.mxu1 %v3874_v42  ;;  %v1517_v41 = vld [vmem:[#allocation8 + $0xeb8] sm:$0xff]  ;;  %v3764_v42 = vpack.c.bf16 %v1506_v30, %v1502_v29  ;;  %v3892_v43 = vpack.c.bf16 %v1508_v34, %v1504_v33  ;;  %v3766_v47 = vpack.c.bf16 %v1515_v39, %v1511_v37  ;;  %v1547_v29 = vld [vmem:[#allocation8 + $0xfa8] sm:$0xff]  ;;  %v1542_v34 = vld [vmem:[#allocation8 + $0xf80] sm:$0xff] }
 0x1d1   : > { %v3894_v48 = vpack.c.bf16 %v1517_v41, %v1513_v40  ;;  %v1545_v30 = vld [vmem:[#allocation8 + $0xf98] sm:$0xff]  ;;  %v1546_v37 = vld [vmem:[#allocation8 + $0xfa0] sm:$0xff]  ;;  %v1544_v41 = vld [vmem:[#allocation8 + $0xf90] sm:$0xff] }
 0x1d3   : > { %3749 = vmatpush1.bf16.msra.mxu0 %v3748_v51  ;;  %3877 = vmatpush1.bf16.msra.mxu1 %v3876_v52  ;;  %v1516_v51 = vld [vmem:[#allocation8 + $0xeb0] sm:$0xff]  ;;  %v1519_v52 = vld [vmem:[#allocation8 + $0xec8] sm:$0xff] }
 0x1d4   : > { %3751 = vmatprep.subr.bf16.mxu0 %v3750_v56  ;;  %3879 = vmatprep.subr.bf16.mxu1 %v3878_v57  ;;  %v1525_v56 = vld [vmem:[#allocation8 + $0xef8] sm:$0xff]  ;;  %v3768_v57 = vpack.c.bf16 %v1514_v45, %v1510_v44  ;;  %v3896_v58 = vpack.c.bf16 %v1516_v51, %v1512_v50  ;;  %v3770_v62 = vpack.c.bf16 %v1523_v53, %v1519_v52  ;;  %v1555_v44 = vld [vmem:[#allocation8 + $0xfe8] sm:$0xff]  ;;  %v1550_v51 = vld [vmem:[#allocation8 + $0xfc0] sm:$0xff] }
 0x1d5   : > { %v3898_v63 = vpack.c.bf16 %v1525_v56, %v1521_v54  ;;  %v1553_v45 = vld [vmem:[#allocation8 + $0xfd8] sm:$0xff]  ;;  %v1554_v52 = vld [vmem:[#allocation8 + $0xfe0] sm:$0xff]  ;;  %v1552_v56 = vld [vmem:[#allocation8 + $0xfd0] sm:$0xff] }
 0x1d7   : > { %3753 = vmatpush1.bf16.msra.mxu0 %v3752_v2  ;;  %3881 = vmatpush1.bf16.msra.mxu1 %v3880_v3  ;;  %v1524_v2 = vld [vmem:[#allocation8 + $0xef0] sm:$0xff]  ;;  %v1527_v3 = vld [vmem:[#allocation8 + $0xf08] sm:$0xff] }
 0x1d8   : > { %3755 = vmatprep.subr.bf16.mxu0 %v3754_v7  ;;  %3883 = vmatprep.subr.bf16.mxu1 %v3882_v8  ;;  %v1533_v7 = vld [vmem:[#allocation8 + $0xf38] sm:$0xff]  ;;  %v3772_v8 = vpack.c.bf16 %v1522_v61, %v1518_v59  ;;  %v3900_v9 = vpack.c.bf16 %v1524_v2, %v1520_v1  ;;  %v3774_v12 = vpack.c.bf16 %v1531_v4, %v1527_v3  ;;  %v1042_v59 = vld [vmem:[#allocation8 + $0x28] sm:$0xff]  ;;  %v1300_v3 = vld [vmem:[#allocation2 + $0x58] sm:$0x1] }
 0x1d9   : > { %v3902_v13 = vpack.c.bf16 %v1533_v7, %v1529_v5  ;;  %v1040_v61 = vld [vmem:[#allocation8 + $0x18] sm:$0xff]  ;;  %v3788_v1 = vpack.c.bf16 %v1554_v52, %v1550_v51  ;;  %v1037_v7 = vld [vmem:[#allocation8] sm:$0xff] }
 0x1da   : > { %v1061_v52 = vld [vmem:[#allocation8 + $0xc0] sm:$0xff] }
 0x1db   : > { %3757 = vmatpush1.bf16.msra.mxu0 %v3756_v15  ;;  %3885 = vmatpush1.bf16.msra.mxu1 %v3884_v16  ;;  %v1532_v15 = vld [vmem:[#allocation8 + $0xf30] sm:$0xff]  ;;  %v1535_v16 = vld [vmem:[#allocation8 + $0xf48] sm:$0xff] }
 0x1dc   : > { %3759 = vmatprep.subr.bf16.mxu0 %v3758_v19  ;;  %3887 = vmatprep.subr.bf16.mxu1 %v3886_v20  ;;  %v1541_v19 = vld [vmem:[#allocation8 + $0xf78] sm:$0xff]  ;;  %v3776_v20 = vpack.c.bf16 %v1530_v11, %v1526_v10  ;;  %v3904_v21 = vpack.c.bf16 %v1532_v15, %v1528_v14  ;;  %v3778_v24 = vpack.c.bf16 %v1539_v17, %v1535_v16  ;;  %v1578_v11 = vrot.slane %v5194_v55, 1  ;;  %v1050_v14 = vld [vmem:[#allocation8 + $0x68] sm:$0xff] }
 0x1dd   : > { %v3906_v25 = vpack.c.bf16 %v1541_v19, %v1537_v18  ;;  %v1589_v15 = vrot.slane %v1300_v3, 1  ;;  %v1299_v16 = vld [vmem:[#allocation2 + $0x50] sm:$0x1]  ;;  %v1048_v17 = vld [vmem:[#allocation8 + $0x58] sm:$0xff]  ;;  %v1069_v3 = vld [vmem:[#allocation8 + $0x100] sm:$0xff] }
 0x1de   : > { %v1052_v18 = vld [vmem:[#allocation8 + $0x78] sm:$0xff] }
 0x1df   : > { %3761 = vmatpush1.bf16.msra.mxu0 %v3760_v27  ;;  %3889 = vmatpush1.bf16.msra.mxu1 %v3888_v28  ;;  %v1540_v27 = vld [vmem:[#allocation8 + $0xf70] sm:$0xff]  ;;  %v1543_v28 = vld [vmem:[#allocation8 + $0xf88] sm:$0xff]  ;;  %v4050_v55 = vpack.c.bf16 %v1052_v18, %v1048_v17  ;;  %v1081_v17 = vld [vmem:[#allocation8 + $0x160] sm:$0xff] }
 0x1e0   : > { %3763 = vmatprep.subr.bf16.mxu0 %v3762_v31  ;;  %3891 = vmatprep.subr.bf16.mxu1 %v3890_v32  ;;  %v1549_v31 = vld [vmem:[#allocation8 + $0xfb8] sm:$0xff]  ;;  %v3780_v32 = vpack.c.bf16 %v1538_v23, %v1534_v22  ;;  %v3908_v33 = vpack.c.bf16 %v1540_v27, %v1536_v26  ;;  %v3782_v39 = vpack.c.bf16 %v1547_v29, %v1543_v28  ;;  %v1049_v22 = vld [vmem:[#allocation8 + $0x60] sm:$0xff]  ;;  %v1047_v26 = vld [vmem:[#allocation8 + $0x50] sm:$0xff] }
 0x1e1   : > { %v3910_v40 = vpack.c.bf16 %v1549_v31, %v1545_v30  ;;  %v1051_v27 = vld [vmem:[#allocation8 + $0x70] sm:$0xff]  ;;  %v1054_v28 = vld [vmem:[#allocation8 + $0x88] sm:$0xff]  ;;  %v1590_v29 = vsel %vm1570_vm3, %v1581_v6, %v1589_v15  ;;  %v1056_v31 = vld [vmem:[#allocation8 + $0x98] sm:$0xff] }
 0x1e2   : > { %v1058_v30 = vld [vmem:[#allocation8 + $0xa8] sm:$0xff] }
 0x1e3   : > { %3765 = vmatpush1.bf16.msra.mxu0 %v3764_v42  ;;  %3893 = vmatpush1.bf16.msra.mxu1 %v3892_v43  ;;  %v1548_v42 = vld [vmem:[#allocation8 + $0xfb0] sm:$0xff]  ;;  %v1551_v43 = vld [vmem:[#allocation8 + $0xfc8] sm:$0xff] }
 0x1e4   : > { %3767 = vmatprep.subr.bf16.mxu0 %v3766_v47  ;;  %3895 = vmatprep.subr.bf16.mxu1 %v3894_v48  ;;  %v1557_v47 = vld [vmem:[#allocation8 + $0xff8] sm:$0xff]  ;;  %v3784_v48 = vpack.c.bf16 %v1546_v37, %v1542_v34  ;;  %v3912_v50 = vpack.c.bf16 %v1548_v42, %v1544_v41  ;;  %v3786_v53 = vpack.c.bf16 %v1555_v44, %v1551_v43  ;;  %v1053_v37 = vld [vmem:[#allocation8 + $0x80] sm:$0xff]  ;;  %v1059_v43 = vld [vmem:[#allocation8 + $0xb0] sm:$0xff] }
 0x1e5   : > { %v3914_v54 = vpack.c.bf16 %v1557_v47, %v1553_v45  ;;  %v4052_v34 = vpack.c.bf16 %v1051_v27, %v1047_v26  ;;  %v3926_v42 = vpack.c.bf16 %v1058_v30, %v1054_v28  ;;  %v1062_v6 = vld [vmem:[#allocation8 + $0xc8] sm:$0xff]  ;;  %v1064_v47 = vld [vmem:[#allocation8 + $0xd8] sm:$0xff]  ;;  %v1085_v27 = vld [vmem:[#allocation8 + $0x180] sm:$0xff] }
 0x1e6   : > { %v1066_v44 = vld [vmem:[#allocation8 + $0xe8] sm:$0xff]  ;;  %v1089_v28 = vld [vmem:[#allocation8 + $0x1a0] sm:$0xff] }
 0x1e7   : > { %3769 = vmatpush1.bf16.msra.mxu0 %v3768_v57  ;;  %3897 = vmatpush1.bf16.msra.mxu1 %v3896_v58  ;;  %v1556_v57 = vld [vmem:[#allocation8 + $0xff0] sm:$0xff]  ;;  %v1038_v58 = vld [vmem:[#allocation8 + $0x8] sm:$0xff] }
 0x1e8   : > { %3771 = vmatprep.subr.bf16.mxu0 %v3770_v62  ;;  %3899 = vmatprep.subr.bf16.mxu1 %v3898_v63  ;;  %v1044_v62 = vld [vmem:[#allocation8 + $0x38] sm:$0xff]  ;;  %v1295_v63 = vld [vmem:[#allocation2 + $0x10] sm:$0xfe]  ;;  %v3916_v2 = vpack.c.bf16 %v1556_v57, %v1552_v56  ;;  %v3918_v4 = vpack.c.bf16 %v1042_v59, %v1038_v58  ;;  %v1030_v45 = vld [vmem:[#allocation2 + $0x8] sm:$0xff] }
 0x1e9   : > { %v4046_v5 = vpack.c.bf16 %v1044_v62, %v1040_v61  ;;  %v1577_v10 = vrot.slane %v1295_v63, 1  ;;  %v1063_v57 = vld [vmem:[#allocation8 + $0xd0] sm:$0xff]  ;;  %v1070_v59 = vld [vmem:[#allocation8 + $0x108] sm:$0xff]  ;;  %v1072_v62 = vld [vmem:[#allocation8 + $0x118] sm:$0xff] }
 0x1ea   : > { %v1067_v58 = vld [vmem:[#allocation8 + $0xf0] sm:$0xff]  ;;  %v1074_v61 = vld [vmem:[#allocation8 + $0x128] sm:$0xff]  ;;  %v1076_v63 = vld [vmem:[#allocation8 + $0x138] sm:$0xff] }
 0x1eb   : > { %3773 = vmatpush1.bf16.msra.mxu0 %v3772_v8  ;;  %3901 = vmatpush1.bf16.msra.mxu1 %v3900_v9  ;;  %v1041_v8 = vld [vmem:[#allocation8 + $0x20] sm:$0xff]  ;;  %v1039_v9 = vld [vmem:[#allocation8 + $0x10] sm:$0xff]  ;;  %v1579_v23 = vsel %vm1570_vm3, %v1577_v10, %v1578_v11  ;;  %v1078_v10 = vld [vmem:[#allocation8 + $0x148] sm:$0xff] }
 0x1ec   : > { %3775 = vmatprep.subr.bf16.mxu0 %v3774_v12  ;;  %3903 = vmatprep.subr.bf16.mxu1 %v3902_v13  ;;  %v1043_v12 = vld [vmem:[#allocation8 + $0x30] sm:$0xff]  ;;  %v1046_v13 = vld [vmem:[#allocation8 + $0x48] sm:$0xff]  ;;  %v3920_v19 = vpack.c.bf16 %v1041_v8, %v1037_v7  ;;  %v4062_v7 = vpack.c.bf16 %v1076_v63, %v1072_v62 }
 0x1ed   : > { %v1071_v8 = vld [vmem:[#allocation8 + $0x110] sm:$0xff]  ;;  %v1110_v62 = vld [vmem:[#allocation8 + $0x248] sm:$0xff] }
 0x1ee   : > { %v1114_v63 = vld [vmem:[#allocation8 + $0x268] sm:$0xff] }
 0x1ef   : > { %3777 = vmatpush1.bf16.msra.mxu0 %v3776_v20  ;;  %3905 = vmatpush1.bf16.msra.mxu1 %v3904_v21  ;;  %v4048_v20 = vpack.c.bf16 %v1043_v12, %v1039_v9  ;;  %v1045_v21 = vld [vmem:[#allocation8 + $0x40] sm:$0xff]  ;;  %v1075_v9 = vld [vmem:[#allocation8 + $0x130] sm:$0xff]  ;;  %v1080_v12 = vld [vmem:[#allocation8 + $0x158] sm:$0xff] }
 0x1f0   : > { %3779 = vmatprep.subr.bf16.mxu0 %v3778_v24  ;;  %3907 = vmatprep.subr.bf16.mxu1 %v3906_v25  ;;  %v1587_v24 = vrot.slane %v1299_v16, 1  ;;  %v3922_v25 = vpack.c.bf16 %v1050_v14, %v1046_v13  ;;  %v1084_v13 = vld [vmem:[#allocation8 + $0x178] sm:$0xff]  ;;  %v4064_v15 = vpack.c.bf16 %v1075_v9, %v1071_v8  ;;  %v1077_v16 = vld [vmem:[#allocation8 + $0x140] sm:$0xff]  ;;  %v3954_v8 = vpack.c.bf16 %v1114_v63, %v1110_v62  ;;  %v1143_v62 = vld [vmem:[#allocation8 + $0x350] sm:$0xff] }
 0x1f1   : > { %v1147_v63 = vld [vmem:[#allocation8 + $0x370] sm:$0xff] }
 0x1f2   : > { %v1588_v41 = vsel %vm1570_vm3, %v1578_v11, %v1587_v24  ;;  %v1082_v11 = vld [vmem:[#allocation8 + $0x168] sm:$0xff]  ;;  %v1088_v24 = vld [vmem:[#allocation8 + $0x198] sm:$0xff] }
 0x1f3   : > { %3781 = vmatpush1.bf16.msra.mxu0 %v3780_v32  ;;  %3909 = vmatpush1.bf16.msra.mxu1 %v3908_v33  ;;  %v1060_v32 = vld [vmem:[#allocation8 + $0xb8] sm:$0xff]  ;;  %v3924_v33 = vpack.c.bf16 %v1049_v22, %v1045_v21  ;;  %v3938_v18 = vpack.c.bf16 %v1082_v11, %v1078_v10  ;;  %v1083_v21 = vld [vmem:[#allocation8 + $0x170] sm:$0xff]  ;;  %v1086_v22 = vld [vmem:[#allocation8 + $0x188] sm:$0xff] }
 0x1f4   : > { %3783 = vmatprep.subr.bf16.mxu0 %v3782_v39  ;;  %3911 = vmatprep.subr.bf16.mxu1 %v3910_v40  ;;  %v1057_v39 = vld [vmem:[#allocation8 + $0xa0] sm:$0xff]  ;;  %v1055_v40 = vld [vmem:[#allocation8 + $0x90] sm:$0xff]  ;;  %v4054_v60 = vpack.c.bf16 %v1060_v32, %v1056_v31 }
 0x1f5   : > { %v4056_v51 = vpack.c.bf16 %v1059_v43, %v1055_v40  ;;  %v1087_v31 = vld [vmem:[#allocation8 + $0x190] sm:$0xff]  ;;  %v3944_v40 = vpack.c.bf16 %v1089_v28, %v1085_v27 }
 0x1f6   : > { %v1091_v32 = vld [vmem:[#allocation8 + $0x1b0] sm:$0xff] }
 0x1f7   : > { %3785 = vmatpush1.bf16.msra.mxu0 %v3784_v48  ;;  %3913 = vmatpush1.bf16.msra.mxu1 %v3912_v50  ;;  %v1068_v48 = vld [vmem:[#allocation8 + $0xf8] sm:$0xff]  ;;  %v3928_v50 = vpack.c.bf16 %v1057_v39, %v1053_v37  ;;  %v1111_v10 = vld [vmem:[#allocation8 + $0x250] sm:$0xff] }
 0x1f8   : > { %3787 = vmatprep.subr.bf16.mxu0 %v3786_v53  ;;  %3915 = vmatprep.subr.bf16.mxu1 %v3914_v54  ;;  %v1065_v53 = vld [vmem:[#allocation8 + $0xe0] sm:$0xff]  ;;  %v3930_v54 = vpack.c.bf16 %v1066_v44, %v1062_v6  ;;  %v4058_v56 = vpack.c.bf16 %v1068_v48, %v1064_v47  ;;  %v1096_v37 = vld [vmem:[#allocation8 + $0x1d8] sm:$0xff]  ;;  %v1095_v44 = vld [vmem:[#allocation8 + $0x1d0] sm:$0xff] }
 0x1f9   : > { %v1100_v39 = vld [vmem:[#allocation8 + $0x1f8] sm:$0xff]  ;;  %v1102_v47 = vld [vmem:[#allocation8 + $0x208] sm:$0xff]  ;;  %v1115_v11 = vld [vmem:[#allocation8 + $0x270] sm:$0xff] }
 0x1fa   : > { %v4074_v6 = vpack.c.bf16 %v1100_v39, %v1096_v37  ;;  %v1106_v48 = vld [vmem:[#allocation8 + $0x228] sm:$0xff] }
 0x1fb   : > { %3789 = vmatpush1.bf16.msra.mxu0 %v3788_v1  ;;  %3917 = vmatpush1.bf16.msra.mxu1 %v3916_v2  ;;  %v3932_v1 = vpack.c.bf16 %v1065_v53, %v1061_v52  ;;  %v4060_v2 = vpack.c.bf16 %v1067_v58, %v1063_v57  ;;  %v3950_v57 = vpack.c.bf16 %v1106_v48, %v1102_v47  ;;  %v1134_v37 = vld [vmem:[#allocation8 + $0x308] sm:$0xff]  ;;  %v1135_v47 = vld [vmem:[#allocation8 + $0x310] sm:$0xff] }
 0x1fc   : > { %3919 = vmatprep.subr.bf16.mxu0 %v3918_v4  ;;  %4047 = vmatprep.subr.bf16.mxu1 %v4046_v5  ;;  %v1073_v4 = vld [vmem:[#allocation8 + $0x120] sm:$0xff]  ;;  %v3934_v5 = vpack.c.bf16 %v1074_v61, %v1070_v59  ;;  %v1103_v59 = vld [vmem:[#allocation8 + $0x210] sm:$0xff]  ;;  %v1138_v39 = vld [vmem:[#allocation8 + $0x328] sm:$0xff] }
 0x1fd   : > { %v3936_v14 = vpack.c.bf16 %v1073_v4, %v1069_v3  ;;  %v1107_v61 = vld [vmem:[#allocation8 + $0x230] sm:$0xff] }
 0x1fe   : > { %1741 = vmatmul.mubr.f32.vlgmr.msra.gmra.mrb[4].mxu0 %v1579_v23  ;;  %1895 = vmatmul.mubr.f32.vlgmr.msra.gmra.mrb[4].mxu1 %v1579_v23  ;;  %v1090_v23 = vld [vmem:[#allocation8 + $0x1a8] sm:$0xff]  ;;  %v4080_v4 = vpack.c.bf16 %v1107_v61, %v1103_v59  ;;  %v1139_v48 = vld [vmem:[#allocation8 + $0x330] sm:$0xff] }
 0x1ff   : > { %1746 = vmatprep.mubr.f32.mxu0 %v1590_v29  ;;  %1900 = vmatprep.mubr.f32.mxu1 %v1590_v29  ;;  %v3942_v29 = vpack.c.bf16 %v1090_v23, %v1086_v22  ;;  %v1119_v22 = vld [vmem:[#allocation8 + $0x290] sm:$0xff] }
 0x200   : > { %3921 = vmatpush1.bf16.msra.mxu0 %v3920_v19  ;;  %4049 = vmatpush1.bf16.msra.mxu1 %v4048_v20  ;;  %v4066_v19 = vpack.c.bf16 %v1084_v13, %v1080_v12  ;;  %v1079_v20 = vld [vmem:[#allocation8 + $0x150] sm:$0xff]  ;;  %v1118_v12 = vld [vmem:[#allocation8 + $0x288] sm:$0xff] }
 0x201   : > { %3923 = vmatprep.subr.bf16.mxu0 %v3922_v25  ;;  %4051 = vmatprep.subr.bf16.mxu1 %v4050_v55  ;;  %v1092_v25 = vld [vmem:[#allocation8 + $0x1b8] sm:$0xff]  ;;  %v3940_v55 = vpack.c.bf16 %v1081_v17, %v1077_v16  ;;  %v4068_v26 = vpack.c.bf16 %v1083_v21, %v1079_v20  ;;  %v1122_v13 = vld [vmem:[#allocation8 + $0x2a8] sm:$0xff]  ;;  %v4084_v17 = vpack.c.bf16 %v1115_v11, %v1111_v10  ;;  %v1123_v23 = vld [vmem:[#allocation8 + $0x2b0] sm:$0xff] }
 0x202   : > { %1747 = vmatmul.mubr.f32.gmra.mrb[6].mxu0 %v1588_v41  ;;  %1901 = vmatmul.mubr.f32.gmra.mrb[6].mxu1 %v1588_v41  ;;  %v4070_v30 = vpack.c.bf16 %v1092_v25, %v1088_v24  ;;  %v4072_v41 = vpack.c.bf16 %v1091_v32, %v1087_v31  ;;  %v3958_v20 = vpack.c.bf16 %v1122_v13, %v1118_v12  ;;  %v1126_v24 = vld [vmem:[#allocation8 + $0x2c8] sm:$0xff]  ;;  %v1151_v12 = vld [vmem:[#allocation8 + $0x390] sm:$0xff] }
 0x203   : > { %1971 = vmatprep.mubr.f32.mxu0 %v1030_v45  ;;  %2125 = vmatprep.mubr.f32.mxu1 %v1030_v45  ;;  %v1099_v45 = vld [vmem:[#allocation8 + $0x1f0] sm:$0xff]  ;;  %v1130_v25 = vld [vmem:[#allocation8 + $0x2e8] sm:$0xff]  ;;  %v4088_v28 = vpack.c.bf16 %v1123_v23, %v1119_v22 }
 0x204   : > { %3925 = vmatpush1.bf16.msra.mxu0 %v3924_v33  ;;  %4053 = vmatpush1.bf16.msra.mxu1 %v4052_v34  ;;  %v1094_v33 = vld [vmem:[#allocation8 + $0x1c8] sm:$0xff]  ;;  %v4076_v53 = vpack.c.bf16 %v1099_v45, %v1095_v44  ;;  %v3962_v31 = vpack.c.bf16 %v1130_v25, %v1126_v24  ;;  %v3966_v44 = vpack.c.bf16 %v1138_v39, %v1134_v37  ;;  %v1155_v13 = vld [vmem:[#allocation8 + $0x3b0] sm:$0xff] }
 0x205   : > { %3927 = vmatprep.subr.bf16.mxu0 %v3926_v42  ;;  %4055 = vmatprep.subr.bf16.mxu1 %v4054_v60  ;;  %v1098_v34 = vld [vmem:[#allocation8 + $0x1e8] sm:$0xff]  ;;  %v1093_v42 = vld [vmem:[#allocation8 + $0x1c0] sm:$0xff]  ;;  %v1159_v24 = vld [vmem:[#allocation8 + $0x3d0] sm:$0xff] }
 0x206   : > { %v1097_v60 = vld [vmem:[#allocation8 + $0x1e0] sm:$0xff]  ;;  %v3946_v43 = vpack.c.bf16 %v1098_v34, %v1094_v33  ;;  %v1127_v33 = vld [vmem:[#allocation8 + $0x2d0] sm:$0xff] }
 0x207   : > { %v3948_v52 = vpack.c.bf16 %v1097_v60, %v1093_v42  ;;  %v1131_v34 = vld [vmem:[#allocation8 + $0x2f0] sm:$0xff] }
 0x208   : > { %3929 = vmatpush1.bf16.msra.mxu0 %v3928_v50  ;;  %4057 = vmatpush1.bf16.msra.mxu1 %v4056_v51  ;;  %v1104_v50 = vld [vmem:[#allocation8 + $0x218] sm:$0xff]  ;;  %v4092_v60 = vpack.c.bf16 %v1131_v34, %v1127_v33  ;;  %v1163_v25 = vld [vmem:[#allocation8 + $0x3f0] sm:$0xff]  ;;  %v1165_v33 = vld [vmem:[#allocation8 + $0x400] sm:$0xff] }
 0x209   : > { %3931 = vmatprep.subr.bf16.mxu0 %v3930_v54  ;;  %4059 = vmatprep.subr.bf16.mxu1 %v4058_v56  ;;  %v1108_v51 = vld [vmem:[#allocation8 + $0x238] sm:$0xff]  ;;  %v1101_v54 = vld [vmem:[#allocation8 + $0x200] sm:$0xff]  ;;  %v1167_v37 = vld [vmem:[#allocation8 + $0x410] sm:$0xff] }
 0x20a   : > { %v1105_v56 = vld [vmem:[#allocation8 + $0x220] sm:$0xff]  ;;  %v4078_v58 = vpack.c.bf16 %v1108_v51, %v1104_v50  ;;  %v1142_v50 = vld [vmem:[#allocation8 + $0x348] sm:$0xff]  ;;  %v1171_v39 = vld [vmem:[#allocation8 + $0x430] sm:$0xff] }
 0x20b   : > { %v3952_v3 = vpack.c.bf16 %v1105_v56, %v1101_v54  ;;  %v1146_v51 = vld [vmem:[#allocation8 + $0x368] sm:$0xff]  ;;  %v4096_v56 = vpack.c.bf16 %v1139_v48, %v1135_v47  ;;  %v1169_v34 = vld [vmem:[#allocation8 + $0x420] sm:$0xff] }
 0x20c   : > { %3933 = vmatpush1.bf16.msra.mxu0 %v3932_v1  ;;  %4061 = vmatpush1.bf16.msra.mxu1 %v4060_v2  ;;  %v1112_v1 = vld [vmem:[#allocation8 + $0x258] sm:$0xff]  ;;  %v3970_v59 = vpack.c.bf16 %v1146_v51, %v1142_v50  ;;  %v1177_v47 = vld [vmem:[#allocation8 + $0x460] sm:$0xff]  ;;  %v1175_v51 = vld [vmem:[#allocation8 + $0x450] sm:$0xff] }
 0x20d   : > { %3935 = vmatprep.subr.bf16.mxu0 %v3934_v5  ;;  %4063 = vmatprep.subr.bf16.mxu1 %v4062_v7  ;;  %v1116_v2 = vld [vmem:[#allocation8 + $0x278] sm:$0xff]  ;;  %v1109_v5 = vld [vmem:[#allocation8 + $0x240] sm:$0xff] }
 0x20e   : > { %v1113_v7 = vld [vmem:[#allocation8 + $0x260] sm:$0xff]  ;;  %v4082_v9 = vpack.c.bf16 %v1116_v2, %v1112_v1  ;;  %v1150_v1 = vld [vmem:[#allocation8 + $0x388] sm:$0xff] }
 0x20f   : > { %v3956_v16 = vpack.c.bf16 %v1113_v7, %v1109_v5  ;;  %v1154_v2 = vld [vmem:[#allocation8 + $0x3a8] sm:$0xff]  ;;  %v4100_v7 = vpack.c.bf16 %v1147_v63, %v1143_v62  ;;  %v1181_v62 = vld [vmem:[#allocation8 + $0x480] sm:$0xff] }
 0x210   : > { %3937 = vmatpush1.bf16.msra.mxu0 %v3936_v14  ;;  %4065 = vmatpush1.bf16.msra.mxu1 %v4064_v15  ;;  %v1120_v14 = vld [vmem:[#allocation8 + $0x298] sm:$0xff]  ;;  %v3974_v10 = vpack.c.bf16 %v1154_v2, %v1150_v1  ;;  %v1185_v63 = vld [vmem:[#allocation8 + $0x4a0] sm:$0xff]  ;;  %v1183_v1 = vld [vmem:[#allocation8 + $0x490] sm:$0xff] }
 0x211   : > { %3939 = vmatprep.subr.bf16.mxu0 %v3938_v18  ;;  %4067 = vmatprep.subr.bf16.mxu1 %v4066_v19  ;;  %v1124_v15 = vld [vmem:[#allocation8 + $0x2b8] sm:$0xff]  ;;  %v1117_v18 = vld [vmem:[#allocation8 + $0x280] sm:$0xff] }
 0x212   : > { %v1121_v19 = vld [vmem:[#allocation8 + $0x2a0] sm:$0xff]  ;;  %v4086_v21 = vpack.c.bf16 %v1124_v15, %v1120_v14  ;;  %v1158_v14 = vld [vmem:[#allocation8 + $0x3c8] sm:$0xff] }
 0x213   : > { %v3960_v27 = vpack.c.bf16 %v1121_v19, %v1117_v18  ;;  %v1162_v15 = vld [vmem:[#allocation8 + $0x3e8] sm:$0xff]  ;;  %v4104_v19 = vpack.c.bf16 %v1155_v13, %v1151_v12  ;;  %v3992_v12 = vpack.c.bf16 %v1185_v63, %v1181_v62  ;;  %v1224_v63 = vld [vmem:[#allocation8 + $0x5d8] sm:$0xff] }
 0x214   : > { %3941 = vmatpush1.bf16.msra.mxu0 %v3940_v55  ;;  %4069 = vmatpush1.bf16.msra.mxu1 %v4068_v26  ;;  %v1128_v55 = vld [vmem:[#allocation8 + $0x2d8] sm:$0xff]  ;;  %v3978_v22 = vpack.c.bf16 %v1162_v15, %v1158_v14  ;;  %v1189_v15 = vld [vmem:[#allocation8 + $0x4c0] sm:$0xff]  ;;  %v1226_v62 = vld [vmem:[#allocation8 + $0x5e8] sm:$0xff] }
 0x215   : > { %3943 = vmatprep.subr.bf16.mxu0 %v3942_v29  ;;  %4071 = vmatprep.subr.bf16.mxu1 %v4070_v30  ;;  %v1132_v26 = vld [vmem:[#allocation8 + $0x2f8] sm:$0xff]  ;;  %v1125_v29 = vld [vmem:[#allocation8 + $0x2c0] sm:$0xff] }
 0x216   : > { %v1129_v30 = vld [vmem:[#allocation8 + $0x2e0] sm:$0xff]  ;;  %v4090_v32 = vpack.c.bf16 %v1132_v26, %v1128_v55  ;;  %v1166_v55 = vld [vmem:[#allocation8 + $0x408] sm:$0xff] }
 0x217   : > { %v3964_v42 = vpack.c.bf16 %v1129_v30, %v1125_v29  ;;  %v1170_v26 = vld [vmem:[#allocation8 + $0x428] sm:$0xff]  ;;  %v4108_v30 = vpack.c.bf16 %v1163_v25, %v1159_v24 }
 0x218   : > { %3945 = vmatpush1.bf16.msra.mxu0 %v3944_v40  ;;  %4073 = vmatpush1.bf16.msra.mxu1 %v4072_v41  ;;  %v1136_v40 = vld [vmem:[#allocation8 + $0x318] sm:$0xff] }
 0x219   : > { %3947 = vmatprep.subr.bf16.mxu0 %v3946_v43  ;;  %4075 = vmatprep.subr.bf16.mxu1 %v4074_v6  ;;  %v1140_v41 = vld [vmem:[#allocation8 + $0x338] sm:$0xff]  ;;  %v1133_v43 = vld [vmem:[#allocation8 + $0x300] sm:$0xff] }
 0x21a   : > { %v1137_v6 = vld [vmem:[#allocation8 + $0x320] sm:$0xff]  ;;  %v4094_v45 = vpack.c.bf16 %v1140_v41, %v1136_v40  ;;  %v1174_v40 = vld [vmem:[#allocation8 + $0x448] sm:$0xff] }
 0x21b   : > { %v3968_v54 = vpack.c.bf16 %v1137_v6, %v1133_v43  ;;  %v1178_v41 = vld [vmem:[#allocation8 + $0x468] sm:$0xff]  ;;  %v3984_v43 = vpack.c.bf16 %v1169_v34, %v1165_v33  ;;  %v1029_v6 = vld [vmem:[#allocation2] sm:$0xff] }
 0x21c   : > { %3949 = vmatpush1.bf16.msra.mxu0 %v3948_v52  ;;  %4077 = vmatpush1.bf16.msra.mxu1 %v4076_v53  ;;  %v1144_v52 = vld [vmem:[#allocation8 + $0x358] sm:$0xff]  ;;  %v3986_v48 = vpack.c.bf16 %v1178_v41, %v1174_v40  ;;  %v1205_v41 = vld [vmem:[#allocation8 + $0x540] sm:$0xff] }
 0x21d   : > { %3951 = vmatprep.subr.bf16.mxu0 %v3950_v57  ;;  %4079 = vmatprep.subr.bf16.mxu1 %v4078_v58  ;;  %v1148_v53 = vld [vmem:[#allocation8 + $0x378] sm:$0xff]  ;;  %v1141_v57 = vld [vmem:[#allocation8 + $0x340] sm:$0xff] }
 0x21e   : > { %v1145_v58 = vld [vmem:[#allocation8 + $0x360] sm:$0xff]  ;;  %v4098_v61 = vpack.c.bf16 %v1148_v53, %v1144_v52  ;;  %v1179_v52 = vld [vmem:[#allocation8 + $0x470] sm:$0xff]  ;;  %v1182_v53 = vld [vmem:[#allocation8 + $0x488] sm:$0xff] }
 0x21f   : > { %v3972_v5 = vpack.c.bf16 %v1145_v58, %v1141_v57  ;;  %v1188_v57 = vld [vmem:[#allocation8 + $0x4b8] sm:$0xff]  ;;  %v5213_v58 = vld [vmem:[#allocation2 + $0x28] sm:$0xff] }
 0x220   : > { %3953 = vmatpush1.bf16.msra.mxu0 %v3952_v3  ;;  %4081 = vmatpush1.bf16.msra.mxu1 %v4080_v4  ;;  %v1152_v3 = vld [vmem:[#allocation8 + $0x398] sm:$0xff] }
 0x221   : > { %3955 = vmatprep.subr.bf16.mxu0 %v3954_v8  ;;  %4083 = vmatprep.subr.bf16.mxu1 %v4082_v9  ;;  %v1156_v4 = vld [vmem:[#allocation8 + $0x3b8] sm:$0xff]  ;;  %v1149_v8 = vld [vmem:[#allocation8 + $0x380] sm:$0xff] }
 0x222   : > { %v1153_v9 = vld [vmem:[#allocation8 + $0x3a0] sm:$0xff]  ;;  %v4102_v11 = vpack.c.bf16 %v1156_v4, %v1152_v3  ;;  %v1187_v4 = vld [vmem:[#allocation8 + $0x4b0] sm:$0xff]  ;;  %v1208_v33 = vld [vmem:[#allocation8 + $0x558] sm:$0xff] }
 0x223   : > { %v3976_v18 = vpack.c.bf16 %v1153_v9, %v1149_v8  ;;  %v5217_v8 = vld [vmem:[#allocation2 + $0x20] sm:$0xff]  ;;  %v1032_v9 = vld [vmem:[#allocation2 + $0x18] sm:$0xff]  ;;  %v4120_v13 = vpack.c.bf16 %v1187_v4, %v1183_v1 }
 0x224   : > { %3957 = vmatpush1.bf16.msra.mxu0 %v3956_v16  ;;  %4085 = vmatpush1.bf16.msra.mxu1 %v4084_v17  ;;  %v1160_v16 = vld [vmem:[#allocation8 + $0x3d8] sm:$0xff] }
 0x225   : > { %3959 = vmatprep.subr.bf16.mxu0 %v3958_v20  ;;  %4087 = vmatprep.subr.bf16.mxu1 %v4086_v21  ;;  %v1164_v17 = vld [vmem:[#allocation8 + $0x3f8] sm:$0xff]  ;;  %v1157_v20 = vld [vmem:[#allocation8 + $0x3c0] sm:$0xff] }
 0x226   : > { %v1161_v21 = vld [vmem:[#allocation8 + $0x3e0] sm:$0xff]  ;;  %v4106_v23 = vpack.c.bf16 %v1164_v17, %v1160_v16  ;;  %v1191_v17 = vld [vmem:[#allocation8 + $0x4d0] sm:$0xff]  ;;  %v1212_v34 = vld [vmem:[#allocation8 + $0x578] sm:$0xff] }
 0x227   : > { %v3980_v29 = vpack.c.bf16 %v1161_v21, %v1157_v20  ;;  %v1193_v16 = vld [vmem:[#allocation8 + $0x4e0] sm:$0xff]  ;;  %v1198_v20 = vld [vmem:[#allocation8 + $0x508] sm:$0xff]  ;;  %v1228_v1 = vld [vmem:[#allocation8 + $0x5f8] sm:$0xff] }
 0x228   : > { %3961 = vmatpush1.bf16.msra.mxu0 %v3960_v27  ;;  %4089 = vmatpush1.bf16.msra.mxu1 %v4088_v28  ;;  %v1168_v27 = vld [vmem:[#allocation8 + $0x418] sm:$0xff]  ;;  %v1202_v21 = vld [vmem:[#allocation8 + $0x528] sm:$0xff]  ;;  %v3996_v24 = vpack.c.bf16 %v1193_v16, %v1189_v15 }
 0x229   : > { %3963 = vmatprep.subr.bf16.mxu0 %v3962_v31  ;;  %4091 = vmatprep.subr.bf16.mxu1 %v4090_v32  ;;  %v1172_v28 = vld [vmem:[#allocation8 + $0x438] sm:$0xff]  ;;  %v3982_v31 = vpack.c.bf16 %v1170_v26, %v1166_v55  ;;  %v3998_v55 = vpack.c.bf16 %v1202_v21, %v1198_v20  ;;  %v1197_v26 = vld [vmem:[#allocation8 + $0x500] sm:$0xff]  ;;  %v1231_v21 = vld [vmem:[#allocation8 + $0x610] sm:$0xff] }
 0x22a   : > { %v4110_v32 = vpack.c.bf16 %v1172_v28, %v1168_v27  ;;  %v1201_v27 = vld [vmem:[#allocation8 + $0x520] sm:$0xff]  ;;  %v1199_v28 = vld [vmem:[#allocation8 + $0x510] sm:$0xff]  ;;  %v1236_v15 = vld [vmem:[#allocation8 + $0x638] sm:$0xff] }
 0x22b   : > { %v1233_v20 = vld [vmem:[#allocation8 + $0x620] sm:$0xff] }
 0x22c   : > { %3965 = vmatpush1.bf16.msra.mxu0 %v3964_v42  ;;  %4093 = vmatpush1.bf16.msra.mxu1 %v4092_v60  ;;  %v1176_v42 = vld [vmem:[#allocation8 + $0x458] sm:$0xff] }
 0x22d   : > { %3967 = vmatprep.subr.bf16.mxu0 %v3966_v44  ;;  %4095 = vmatprep.subr.bf16.mxu1 %v4094_v45  ;;  %v1180_v60 = vld [vmem:[#allocation8 + $0x478] sm:$0xff]  ;;  %v4112_v44 = vpack.c.bf16 %v1171_v39, %v1167_v37  ;;  %v1173_v45 = vld [vmem:[#allocation8 + $0x440] sm:$0xff]  ;;  %v4000_v37 = vpack.c.bf16 %v1201_v27, %v1197_v26 }
 0x22e   : > { %v4114_v50 = vpack.c.bf16 %v1180_v60, %v1176_v42  ;;  %v1209_v42 = vld [vmem:[#allocation8 + $0x560] sm:$0xff]  ;;  %v1207_v60 = vld [vmem:[#allocation8 + $0x550] sm:$0xff]  ;;  %v1244_v26 = vld [vmem:[#allocation8 + $0x678] sm:$0xff] }
 0x230   : > { %3969 = vmatpush1.bf16.msra.mxu0 %v3968_v54  ;;  %4097 = vmatpush1.bf16.msra.mxu1 %v4096_v56  ;;  %v1186_v54 = vld [vmem:[#allocation8 + $0x4a8] sm:$0xff]  ;;  %v1184_v56 = vld [vmem:[#allocation8 + $0x498] sm:$0xff] }
 0x231   : > { %3971 = vmatprep.subr.bf16.mxu0 %v3970_v59  ;;  %4099 = vmatprep.subr.bf16.mxu1 %v4098_v61  ;;  %v3988_v59 = vpack.c.bf16 %v1177_v47, %v1173_v45  ;;  %v4116_v61 = vpack.c.bf16 %v1179_v52, %v1175_v51  ;;  %v3990_v2 = vpack.c.bf16 %v1186_v54, %v1182_v53  ;;  %v1218_v45 = vld [vmem:[#allocation8 + $0x5a8] sm:$0xff]  ;;  %v1216_v47 = vld [vmem:[#allocation8 + $0x598] sm:$0xff]  ;;  %v1213_v53 = vld [vmem:[#allocation8 + $0x580] sm:$0xff] }
 0x232   : > { %v4118_v3 = vpack.c.bf16 %v1188_v57, %v1184_v56  ;;  %v1217_v54 = vld [vmem:[#allocation8 + $0x5a0] sm:$0xff]  ;;  %v1215_v56 = vld [vmem:[#allocation8 + $0x590] sm:$0xff] }
 0x234   : > { %3973 = vmatpush1.bf16.msra.mxu0 %v3972_v5  ;;  %4101 = vmatpush1.bf16.msra.mxu1 %v4100_v7  ;;  %v1190_v5 = vld [vmem:[#allocation8 + $0x4c8] sm:$0xff] }
 0x235   : > { %3975 = vmatprep.subr.bf16.mxu0 %v3974_v10  ;;  %4103 = vmatprep.subr.bf16.mxu1 %v4102_v11  ;;  %v1194_v7 = vld [vmem:[#allocation8 + $0x4e8] sm:$0xff]  ;;  %v1192_v10 = vld [vmem:[#allocation8 + $0x4d8] sm:$0xff] }
 0x236   : > { %v1196_v11 = vld [vmem:[#allocation8 + $0x4f8] sm:$0xff]  ;;  %v3994_v14 = vpack.c.bf16 %v1194_v7, %v1190_v5  ;;  %v1221_v5 = vld [vmem:[#allocation8 + $0x5c0] sm:$0xff] }
 0x237   : > { %v1225_v7 = vld [vmem:[#allocation8 + $0x5e0] sm:$0xff] }
 0x238   : > { %3977 = vmatpush1.bf16.msra.mxu0 %v3976_v18  ;;  %4105 = vmatpush1.bf16.msra.mxu1 %v4104_v19  ;;  %v4122_v18 = vpack.c.bf16 %v1196_v11, %v1192_v10  ;;  %v1195_v19 = vld [vmem:[#allocation8 + $0x4f0] sm:$0xff]  ;;  %v4138_v10 = vpack.c.bf16 %v1228_v1, %v1224_v63  ;;  %v4012_v16 = vpack.c.bf16 %v1225_v7, %v1221_v5  ;;  %v1268_v5 = vld [vmem:[#allocation8 + $0x738] sm:$0xff] }
 0x239   : > { %3979 = vmatprep.subr.bf16.mxu0 %v3978_v22  ;;  %4107 = vmatprep.subr.bf16.mxu1 %v4106_v23  ;;  %v1200_v22 = vld [vmem:[#allocation8 + $0x518] sm:$0xff]  ;;  %v4124_v25 = vpack.c.bf16 %v1195_v19, %v1191_v17  ;;  %v1227_v11 = vld [vmem:[#allocation8 + $0x5f0] sm:$0xff]  ;;  %v1229_v19 = vld [vmem:[#allocation8 + $0x600] sm:$0xff] }
 0x23a   : > { %v1204_v23 = vld [vmem:[#allocation8 + $0x538] sm:$0xff]  ;;  %v4016_v27 = vpack.c.bf16 %v1233_v20, %v1229_v19  ;;  %v1259_v1 = vld [vmem:[#allocation8 + $0x6f0] sm:$0xff] }
 0x23b   : > { %v1276_v19 = vld [vmem:[#allocation8 + $0x778] sm:$0xff] }
 0x23c   : > { %3981 = vmatpush1.bf16.msra.mxu0 %v3980_v29  ;;  %4109 = vmatpush1.bf16.msra.mxu1 %v4108_v30  ;;  %v4126_v29 = vpack.c.bf16 %v1204_v23, %v1200_v22  ;;  %v1203_v30 = vld [vmem:[#allocation8 + $0x530] sm:$0xff] }
 0x23d   : > { %3983 = vmatprep.subr.bf16.mxu0 %v3982_v31  ;;  %4111 = vmatprep.subr.bf16.mxu1 %v4110_v32  ;;  %v1206_v31 = vld [vmem:[#allocation8 + $0x548] sm:$0xff]  ;;  %v4128_v39 = vpack.c.bf16 %v1203_v30, %v1199_v28  ;;  %v1235_v23 = vld [vmem:[#allocation8 + $0x630] sm:$0xff]  ;;  %v1237_v30 = vld [vmem:[#allocation8 + $0x640] sm:$0xff] }
 0x23e   : > { %v1210_v32 = vld [vmem:[#allocation8 + $0x568] sm:$0xff]  ;;  %v4144_v28 = vpack.c.bf16 %v1235_v23, %v1231_v21  ;;  %v1269_v23 = vld [vmem:[#allocation8 + $0x740] sm:$0xff] }
 0x23f   : > { %1972 = vmatmul.mubr.f32.vlgmr.msra.gmra.mrb[4].mxu0 %v1029_v6  ;;  %2126 = vmatmul.mubr.f32.vlgmr.msra.gmra.mrb[4].mxu1 %v1029_v6  ;;  %v4002_v40 = vpack.c.bf16 %v1210_v32, %v1206_v31  ;;  %v1211_v6 = vld [vmem:[#allocation8 + $0x570] sm:$0xff]  ;;  %v1241_v31 = vld [vmem:[#allocation8 + $0x660] sm:$0xff] }
 0x240   : > { %1977 = vmatprep.mubr.f32.mxu0 %v5213_v58  ;;  %3985 = vmatpush1.bf16.msra.mxu0 %v3984_v43  ;;  %v4130_v43 = vpack.c.bf16 %v1212_v34, %v1208_v33  ;;  %v4132_v51 = vpack.c.bf16 %v1211_v6, %v1207_v60  ;;  %v1239_v32 = vld [vmem:[#allocation8 + $0x650] sm:$0xff]  ;;  %v1245_v6 = vld [vmem:[#allocation8 + $0x680] sm:$0xff] }
 0x241   : > { %2131 = vmatprep.mubr.f32.mxu1 %v5213_v58  ;;  %4113 = vmatpush1.bf16.msra.mxu1 %v4112_v44  ;;  %v1214_v44 = vld [vmem:[#allocation8 + $0x588] sm:$0xff]  ;;  %v1243_v34 = vld [vmem:[#allocation8 + $0x670] sm:$0xff] }
 0x242   : > { %3987 = vmatprep.subr.bf16.mxu0 %v3986_v48  ;;  %4115 = vmatprep.subr.bf16.mxu1 %v4114_v50  ;;  %v1220_v48 = vld [vmem:[#allocation8 + $0x5b8] sm:$0xff]  ;;  %v4004_v50 = vpack.c.bf16 %v1209_v42, %v1205_v41  ;;  %v4006_v52 = vpack.c.bf16 %v1218_v45, %v1214_v44  ;;  %v4020_v42 = vpack.c.bf16 %v1241_v31, %v1237_v30  ;;  %v1249_v44 = vld [vmem:[#allocation8 + $0x6a0] sm:$0xff]  ;;  %v1247_v45 = vld [vmem:[#allocation8 + $0x690] sm:$0xff] }
 0x243   : > { %1978 = vmatmul.mubr.f32.gmra.mrb[6].mxu0 %v5217_v8  ;;  %2132 = vmatmul.mubr.f32.gmra.mrb[6].mxu1 %v5217_v8  ;;  %v4134_v57 = vpack.c.bf16 %v1220_v48, %v1216_v47  ;;  %v1252_v41 = vld [vmem:[#allocation8 + $0x6b8] sm:$0xff]  ;;  %v4148_v60 = vpack.c.bf16 %v1243_v34, %v1239_v32  ;;  %v1251_v48 = vld [vmem:[#allocation8 + $0x6b0] sm:$0xff]  ;;  %v1277_v34 = vld [vmem:[#allocation8 + $0x780] sm:$0xff] }
 0x244   : > { %3989 = vmatpush1.bf16.msra.mxu0 %v3988_v59  ;;  %2048 = vmatprep.mubr.f32.mxu0 %v1032_v9  ;;  %v1219_v59 = vld [vmem:[#allocation8 + $0x5b0] sm:$0xff]  ;;  %v1284_v30 = vld [vmem:[#allocation8 + $0x7b8] sm:$0xff] }
 0x245   : > { %4117 = vmatpush1.bf16.msra.mxu1 %v4116_v61  ;;  %2202 = vmatprep.mubr.f32.mxu1 %v1032_v9  ;;  %v1222_v61 = vld [vmem:[#allocation8 + $0x5c8] sm:$0xff]  ;;  %v1223_v9 = vld [vmem:[#allocation8 + $0x5d0] sm:$0xff] }
 0x246   : > { %3991 = vmatprep.subr.bf16.mxu0 %v3990_v2  ;;  %4119 = vmatprep.subr.bf16.mxu1 %v4118_v3  ;;  %v4008_v2 = vpack.c.bf16 %v1217_v54, %v1213_v53  ;;  %v4136_v3 = vpack.c.bf16 %v1219_v59, %v1215_v56  ;;  %v4010_v4 = vpack.c.bf16 %v1226_v62, %v1222_v61  ;;  %v1260_v53 = vld [vmem:[#allocation8 + $0x6f8] sm:$0xff]  ;;  %v1253_v59 = vld [vmem:[#allocation8 + $0x6c0] sm:$0xff]  ;;  %v1255_v62 = vld [vmem:[#allocation8 + $0x6d0] sm:$0xff] }
 0x247   : > { %v4140_v17 = vpack.c.bf16 %v1227_v11, %v1223_v9  ;;  %v4024_v54 = vpack.c.bf16 %v1249_v44, %v1245_v6  ;;  %v4152_v56 = vpack.c.bf16 %v1251_v48, %v1247_v45  ;;  %v1257_v61 = vld [vmem:[#allocation8 + $0x6e0] sm:$0xff]  ;;  %v4156_v9 = vpack.c.bf16 %v1259_v1, %v1255_v62  ;;  %v1292_v6 = vld [vmem:[#allocation8 + $0x7f8] sm:$0xff] }
 0x248   : > { %3993 = vmatpush1.bf16.msra.mxu0 %v3992_v12  ;;  %v1230_v12 = vld [vmem:[#allocation8 + $0x608] sm:$0xff]  ;;  %v4028_v7 = vpack.c.bf16 %v1257_v61, %v1253_v59  ;;  %v1261_v11 = vld [vmem:[#allocation8 + $0x700] sm:$0xff]  ;;  %v2231_v59 = vld [vmem:[#allocation8 + $0x1038] sm:$0xff] }
 0x249   : > { %4121 = vmatpush1.bf16.msra.mxu1 %v4120_v13  ;;  %3995 = vmatprep.subr.bf16.mxu0 %v3994_v14  ;;  %v1234_v13 = vld [vmem:[#allocation8 + $0x628] sm:$0xff]  ;;  %v1232_v14 = vld [vmem:[#allocation8 + $0x618] sm:$0xff]  ;;  %v1285_v48 = vld [vmem:[#allocation8 + $0x7c0] sm:$0xff] }
 0x24a   : > { %4123 = vmatprep.subr.bf16.mxu1 %v4122_v18  ;;  %v4014_v18 = vpack.c.bf16 %v1234_v13, %v1230_v12  ;;  %v4142_v22 = vpack.c.bf16 %v1236_v15, %v1232_v14  ;;  %v1265_v12 = vld [vmem:[#allocation8 + $0x720] sm:$0xff]  ;;  %v1263_v13 = vld [vmem:[#allocation8 + $0x710] sm:$0xff] }
 0x24b   : > { %v1267_v15 = vld [vmem:[#allocation8 + $0x730] sm:$0xff]  ;;  %v4032_v20 = vpack.c.bf16 %v1265_v12, %v1261_v11  ;;  %v2239_v11 = vld [vmem:[#allocation8 + $0x1078] sm:$0xff]  ;;  %v2216_v12 = vld [vmem:[#allocation2 + $0x8] sm:$0xfc] }
 0x24c   : > { %3997 = vmatpush1.bf16.msra.mxu0 %v3996_v24  ;;  %v1238_v24 = vld [vmem:[#allocation8 + $0x648] sm:$0xff]  ;;  %v4160_v21 = vpack.c.bf16 %v1267_v15, %v1263_v13 }
 0x24d   : > { %4125 = vmatpush1.bf16.msra.mxu1 %v4124_v25  ;;  %3999 = vmatprep.subr.bf16.mxu0 %v3998_v55  ;;  %v1242_v25 = vld [vmem:[#allocation8 + $0x668] sm:$0xff]  ;;  %v1240_v55 = vld [vmem:[#allocation8 + $0x658] sm:$0xff] }
 0x24e   : > { %4127 = vmatprep.subr.bf16.mxu1 %v4126_v29  ;;  %v4018_v29 = vpack.c.bf16 %v1242_v25, %v1238_v24  ;;  %v4146_v33 = vpack.c.bf16 %v1244_v26, %v1240_v55  ;;  %v1273_v24 = vld [vmem:[#allocation8 + $0x760] sm:$0xff]  ;;  %v1271_v25 = vld [vmem:[#allocation8 + $0x750] sm:$0xff] }
 0x24f   : > { %v1275_v26 = vld [vmem:[#allocation8 + $0x770] sm:$0xff]  ;;  %v4036_v31 = vpack.c.bf16 %v1273_v24, %v1269_v23  ;;  %v2241_v23 = vld [vmem:[#allocation8 + $0x1088] sm:$0xff] }
 0x250   : > { %4001 = vmatpush1.bf16.msra.mxu0 %v4000_v37  ;;  %v1246_v37 = vld [vmem:[#allocation8 + $0x688] sm:$0xff]  ;;  %v4164_v32 = vpack.c.bf16 %v1275_v26, %v1271_v25  ;;  %v5221_v25 = vld [vmem:[#allocation2 + $0x38] sm:$0xff] }
 0x251   : > { %4129 = vmatpush1.bf16.msra.mxu1 %v4128_v39  ;;  %4003 = vmatprep.subr.bf16.mxu0 %v4002_v40  ;;  %v1250_v39 = vld [vmem:[#allocation8 + $0x6a8] sm:$0xff]  ;;  %v1248_v40 = vld [vmem:[#allocation8 + $0x698] sm:$0xff] }
 0x252   : > { %4131 = vmatprep.subr.bf16.mxu1 %v4130_v43  ;;  %v4022_v43 = vpack.c.bf16 %v1250_v39, %v1246_v37  ;;  %v4150_v47 = vpack.c.bf16 %v1252_v41, %v1248_v40  ;;  %v1281_v37 = vld [vmem:[#allocation8 + $0x7a0] sm:$0xff]  ;;  %v1279_v39 = vld [vmem:[#allocation8 + $0x790] sm:$0xff]  ;;  %v2245_v24 = vld [vmem:[#allocation8 + $0x10a8] sm:$0xff] }
 0x253   : > { %v1283_v41 = vld [vmem:[#allocation8 + $0x7b0] sm:$0xff]  ;;  %v4040_v44 = vpack.c.bf16 %v1281_v37, %v1277_v34  ;;  %v2247_v26 = vld [vmem:[#allocation8 + $0x10b8] sm:$0xff] }
 0x254   : > { %4005 = vmatpush1.bf16.msra.mxu0 %v4004_v50  ;;  %v1254_v50 = vld [vmem:[#allocation8 + $0x6c8] sm:$0xff]  ;;  %v4168_v45 = vpack.c.bf16 %v1283_v41, %v1279_v39 }
 0x255   : > { %4133 = vmatpush1.bf16.msra.mxu1 %v4132_v51  ;;  %4007 = vmatprep.subr.bf16.mxu0 %v4006_v52  ;;  %v1258_v51 = vld [vmem:[#allocation8 + $0x6e8] sm:$0xff]  ;;  %v1256_v52 = vld [vmem:[#allocation8 + $0x6d8] sm:$0xff] }
 0x256   : > { %4135 = vmatprep.subr.bf16.mxu1 %v4134_v57  ;;  %v4026_v57 = vpack.c.bf16 %v1258_v51, %v1254_v50  ;;  %v4154_v63 = vpack.c.bf16 %v1260_v53, %v1256_v52  ;;  %v1289_v50 = vld [vmem:[#allocation8 + $0x7e0] sm:$0xff]  ;;  %v1287_v51 = vld [vmem:[#allocation8 + $0x7d0] sm:$0xff]  ;;  %v2249_v41 = vld [vmem:[#allocation8 + $0x10c8] sm:$0xff] }
 0x257   : > { %v1291_v53 = vld [vmem:[#allocation8 + $0x7f0] sm:$0xff]  ;;  %v4044_v61 = vpack.c.bf16 %v1289_v50, %v1285_v48  ;;  %v2252_v48 = vld [vmem:[#allocation8 + $0x10e0] sm:$0xff] }
 0x258   : > { %4009 = vmatpush1.bf16.msra.mxu0 %v4008_v2  ;;  %v1262_v2 = vld [vmem:[#allocation8 + $0x708] sm:$0xff]  ;;  %v4172_v62 = vpack.c.bf16 %v1291_v53, %v1287_v51  ;;  %v2250_v50 = vld [vmem:[#allocation8 + $0x10d0] sm:$0xff] }
 0x259   : > { %4137 = vmatpush1.bf16.msra.mxu1 %v4136_v3  ;;  %4011 = vmatprep.subr.bf16.mxu0 %v4010_v4  ;;  %v1266_v3 = vld [vmem:[#allocation8 + $0x728] sm:$0xff]  ;;  %v1264_v4 = vld [vmem:[#allocation8 + $0x718] sm:$0xff] }
 0x25a   : > { %4139 = vmatprep.subr.bf16.mxu1 %v4138_v10  ;;  %v4030_v10 = vpack.c.bf16 %v1266_v3, %v1262_v2  ;;  %v4158_v14 = vpack.c.bf16 %v1268_v5, %v1264_v4  ;;  %v2224_v2 = vld [vmem:[#allocation8 + $0x1000] sm:$0xff]  ;;  %v2226_v4 = vld [vmem:[#allocation8 + $0x1010] sm:$0xff]  ;;  %v2257_v53 = vld [vmem:[#allocation8 + $0x1108] sm:$0xff] }
 0x25b   : > { %v2228_v3 = vld [vmem:[#allocation8 + $0x1020] sm:$0xff]  ;;  %v2230_v5 = vld [vmem:[#allocation8 + $0x1030] sm:$0xff] }
 0x25c   : > { %4013 = vmatpush1.bf16.msra.mxu0 %v4012_v16  ;;  %v1270_v16 = vld [vmem:[#allocation8 + $0x748] sm:$0xff]  ;;  %v4304_v15 = vpack.c.bf16 %v2230_v5, %v2226_v4  ;;  %v2262_v4 = vld [vmem:[#allocation8 + $0x1130] sm:$0xff] }
 0x25d   : > { %4141 = vmatpush1.bf16.msra.mxu1 %v4140_v17  ;;  %4015 = vmatprep.subr.bf16.mxu0 %v4014_v18  ;;  %v1274_v17 = vld [vmem:[#allocation8 + $0x768] sm:$0xff]  ;;  %v1272_v18 = vld [vmem:[#allocation8 + $0x758] sm:$0xff] }
 0x25e   : > { %4143 = vmatprep.subr.bf16.mxu1 %v4142_v22  ;;  %v4034_v22 = vpack.c.bf16 %v1274_v17, %v1270_v16  ;;  %v4162_v55 = vpack.c.bf16 %v1276_v19, %v1272_v18  ;;  %v1031_v13 = vld [vmem:[#allocation2 + $0x10] sm:$0xff]  ;;  %v2232_v17 = vld [vmem:[#allocation8 + $0x1040] sm:$0xff] }
 0x25f   : > { %v2236_v18 = vld [vmem:[#allocation8 + $0x1060] sm:$0xff]  ;;  %v2234_v19 = vld [vmem:[#allocation8 + $0x1050] sm:$0xff]  ;;  %v2265_v5 = vld [vmem:[#allocation8 + $0x1148] sm:$0xff] }
 0x260   : > { %4017 = vmatpush1.bf16.msra.mxu0 %v4016_v27  ;;  %v1278_v27 = vld [vmem:[#allocation8 + $0x788] sm:$0xff] }
 0x261   : > { %4145 = vmatpush1.bf16.msra.mxu1 %v4144_v28  ;;  %4019 = vmatprep.subr.bf16.mxu0 %v4018_v29  ;;  %v1282_v28 = vld [vmem:[#allocation8 + $0x7a8] sm:$0xff]  ;;  %v1280_v29 = vld [vmem:[#allocation8 + $0x798] sm:$0xff] }
 0x262   : > { %4147 = vmatprep.subr.bf16.mxu1 %v4146_v33  ;;  %v4038_v33 = vpack.c.bf16 %v1282_v28, %v1278_v27  ;;  %v4166_v40 = vpack.c.bf16 %v1284_v30, %v1280_v29  ;;  %v4180_v27 = vpack.c.bf16 %v2236_v18, %v2232_v17  ;;  %v2493_v28 = vrot.slane %v5213_v58, 2  ;;  %v5226_v34 = vld [vmem:[#allocation2 + $0x30] sm:$0xff] }
 0x263   : > { %v4182_v30 = vpack.c.bf16 %v2245_v24, %v2241_v23  ;;  %v2270_v18 = vld [vmem:[#allocation8 + $0x1170] sm:$0xff] }
 0x264   : > { %4021 = vmatpush1.bf16.msra.mxu0 %v4020_v42  ;;  %v1286_v42 = vld [vmem:[#allocation8 + $0x7c8] sm:$0xff] }
 0x265   : > { %4149 = vmatpush1.bf16.msra.mxu1 %v4148_v60  ;;  %4023 = vmatprep.subr.bf16.mxu0 %v4022_v43  ;;  %v1290_v60 = vld [vmem:[#allocation8 + $0x7e8] sm:$0xff]  ;;  %v1288_v43 = vld [vmem:[#allocation8 + $0x7d8] sm:$0xff] }
 0x266   : > { %4151 = vmatprep.subr.bf16.mxu1 %v4150_v47  ;;  %v4042_v47 = vpack.c.bf16 %v1290_v60, %v1286_v42  ;;  %v4170_v52 = vpack.c.bf16 %v1292_v6, %v1288_v43  ;;  %v2253_v42 = vld [vmem:[#allocation8 + $0x10e8] sm:$0xff]  ;;  %v2251_v60 = vld [vmem:[#allocation8 + $0x10d8] sm:$0xff] }
 0x267   : > { %v2255_v43 = vld [vmem:[#allocation8 + $0x10f8] sm:$0xff] }
 0x268   : > { %4025 = vmatpush1.bf16.msra.mxu0 %v4024_v54  ;;  %v2225_v54 = vld [vmem:[#allocation8 + $0x1008] sm:$0xff]  ;;  %v4314_v51 = vpack.c.bf16 %v2255_v43, %v2251_v60  ;;  %v2280_v60 = vld [vmem:[#allocation8 + $0x11c0] sm:$0xff] }
 0x269   : > { %4153 = vmatpush1.bf16.msra.mxu1 %v4152_v56  ;;  %4027 = vmatprep.subr.bf16.mxu0 %v4026_v57  ;;  %v2229_v56 = vld [vmem:[#allocation8 + $0x1028] sm:$0xff]  ;;  %v2227_v57 = vld [vmem:[#allocation8 + $0x1018] sm:$0xff]  ;;  %v2284_v43 = vld [vmem:[#allocation8 + $0x11e0] sm:$0xff] }
 0x26a   : > { %4155 = vmatprep.subr.bf16.mxu1 %v4154_v63  ;;  %v4174_v63 = vpack.c.bf16 %v2229_v56, %v2225_v54  ;;  %v4302_v1 = vpack.c.bf16 %v2231_v59, %v2227_v57  ;;  %v2261_v54 = vld [vmem:[#allocation8 + $0x1128] sm:$0xff]  ;;  %v2259_v56 = vld [vmem:[#allocation8 + $0x1118] sm:$0xff] }
 0x26b   : > { %v2263_v57 = vld [vmem:[#allocation8 + $0x1138] sm:$0xff] }
 0x26c   : > { %4029 = vmatpush1.bf16.msra.mxu0 %v4028_v7  ;;  %v2233_v7 = vld [vmem:[#allocation8 + $0x1048] sm:$0xff] }
 0x26d   : > { %4157 = vmatpush1.bf16.msra.mxu1 %v4156_v9  ;;  %4031 = vmatprep.subr.bf16.mxu0 %v4030_v10  ;;  %v2237_v9 = vld [vmem:[#allocation8 + $0x1068] sm:$0xff]  ;;  %v2235_v10 = vld [vmem:[#allocation8 + $0x1058] sm:$0xff] }
 0x26e   : > { %4159 = vmatprep.subr.bf16.mxu1 %v4158_v14  ;;  %v4176_v14 = vpack.c.bf16 %v2228_v3, %v2224_v2  ;;  %v4178_v16 = vpack.c.bf16 %v2237_v9, %v2233_v7  ;;  %v2258_v2 = vld [vmem:[#allocation8 + $0x1110] sm:$0xff]  ;;  %v4318_v3 = vpack.c.bf16 %v2263_v57, %v2259_v56  ;;  %v2269_v7 = vld [vmem:[#allocation8 + $0x1168] sm:$0xff]  ;;  %v2267_v9 = vld [vmem:[#allocation8 + $0x1158] sm:$0xff] }
 0x26f   : > { %v2288_v56 = vld [vmem:[#allocation8 + $0x1200] sm:$0xff] }
 0x270   : > { %4033 = vmatpush1.bf16.msra.mxu0 %v4032_v20  ;;  %v4306_v20 = vpack.c.bf16 %v2239_v11, %v2235_v10  ;;  %v2271_v10 = vld [vmem:[#allocation8 + $0x1178] sm:$0xff]  ;;  %v2292_v57 = vld [vmem:[#allocation8 + $0x1220] sm:$0xff] }
 0x271   : > { %4161 = vmatpush1.bf16.msra.mxu1 %v4160_v21  ;;  %4035 = vmatprep.subr.bf16.mxu0 %v4034_v22  ;;  %v2492_v21 = vrot.slane %v2216_v12, 2  ;;  %v2238_v22 = vld [vmem:[#allocation8 + $0x1070] sm:$0xff]  ;;  %v4320_v12 = vpack.c.bf16 %v2262_v4, %v2258_v2  ;;  %v4322_v17 = vpack.c.bf16 %v2271_v10, %v2267_v9  ;;  %v2299_v2 = vld [vmem:[#allocation8 + $0x1258] sm:$0xff]  ;;  %v4208_v4 = vpack.c.bf16 %v2292_v57, %v2288_v56  ;;  %v2296_v9 = vld [vmem:[#allocation8 + $0x1240] sm:$0xff] }
 0x272   : > { %4163 = vmatprep.subr.bf16.mxu1 %v4162_v55  ;;  %v2243_v55 = vld [vmem:[#allocation8 + $0x1098] sm:$0xff]  ;;  %v4308_v29 = vpack.c.bf16 %v2238_v22, %v2234_v19  ;;  %v2273_v19 = vld [vmem:[#allocation8 + $0x1188] sm:$0xff]  ;;  %v2300_v10 = vld [vmem:[#allocation8 + $0x1260] sm:$0xff] }
 0x273   : > { %v2494_v37 = vsel %vm2488_vm4, %v2492_v21, %v2493_v28  ;;  %v4310_v39 = vpack.c.bf16 %v2247_v26, %v2243_v55  ;;  %v2275_v21 = vld [vmem:[#allocation8 + $0x1198] sm:$0xff]  ;;  %v2272_v26 = vld [vmem:[#allocation8 + $0x1180] sm:$0xff]  ;;  %v2329_v56 = vld [vmem:[#allocation8 + $0x1348] sm:$0xff] }
 0x274   : > { %4037 = vmatpush1.bf16.msra.mxu0 %v4036_v31  ;;  %v2240_v31 = vld [vmem:[#allocation8 + $0x1080] sm:$0xff]  ;;  %v2279_v22 = vld [vmem:[#allocation8 + $0x11b8] sm:$0xff]  ;;  %v2333_v57 = vld [vmem:[#allocation8 + $0x1368] sm:$0xff] }
 0x275   : > { %4165 = vmatpush1.bf16.msra.mxu1 %v4164_v32  ;;  %4039 = vmatprep.subr.bf16.mxu0 %v4038_v33  ;;  %v2244_v32 = vld [vmem:[#allocation8 + $0x10a0] sm:$0xff]  ;;  %v2242_v33 = vld [vmem:[#allocation8 + $0x1090] sm:$0xff] }
 0x276   : > { %4167 = vmatprep.subr.bf16.mxu1 %v4166_v40  ;;  %v2246_v40 = vld [vmem:[#allocation8 + $0x10b0] sm:$0xff]  ;;  %v4184_v6 = vpack.c.bf16 %v2244_v32, %v2240_v31  ;;  %v2281_v32 = vld [vmem:[#allocation8 + $0x11c8] sm:$0xff] }
 0x277   : > { %v2278_v31 = vld [vmem:[#allocation8 + $0x11b0] sm:$0xff] }
 0x278   : > { %4041 = vmatpush1.bf16.msra.mxu0 %v4040_v44  ;;  %v4312_v44 = vpack.c.bf16 %v2246_v40, %v2242_v33  ;;  %v2285_v33 = vld [vmem:[#allocation8 + $0x11e8] sm:$0xff] }
 0x279   : > { %4169 = vmatpush1.bf16.msra.mxu1 %v4168_v45  ;;  %4043 = vmatprep.subr.bf16.mxu0 %v4042_v47  ;;  %v4186_v45 = vpack.c.bf16 %v2253_v42, %v2249_v41  ;;  %v2248_v47 = vld [vmem:[#allocation8 + $0x10c0] sm:$0xff]  ;;  %v4202_v42 = vpack.c.bf16 %v2285_v33, %v2281_v32 }
 0x27a   : > { %4171 = vmatprep.subr.bf16.mxu1 %v4170_v52  ;;  %v2254_v52 = vld [vmem:[#allocation8 + $0x10f0] sm:$0xff]  ;;  %v4188_v59 = vpack.c.bf16 %v2252_v48, %v2248_v47  ;;  %v2289_v47 = vld [vmem:[#allocation8 + $0x1208] sm:$0xff] }
 0x27b   : > { %v2293_v48 = vld [vmem:[#allocation8 + $0x1228] sm:$0xff] }
 0x27c   : > { %4045 = vmatpush1.bf16.msra.mxu0 %v4044_v61  ;;  %v4316_v61 = vpack.c.bf16 %v2254_v52, %v2250_v50  ;;  %v2291_v50 = vld [vmem:[#allocation8 + $0x1218] sm:$0xff]  ;;  %v4204_v52 = vpack.c.bf16 %v2284_v43, %v2280_v60  ;;  %v2321_v60 = vld [vmem:[#allocation8 + $0x1308] sm:$0xff] }
 0x27d   : > { %4173 = vmatpush1.bf16.msra.mxu1 %v4172_v62  ;;  %4175 = vmatprep.subr.bf16.mxu0 %v4174_v63  ;;  %v4190_v62 = vpack.c.bf16 %v2261_v54, %v2257_v53  ;;  %v2256_v63 = vld [vmem:[#allocation8 + $0x1100] sm:$0xff]  ;;  %v4206_v54 = vpack.c.bf16 %v2293_v48, %v2289_v47  ;;  %v2325_v43 = vld [vmem:[#allocation8 + $0x1328] sm:$0xff] }
 0x27e   : > { %4303 = vmatprep.subr.bf16.mxu1 %v4302_v1  ;;  %v2260_v1 = vld [vmem:[#allocation8 + $0x1120] sm:$0xff]  ;;  %v4222_v48 = vpack.c.bf16 %v2325_v43, %v2321_v60 }
 0x27f   : > { %2049 = vmatmul.mubr.f32.vlgmr.msra.gmra.mrb[4].mxu0 %v1031_v13  ;;  %v4192_v11 = vpack.c.bf16 %v2260_v1, %v2256_v63  ;;  %v2297_v63 = vld [vmem:[#allocation8 + $0x1248] sm:$0xff]  ;;  %v2220_v43 = vld [vmem:[#allocation2 + $0x48] sm:$0x3] }
 0x280   : > { %2203 = vmatmul.mubr.f32.vlgmr.msra.gmra.mrb[4].mxu1 %v1031_v13  ;;  %2054 = vmatprep.mubr.f32.mxu0 %v5221_v25  ;;  %v4194_v13 = vpack.c.bf16 %v2269_v7, %v2265_v5  ;;  %v2301_v1 = vld [vmem:[#allocation8 + $0x1268] sm:$0xff] }
 0x281   : > { %2208 = vmatprep.mubr.f32.mxu1 %v5221_v25  ;;  %4177 = vmatpush1.bf16.msra.mxu0 %v4176_v14  ;;  %v2264_v14 = vld [vmem:[#allocation8 + $0x1140] sm:$0xff]  ;;  %v4210_v7 = vpack.c.bf16 %v2301_v1, %v2297_v63  ;;  %v4226_v1 = vpack.c.bf16 %v2333_v57, %v2329_v56  ;;  %v2361_v56 = vld [vmem:[#allocation8 + $0x1448] sm:$0xff] }
 0x282   : > { %4305 = vmatpush1.bf16.msra.mxu1 %v4304_v15  ;;  %4179 = vmatprep.subr.bf16.mxu0 %v4178_v16  ;;  %v2268_v15 = vld [vmem:[#allocation8 + $0x1160] sm:$0xff]  ;;  %v2266_v16 = vld [vmem:[#allocation8 + $0x1150] sm:$0xff]  ;;  %v2365_v57 = vld [vmem:[#allocation8 + $0x1468] sm:$0xff] }
 0x283   : > { %2055 = vmatmul.mubr.f32.gmra.mrb[6].mxu0 %v5226_v34  ;;  %4307 = vmatprep.subr.bf16.mxu1 %v4306_v20  ;;  %v2277_v20 = vld [vmem:[#allocation8 + $0x11a8] sm:$0xff]  ;;  %v4196_v23 = vpack.c.bf16 %v2268_v15, %v2264_v14  ;;  %v4324_v24 = vpack.c.bf16 %v2270_v18, %v2266_v16  ;;  %v2307_v16 = vld [vmem:[#allocation8 + $0x1298] sm:$0xff]  ;;  %v4212_v18 = vpack.c.bf16 %v2300_v10, %v2296_v9 }
 0x284   : > { %2209 = vmatmul.mubr.f32.gmra.mrb[6].mxu1 %v5226_v34  ;;  %2581 = vmatprep.mubr.f32.mxu0 %v2494_v37  ;;  %v4198_v55 = vpack.c.bf16 %v2277_v20, %v2273_v19  ;;  %v2305_v14 = vld [vmem:[#allocation8 + $0x1288] sm:$0xff] }
 0x285   : > { %4181 = vmatpush1.bf16.msra.mxu0 %v4180_v27  ;;  %2735 = vmatprep.mubr.f32.mxu1 %v2494_v37  ;;  %v2276_v27 = vld [vmem:[#allocation8 + $0x11a0] sm:$0xff]  ;;  %v2283_v37 = vld [vmem:[#allocation8 + $0x11d8] sm:$0xff]  ;;  %v2309_v15 = vld [vmem:[#allocation8 + $0x12a8] sm:$0xff] }
 0x286   : > { %4309 = vmatpush1.bf16.msra.mxu1 %v4308_v29  ;;  %4183 = vmatprep.subr.bf16.mxu0 %v4182_v30  ;;  %v2274_v29 = vld [vmem:[#allocation8 + $0x1190] sm:$0xff]  ;;  %v4326_v30 = vpack.c.bf16 %v2279_v22, %v2275_v21  ;;  %v4200_v40 = vpack.c.bf16 %v2276_v27, %v2272_v26  ;;  %v4214_v20 = vpack.c.bf16 %v2309_v15, %v2305_v14  ;;  %v2304_v21 = vld [vmem:[#allocation8 + $0x1280] sm:$0xff]  ;;  %v2313_v26 = vld [vmem:[#allocation8 + $0x12c8] sm:$0xff] }
 0x287   : > { %4311 = vmatprep.subr.bf16.mxu1 %v4310_v39  ;;  %v2287_v39 = vld [vmem:[#allocation8 + $0x11f8] sm:$0xff]  ;;  %v4328_v41 = vpack.c.bf16 %v2278_v31, %v2274_v29  ;;  %v2308_v22 = vld [vmem:[#allocation8 + $0x12a0] sm:$0xff]  ;;  %v2317_v27 = vld [vmem:[#allocation8 + $0x12e8] sm:$0xff] }
 0x288   : > { %v2315_v29 = vld [vmem:[#allocation8 + $0x12d8] sm:$0xff]  ;;  %v4216_v31 = vpack.c.bf16 %v2308_v22, %v2304_v21  ;;  %v4218_v33 = vpack.c.bf16 %v2317_v27, %v2313_v26  ;;  %v2337_v9 = vld [vmem:[#allocation8 + $0x1388] sm:$0xff] }
 0x289   : > { %4185 = vmatpush1.bf16.msra.mxu0 %v4184_v6  ;;  %v2282_v6 = vld [vmem:[#allocation8 + $0x11d0] sm:$0xff]  ;;  %v2341_v10 = vld [vmem:[#allocation8 + $0x13a8] sm:$0xff] }
 0x28a   : > { %4313 = vmatpush1.bf16.msra.mxu1 %v4312_v44  ;;  %4187 = vmatprep.subr.bf16.mxu0 %v4186_v45  ;;  %v4330_v44 = vpack.c.bf16 %v2287_v39, %v2283_v37  ;;  %v2286_v45 = vld [vmem:[#allocation8 + $0x11f0] sm:$0xff]  ;;  %v2312_v37 = vld [vmem:[#allocation8 + $0x12c0] sm:$0xff]  ;;  %v4230_v15 = vpack.c.bf16 %v2341_v10, %v2337_v9  ;;  %v2345_v21 = vld [vmem:[#allocation8 + $0x13c8] sm:$0xff] }
 0x28b   : > { %4315 = vmatprep.subr.bf16.mxu1 %v4314_v51  ;;  %v2295_v51 = vld [vmem:[#allocation8 + $0x1238] sm:$0xff]  ;;  %v4332_v53 = vpack.c.bf16 %v2286_v45, %v2282_v6  ;;  %v2316_v39 = vld [vmem:[#allocation8 + $0x12e0] sm:$0xff]  ;;  %v2349_v22 = vld [vmem:[#allocation8 + $0x13e8] sm:$0xff] }
 0x28c   : > { %v2323_v6 = vld [vmem:[#allocation8 + $0x1318] sm:$0xff]  ;;  %v4220_v45 = vpack.c.bf16 %v2316_v39, %v2312_v37  ;;  %v4234_v27 = vpack.c.bf16 %v2349_v22, %v2345_v21  ;;  %v2353_v37 = vld [vmem:[#allocation8 + $0x1408] sm:$0xff]  ;;  %v2364_v9 = vld [vmem:[#allocation8 + $0x1460] sm:$0xff] }
 0x28d   : > { %4189 = vmatpush1.bf16.msra.mxu0 %v4188_v59  ;;  %v2290_v59 = vld [vmem:[#allocation8 + $0x1210] sm:$0xff]  ;;  %v2357_v39 = vld [vmem:[#allocation8 + $0x1428] sm:$0xff]  ;;  %v2368_v21 = vld [vmem:[#allocation8 + $0x1480] sm:$0xff] }
 0x28e   : > { %4317 = vmatpush1.bf16.msra.mxu1 %v4316_v61  ;;  %4191 = vmatprep.subr.bf16.mxu0 %v4190_v62  ;;  %v4334_v61 = vpack.c.bf16 %v2295_v51, %v2291_v50  ;;  %v2294_v62 = vld [vmem:[#allocation8 + $0x1230] sm:$0xff]  ;;  %v2320_v50 = vld [vmem:[#allocation8 + $0x1300] sm:$0xff] }
 0x28f   : > { %4319 = vmatprep.subr.bf16.mxu1 %v4318_v3  ;;  %v2303_v3 = vld [vmem:[#allocation8 + $0x1278] sm:$0xff]  ;;  %v4336_v5 = vpack.c.bf16 %v2294_v62, %v2290_v59  ;;  %v2324_v51 = vld [vmem:[#allocation8 + $0x1320] sm:$0xff]  ;;  %v2362_v10 = vld [vmem:[#allocation8 + $0x1450] sm:$0xff] }
 0x290   : > { %v2331_v59 = vld [vmem:[#allocation8 + $0x1358] sm:$0xff]  ;;  %v4224_v62 = vpack.c.bf16 %v2324_v51, %v2320_v50  ;;  %v2352_v50 = vld [vmem:[#allocation8 + $0x1400] sm:$0xff] }
 0x291   : > { %4193 = vmatpush1.bf16.msra.mxu0 %v4192_v11  ;;  %v2298_v11 = vld [vmem:[#allocation8 + $0x1250] sm:$0xff]  ;;  %v2356_v51 = vld [vmem:[#allocation8 + $0x1420] sm:$0xff] }
 0x292   : > { %4321 = vmatpush1.bf16.msra.mxu1 %v4320_v12  ;;  %4195 = vmatprep.subr.bf16.mxu0 %v4194_v13  ;;  %v4338_v12 = vpack.c.bf16 %v2303_v3, %v2299_v2  ;;  %v2302_v13 = vld [vmem:[#allocation8 + $0x1270] sm:$0xff]  ;;  %v2328_v2 = vld [vmem:[#allocation8 + $0x1340] sm:$0xff] }
 0x293   : > { %4323 = vmatprep.subr.bf16.mxu1 %v4322_v17  ;;  %v2311_v17 = vld [vmem:[#allocation8 + $0x12b8] sm:$0xff]  ;;  %v4340_v19 = vpack.c.bf16 %v2302_v13, %v2298_v11  ;;  %v2332_v3 = vld [vmem:[#allocation8 + $0x1360] sm:$0xff] }
 0x294   : > { %v2339_v11 = vld [vmem:[#allocation8 + $0x1398] sm:$0xff]  ;;  %v4228_v13 = vpack.c.bf16 %v2332_v3, %v2328_v2  ;;  %v2372_v22 = vld [vmem:[#allocation8 + $0x14a0] sm:$0xff] }
 0x295   : > { %4197 = vmatpush1.bf16.msra.mxu0 %v4196_v23  ;;  %v2306_v23 = vld [vmem:[#allocation8 + $0x1290] sm:$0xff] }
 0x296   : > { %4325 = vmatpush1.bf16.msra.mxu1 %v4324_v24  ;;  %4199 = vmatprep.subr.bf16.mxu0 %v4198_v55  ;;  %v4342_v24 = vpack.c.bf16 %v2311_v17, %v2307_v16  ;;  %v2310_v55 = vld [vmem:[#allocation8 + $0x12b0] sm:$0xff]  ;;  %v2336_v16 = vld [vmem:[#allocation8 + $0x1380] sm:$0xff] }
 0x297   : > { %4327 = vmatprep.subr.bf16.mxu1 %v4326_v30  ;;  %v2319_v30 = vld [vmem:[#allocation8 + $0x12f8] sm:$0xff]  ;;  %v4344_v32 = vpack.c.bf16 %v2310_v55, %v2306_v23  ;;  %v2340_v17 = vld [vmem:[#allocation8 + $0x13a0] sm:$0xff] }
 0x298   : > { %v2347_v23 = vld [vmem:[#allocation8 + $0x13d8] sm:$0xff]  ;;  %v4232_v55 = vpack.c.bf16 %v2340_v17, %v2336_v16  ;;  %v2373_v16 = vld [vmem:[#allocation8 + $0x14a8] sm:$0xff] }
 0x299   : > { %4201 = vmatpush1.bf16.msra.mxu0 %v4200_v40  ;;  %v2314_v40 = vld [vmem:[#allocation8 + $0x12d0] sm:$0xff]  ;;  %v2371_v17 = vld [vmem:[#allocation8 + $0x1498] sm:$0xff] }
 0x29a   : > { %4329 = vmatpush1.bf16.msra.mxu1 %v4328_v41  ;;  %4203 = vmatprep.subr.bf16.mxu0 %v4202_v42  ;;  %v4346_v41 = vpack.c.bf16 %v2319_v30, %v2315_v29  ;;  %v2318_v42 = vld [vmem:[#allocation8 + $0x12f0] sm:$0xff]  ;;  %v2344_v29 = vld [vmem:[#allocation8 + $0x13c0] sm:$0xff] }
 0x29b   : > { %4331 = vmatprep.subr.bf16.mxu1 %v4330_v44  ;;  %v2327_v44 = vld [vmem:[#allocation8 + $0x1338] sm:$0xff]  ;;  %v4348_v47 = vpack.c.bf16 %v2318_v42, %v2314_v40  ;;  %v2348_v30 = vld [vmem:[#allocation8 + $0x13e0] sm:$0xff] }
 0x29c   : > { %v2215_v40 = vld [vmem:[#allocation2] sm:$0xfc]  ;;  %v4236_v60 = vpack.c.bf16 %v2348_v30, %v2344_v29  ;;  %v2381_v29 = vld [vmem:[#allocation8 + $0x14e8] sm:$0xff] }
 0x29d   : > { %4205 = vmatpush1.bf16.msra.mxu0 %v4204_v52  ;;  %v2322_v52 = vld [vmem:[#allocation8 + $0x1310] sm:$0xff]  ;;  %v2359_v42 = vld [vmem:[#allocation8 + $0x1438] sm:$0xff] }
 0x29e   : > { %4333 = vmatpush1.bf16.msra.mxu1 %v4332_v53  ;;  %4207 = vmatprep.subr.bf16.mxu0 %v4206_v54  ;;  %v4350_v53 = vpack.c.bf16 %v2327_v44, %v2323_v6  ;;  %v2326_v54 = vld [vmem:[#allocation8 + $0x1330] sm:$0xff]  ;;  %v4238_v44 = vpack.c.bf16 %v2357_v39, %v2353_v37  ;;  %v2379_v30 = vld [vmem:[#allocation8 + $0x14d8] sm:$0xff]  ;;  %v2376_v39 = vld [vmem:[#allocation8 + $0x14c0] sm:$0xff] }
 0x29f   : > { %4335 = vmatprep.subr.bf16.mxu1 %v4334_v61  ;;  %v2335_v61 = vld [vmem:[#allocation8 + $0x1378] sm:$0xff]  ;;  %v4352_v63 = vpack.c.bf16 %v2326_v54, %v2322_v52  ;;  %v2354_v52 = vld [vmem:[#allocation8 + $0x1410] sm:$0xff] }
 0x2a0   : > { %v2358_v54 = vld [vmem:[#allocation8 + $0x1430] sm:$0xff] }
 0x2a1   : > { %4209 = vmatpush1.bf16.msra.mxu0 %v4208_v4  ;;  %v2330_v4 = vld [vmem:[#allocation8 + $0x1350] sm:$0xff]  ;;  %v4368_v3 = vpack.c.bf16 %v2358_v54, %v2354_v52  ;;  %v2388_v52 = vld [vmem:[#allocation8 + $0x1520] sm:$0xff] }
 0x2a2   : > { %4337 = vmatpush1.bf16.msra.mxu1 %v4336_v5  ;;  %4211 = vmatprep.subr.bf16.mxu0 %v4210_v7  ;;  %v4354_v5 = vpack.c.bf16 %v2335_v61, %v2331_v59  ;;  %v2334_v7 = vld [vmem:[#allocation8 + $0x1370] sm:$0xff]  ;;  %v2490_v59 = vrot.slane %v5217_v8, 2  ;;  %v2363_v61 = vld [vmem:[#allocation8 + $0x1458] sm:$0xff] }
 0x2a3   : > { %4339 = vmatprep.subr.bf16.mxu1 %v4338_v12  ;;  %v2343_v12 = vld [vmem:[#allocation8 + $0x13b8] sm:$0xff]  ;;  %v4356_v14 = vpack.c.bf16 %v2334_v7, %v2330_v4  ;;  %v2360_v7 = vld [vmem:[#allocation8 + $0x1440] sm:$0xff] }
 0x2a5   : > { %4213 = vmatpush1.bf16.msra.mxu0 %v4212_v18  ;;  %v2338_v18 = vld [vmem:[#allocation8 + $0x1390] sm:$0xff] }
 0x2a6   : > { %4341 = vmatpush1.bf16.msra.mxu1 %v4340_v19  ;;  %4215 = vmatprep.subr.bf16.mxu0 %v4214_v20  ;;  %v4358_v19 = vpack.c.bf16 %v2343_v12, %v2339_v11  ;;  %v2342_v20 = vld [vmem:[#allocation8 + $0x13b0] sm:$0xff] }
 0x2a7   : > { %4343 = vmatprep.subr.bf16.mxu1 %v4342_v24  ;;  %v2351_v24 = vld [vmem:[#allocation8 + $0x13f8] sm:$0xff]  ;;  %v4360_v26 = vpack.c.bf16 %v2342_v20, %v2338_v18 }
 0x2a8   : > { %v2375_v18 = vld [vmem:[#allocation8 + $0x14b8] sm:$0xff] }
 0x2a9   : > { %4217 = vmatpush1.bf16.msra.mxu0 %v4216_v31  ;;  %v2346_v31 = vld [vmem:[#allocation8 + $0x13d0] sm:$0xff] }
 0x2aa   : > { %4345 = vmatpush1.bf16.msra.mxu1 %v4344_v32  ;;  %4219 = vmatprep.subr.bf16.mxu0 %v4218_v33  ;;  %v4362_v32 = vpack.c.bf16 %v2351_v24, %v2347_v23  ;;  %v2350_v33 = vld [vmem:[#allocation8 + $0x13f0] sm:$0xff] }
 0x2ab   : > { %4347 = vmatprep.subr.bf16.mxu1 %v4346_v41  ;;  %v2355_v41 = vld [vmem:[#allocation8 + $0x1418] sm:$0xff]  ;;  %v4364_v6 = vpack.c.bf16 %v2350_v33, %v2346_v31  ;;  %v2370_v23 = vld [vmem:[#allocation8 + $0x1490] sm:$0xff] }
 0x2ac   : > { %v2383_v31 = vld [vmem:[#allocation8 + $0x14f8] sm:$0xff] }
 0x2ad   : > { %4221 = vmatpush1.bf16.msra.mxu0 %v4220_v45  ;;  %v2219_v45 = vld [vmem:[#allocation2 + $0x40] sm:$0x3] }
 0x2ae   : > { %4349 = vmatpush1.bf16.msra.mxu1 %v4348_v47  ;;  %4223 = vmatprep.subr.bf16.mxu0 %v4222_v48  ;;  %v2489_v47 = vrot.slane %v2215_v40, 2  ;;  %v4366_v48 = vpack.c.bf16 %v2359_v42, %v2355_v41  ;;  %v2501_v4 = vrot.slane %v2219_v45, 2  ;;  %v2380_v40 = vld [vmem:[#allocation8 + $0x14e0] sm:$0xff]  ;;  %v2378_v41 = vld [vmem:[#allocation8 + $0x14d0] sm:$0xff]  ;;  %v4378_v42 = vpack.c.bf16 %v2383_v31, %v2379_v30  ;;  %v2391_v45 = vld [vmem:[#allocation8 + $0x1538] sm:$0xff] }
 0x2af   : > { %4351 = vmatprep.subr.bf16.mxu1 %v4350_v53  ;;  %v2503_v53 = vrot.slane %v2220_v43, 2  ;;  %v2385_v43 = vld [vmem:[#allocation8 + $0x1508] sm:$0xff]  ;;  %v2410_v30 = vld [vmem:[#allocation8 + $0x15d0] sm:$0xff] }
 0x2b0   : > { %v2491_v2 = vsel %vm2488_vm4, %v2489_v47, %v2490_v59  ;;  %v2502_v20 = vsel %vm2488_vm4, %v2490_v59, %v2501_v4  ;;  %v4252_v47 = vpack.c.bf16 %v2380_v40, %v2376_v39  ;;  %v2397_v59 = vld [vmem:[#allocation8 + $0x1568] sm:$0xff]  ;;  %v2396_v4 = vld [vmem:[#allocation8 + $0x1560] sm:$0xff]  ;;  %v2419_v39 = vld [vmem:[#allocation8 + $0x1618] sm:$0xff] }
 0x2b1   : > { %4225 = vmatpush1.bf16.msra.mxu0 %v4224_v62  ;;  %v2367_v62 = vld [vmem:[#allocation8 + $0x1478] sm:$0xff]  ;;  %v2504_v8 = vsel %vm2488_vm4, %v2493_v28, %v2503_v53  ;;  %v2386_v53 = vld [vmem:[#allocation8 + $0x1510] sm:$0xff] }
 0x2b2   : > { %4353 = vmatpush1.bf16.msra.mxu1 %v4352_v63  ;;  %4227 = vmatprep.subr.bf16.mxu0 %v4226_v1  ;;  %v2218_v63 = vld [vmem:[#allocation2 + $0x18] sm:$0xfc]  ;;  %v4240_v1 = vpack.c.bf16 %v2356_v51, %v2352_v50  ;;  %v4370_v11 = vpack.c.bf16 %v2367_v62, %v2363_v61  ;;  %v2384_v51 = vld [vmem:[#allocation8 + $0x1500] sm:$0xff] }
 0x2b3   : > { %4355 = vmatprep.subr.bf16.mxu1 %v4354_v5  ;;  %v4242_v5 = vpack.c.bf16 %v2365_v57, %v2361_v56  ;;  %v2498_v12 = vrot.slane %v2218_v63, 2  ;;  %v2390_v56 = vld [vmem:[#allocation8 + $0x1530] sm:$0xff]  ;;  %v2393_v57 = vld [vmem:[#allocation8 + $0x1548] sm:$0xff]  ;;  %v2395_v61 = vld [vmem:[#allocation8 + $0x1558] sm:$0xff]  ;;  %v4256_v63 = vpack.c.bf16 %v2388_v52, %v2384_v51 }
 0x2b4   : > { %v2399_v62 = vld [vmem:[#allocation8 + $0x1578] sm:$0xff] }
 0x2b5   : > { %4229 = vmatpush1.bf16.msra.mxu0 %v4228_v13  ;;  %v2499_v13 = vrot.slane %v5221_v25, 2  ;;  %v2423_v40 = vld [vmem:[#allocation8 + $0x1638] sm:$0xff]  ;;  %v2943_v25 = vld [vmem:[%s5546_s5 + $0x1a0] sm:$0xff] }
 0x2b6   : > { %4357 = vmatpush1.bf16.msra.mxu1 %v4356_v14  ;;  %4231 = vmatprep.subr.bf16.mxu0 %v4230_v15  ;;  %v2366_v14 = vld [vmem:[#allocation8 + $0x1470] sm:$0xff]  ;;  %v2369_v15 = vld [vmem:[#allocation8 + $0x1488] sm:$0xff]  ;;  %v2427_v51 = vld [vmem:[#allocation8 + $0x1658] sm:$0xff] }
 0x2b7   : > { %4359 = vmatprep.subr.bf16.mxu1 %v4358_v19  ;;  %v4244_v19 = vpack.c.bf16 %v2364_v9, %v2360_v7  ;;  %v4372_v58 = vpack.c.bf16 %v2366_v14, %v2362_v10  ;;  %v4246_v28 = vpack.c.bf16 %v2373_v16, %v2369_v15  ;;  %v2500_v24 = vsel %vm2488_vm4, %v2498_v12, %v2499_v13  ;;  %v2398_v9 = vld [vmem:[#allocation8 + $0x1570] sm:$0xff]  ;;  %v2401_v10 = vld [vmem:[#allocation8 + $0x1588] sm:$0xff]  ;;  %v2407_v12 = vld [vmem:[#allocation8 + $0x15b8] sm:$0xff] }
 0x2b8   : > { %v4386_v7 = vpack.c.bf16 %v2399_v62, %v2395_v61  ;;  %v2431_v52 = vld [vmem:[#allocation8 + $0x1678] sm:$0xff]  ;;  %v2426_v61 = vld [vmem:[#allocation8 + $0x1650] sm:$0xff] }
 0x2b9   : > { %4233 = vmatpush1.bf16.msra.mxu0 %v4232_v55  ;;  %v4374_v55 = vpack.c.bf16 %v2375_v18, %v2371_v17  ;;  %v2400_v17 = vld [vmem:[#allocation8 + $0x1580] sm:$0xff]  ;;  %v4402_v62 = vpack.c.bf16 %v2431_v52, %v2427_v51  ;;  %v2458_v51 = vld [vmem:[#allocation8 + $0x1750] sm:$0xff] }
 0x2ba   : > { %4361 = vmatpush1.bf16.msra.mxu1 %v4360_v26  ;;  %4235 = vmatprep.subr.bf16.mxu0 %v4234_v27  ;;  %v2374_v26 = vld [vmem:[#allocation8 + $0x14b0] sm:$0xff]  ;;  %v2377_v27 = vld [vmem:[#allocation8 + $0x14c8] sm:$0xff]  ;;  %v2404_v18 = vld [vmem:[#allocation8 + $0x15a0] sm:$0xff] }
 0x2bb   : > { %4363 = vmatprep.subr.bf16.mxu1 %v4362_v32  ;;  %v4248_v32 = vpack.c.bf16 %v2372_v22, %v2368_v21  ;;  %v4376_v33 = vpack.c.bf16 %v2374_v26, %v2370_v23  ;;  %v4250_v37 = vpack.c.bf16 %v2381_v29, %v2377_v27  ;;  %v2413_v21 = vld [vmem:[#allocation8 + $0x15e8] sm:$0xff]  ;;  %v2411_v22 = vld [vmem:[#allocation8 + $0x15d8] sm:$0xff]  ;;  %v2408_v27 = vld [vmem:[#allocation8 + $0x15c0] sm:$0xff] }
 0x2bc   : > { %v2415_v23 = vld [vmem:[#allocation8 + $0x15f8] sm:$0xff]  ;;  %v2412_v29 = vld [vmem:[#allocation8 + $0x15e0] sm:$0xff] }
 0x2bd   : > { %4237 = vmatpush1.bf16.msra.mxu0 %v4236_v60  ;;  %v2382_v60 = vld [vmem:[#allocation8 + $0x14f0] sm:$0xff]  ;;  %v4394_v31 = vpack.c.bf16 %v2415_v23, %v2411_v22 }
 0x2be   : > { %4365 = vmatpush1.bf16.msra.mxu1 %v4364_v6  ;;  %4239 = vmatprep.subr.bf16.mxu0 %v4238_v44  ;;  %v2389_v6 = vld [vmem:[#allocation8 + $0x1528] sm:$0xff]  ;;  %v2387_v44 = vld [vmem:[#allocation8 + $0x1518] sm:$0xff]  ;;  %v2442_v22 = vld [vmem:[#allocation8 + $0x16d0] sm:$0xff] }
 0x2bf   : > { %4367 = vmatprep.subr.bf16.mxu1 %v4366_v48  ;;  %v4380_v48 = vpack.c.bf16 %v2382_v60, %v2378_v41  ;;  %v4254_v50 = vpack.c.bf16 %v2389_v6, %v2385_v43  ;;  %v4382_v54 = vpack.c.bf16 %v2391_v45, %v2387_v44  ;;  %v4268_v41 = vpack.c.bf16 %v2412_v29, %v2408_v27  ;;  %v2416_v43 = vld [vmem:[#allocation8 + $0x1600] sm:$0xff]  ;;  %v2418_v44 = vld [vmem:[#allocation8 + $0x1610] sm:$0xff]  ;;  %v2451_v27 = vld [vmem:[#allocation8 + $0x1718] sm:$0xff] }
 0x2c0   : > { %2582 = vmatmul.mubr.f32.vlgmr.msra.gmra.mrb[4].mxu0 %v2491_v2  ;;  %v2420_v6 = vld [vmem:[#allocation8 + $0x1620] sm:$0xff]  ;;  %v4398_v45 = vpack.c.bf16 %v2423_v40, %v2419_v39  ;;  %v2455_v29 = vld [vmem:[#allocation8 + $0x1738] sm:$0xff]  ;;  %v2450_v39 = vld [vmem:[#allocation8 + $0x1710] sm:$0xff] }
 0x2c1   : > { %2736 = vmatmul.mubr.f32.vlgmr.msra.gmra.mrb[4].mxu1 %v2491_v2  ;;  %2587 = vmatprep.mubr.f32.mxu0 %v2504_v8  ;;  %v4258_v2 = vpack.c.bf16 %v2397_v59, %v2393_v57  ;;  %v2424_v57 = vld [vmem:[#allocation8 + $0x1640] sm:$0xff]  ;;  %v4414_v40 = vpack.c.bf16 %v2455_v29, %v2451_v27 }
 0x2c2   : > { %4241 = vmatpush1.bf16.msra.mxu0 %v4240_v1  ;;  %2741 = vmatprep.mubr.f32.mxu1 %v2504_v8  ;;  %v4384_v1 = vpack.c.bf16 %v2390_v56, %v2386_v53  ;;  %v2405_v8 = vld [vmem:[#allocation8 + $0x15a8] sm:$0xff]  ;;  %v4272_v53 = vpack.c.bf16 %v2420_v6, %v2416_v43  ;;  %v2428_v59 = vld [vmem:[#allocation8 + $0x1660] sm:$0xff]  ;;  %v2459_v43 = vld [vmem:[#allocation8 + $0x1758] sm:$0xff] }
 0x2c3   : > { %4369 = vmatpush1.bf16.msra.mxu1 %v4368_v3  ;;  %4243 = vmatprep.subr.bf16.mxu0 %v4242_v5  ;;  %v2392_v3 = vld [vmem:[#allocation8 + $0x1540] sm:$0xff]  ;;  %v2394_v5 = vld [vmem:[#allocation8 + $0x1550] sm:$0xff]  ;;  %v4262_v16 = vpack.c.bf16 %v2405_v8, %v2401_v10  ;;  %v2463_v6 = vld [vmem:[#allocation8 + $0x1778] sm:$0xff] }
 0x2c4   : > { %2588 = vmatmul.mubr.f32.gmra.mrb[6].mxu0 %v2502_v20  ;;  %4371 = vmatprep.subr.bf16.mxu1 %v4370_v11  ;;  %v2403_v11 = vld [vmem:[#allocation8 + $0x1598] sm:$0xff]  ;;  %v4260_v14 = vpack.c.bf16 %v2396_v4, %v2392_v3  ;;  %v4388_v15 = vpack.c.bf16 %v2398_v9, %v2394_v5  ;;  %v4276_v5 = vpack.c.bf16 %v2428_v59, %v2424_v57  ;;  %v2432_v10 = vld [vmem:[#allocation8 + $0x1680] sm:$0xff] }
 0x2c5   : > { %2742 = vmatmul.mubr.f32.gmra.mrb[6].mxu1 %v2502_v20  ;;  %2658 = vmatprep.mubr.f32.mxu0 %v2500_v24  ;;  %v4390_v20 = vpack.c.bf16 %v2407_v12, %v2403_v11  ;;  %v2435_v3 = vld [vmem:[#allocation8 + $0x1698] sm:$0xff]  ;;  %v2436_v8 = vld [vmem:[#allocation8 + $0x16a0] sm:$0xff]  ;;  %v2434_v11 = vld [vmem:[#allocation8 + $0x1690] sm:$0xff]  ;;  %v4418_v52 = vpack.c.bf16 %v2463_v6, %v2459_v43 }
 0x2c6   : > { %4245 = vmatpush1.bf16.msra.mxu0 %v4244_v19  ;;  %2812 = vmatprep.mubr.f32.mxu1 %v2500_v24  ;;  %v2402_v19 = vld [vmem:[#allocation8 + $0x1590] sm:$0xff]  ;;  %v4264_v24 = vpack.c.bf16 %v2404_v18, %v2400_v17  ;;  %v2439_v4 = vld [vmem:[#allocation8 + $0x16b8] sm:$0xff] }
 0x2c7   : > { %4373 = vmatpush1.bf16.msra.mxu1 %v4372_v58  ;;  %4247 = vmatprep.subr.bf16.mxu0 %v4246_v28  ;;  %v2406_v58 = vld [vmem:[#allocation8 + $0x15b0] sm:$0xff]  ;;  %v2409_v28 = vld [vmem:[#allocation8 + $0x15c8] sm:$0xff]  ;;  %v4406_v12 = vpack.c.bf16 %v2439_v4, %v2435_v3  ;;  %v2443_v17 = vld [vmem:[#allocation8 + $0x16d8] sm:$0xff] }
 0x2c8   : > { %4375 = vmatprep.subr.bf16.mxu1 %v4374_v55  ;;  %v4392_v55 = vpack.c.bf16 %v2406_v58, %v2402_v19  ;;  %v4266_v26 = vpack.c.bf16 %v2413_v21, %v2409_v28  ;;  %v2447_v18 = vld [vmem:[#allocation8 + $0x16f8] sm:$0xff]  ;;  %v4280_v19 = vpack.c.bf16 %v2436_v8, %v2432_v10  ;;  %v2440_v28 = vld [vmem:[#allocation8 + $0x16c0] sm:$0xff]  ;;  %v2466_v3 = vld [vmem:[#allocation8 + $0x1790] sm:$0xff] }
 0x2c9   : > { %v2444_v21 = vld [vmem:[#allocation8 + $0x16e0] sm:$0xff]  ;;  %v4410_v23 = vpack.c.bf16 %v2447_v18, %v2443_v17  ;;  %v2467_v57 = vld [vmem:[#allocation8 + $0x1798] sm:$0xff]  ;;  %v2474_v17 = vld [vmem:[#allocation8 + $0x17d0] sm:$0xff] }
 0x2ca   : > { %4249 = vmatpush1.bf16.msra.mxu0 %v4248_v32  ;;  %v2414_v32 = vld [vmem:[#allocation8 + $0x15f0] sm:$0xff]  ;;  %v2471_v59 = vld [vmem:[#allocation8 + $0x17b8] sm:$0xff] }
 0x2cb   : > { %4377 = vmatpush1.bf16.msra.mxu1 %v4376_v33  ;;  %4251 = vmatprep.subr.bf16.mxu0 %v4250_v37  ;;  %v2417_v33 = vld [vmem:[#allocation8 + $0x1608] sm:$0xff]  ;;  %v4422_v4 = vpack.c.bf16 %v2471_v59, %v2467_v57  ;;  %v2475_v10 = vld [vmem:[#allocation8 + $0x17d8] sm:$0xff] }
 0x2cc   : > { %4379 = vmatprep.subr.bf16.mxu1 %v4378_v42  ;;  %v2421_v37 = vld [vmem:[#allocation8 + $0x1628] sm:$0xff]  ;;  %v4396_v42 = vpack.c.bf16 %v2414_v32, %v2410_v30  ;;  %v4284_v30 = vpack.c.bf16 %v2444_v21, %v2440_v28  ;;  %v2479_v8 = vld [vmem:[#allocation8 + $0x17f8] sm:$0xff] }
 0x2cd   : > { %v4270_v60 = vpack.c.bf16 %v2421_v37, %v2417_v33  ;;  %v2448_v33 = vld [vmem:[#allocation8 + $0x1700] sm:$0xff]  ;;  %v4426_v18 = vpack.c.bf16 %v2479_v8, %v2475_v10  ;;  %v2217_v28 = vld [vmem:[#allocation2 + $0x10] sm:$0xfc]  ;;  %v2912_v57 = vld [vmem:[%s5546_s5 + $0xa8] sm:$0xff] }
 0x2ce   : > { %4253 = vmatpush1.bf16.msra.mxu0 %v4252_v47  ;;  %v2422_v47 = vld [vmem:[#allocation8 + $0x1630] sm:$0xff]  ;;  %v2452_v37 = vld [vmem:[#allocation8 + $0x1720] sm:$0xff]  ;;  %v2495_v29 = vrot.slane %v2217_v28, 2 }
 0x2cf   : > { %4381 = vmatpush1.bf16.msra.mxu1 %v4380_v48  ;;  %4255 = vmatprep.subr.bf16.mxu0 %v4254_v50  ;;  %v2425_v48 = vld [vmem:[#allocation8 + $0x1648] sm:$0xff] }
 0x2d0   : > { %4383 = vmatprep.subr.bf16.mxu1 %v4382_v54  ;;  %v2429_v50 = vld [vmem:[#allocation8 + $0x1668] sm:$0xff]  ;;  %v4400_v54 = vpack.c.bf16 %v2422_v47, %v2418_v44  ;;  %v4288_v44 = vpack.c.bf16 %v2452_v37, %v2448_v33  ;;  %v2892_v33 = vld [vmem:[%s5546_s5 + $0x8] sm:$0xff] }
 0x2d1   : > { %v4274_v56 = vpack.c.bf16 %v2429_v50, %v2425_v48  ;;  %v2456_v48 = vld [vmem:[#allocation8 + $0x1740] sm:$0xff]  ;;  %v2939_v21 = vld [vmem:[%s5546_s5 + $0x180] sm:$0xff] }
 0x2d2   : > { %4257 = vmatpush1.bf16.msra.mxu0 %v4256_v63  ;;  %v2430_v63 = vld [vmem:[#allocation8 + $0x1670] sm:$0xff]  ;;  %v2460_v50 = vld [vmem:[#allocation8 + $0x1760] sm:$0xff] }
 0x2d3   : > { %4385 = vmatpush1.bf16.msra.mxu1 %v4384_v1  ;;  %4259 = vmatprep.subr.bf16.mxu0 %v4258_v2  ;;  %v2433_v1 = vld [vmem:[#allocation8 + $0x1688] sm:$0xff] }
 0x2d4   : > { %4387 = vmatprep.subr.bf16.mxu1 %v4386_v7  ;;  %v2437_v2 = vld [vmem:[#allocation8 + $0x16a8] sm:$0xff]  ;;  %v4404_v7 = vpack.c.bf16 %v2430_v63, %v2426_v61  ;;  %v4292_v61 = vpack.c.bf16 %v2460_v50, %v2456_v48  ;;  %v2893_v48 = vld [vmem:[%s5546_s5 + $0x10] sm:$0xff] }
 0x2d5   : > { %v4278_v9 = vpack.c.bf16 %v2437_v2, %v2433_v1  ;;  %v2464_v1 = vld [vmem:[#allocation8 + $0x1780] sm:$0xff]  ;;  %v2923_v37 = vld [vmem:[%s5546_s5 + $0x100] sm:$0xff] }
 0x2d6   : > { %4261 = vmatpush1.bf16.msra.mxu0 %v4260_v14  ;;  %v2438_v14 = vld [vmem:[#allocation8 + $0x16b0] sm:$0xff]  ;;  %v2468_v2 = vld [vmem:[#allocation8 + $0x17a0] sm:$0xff] }
 0x2d7   : > { %4389 = vmatpush1.bf16.msra.mxu1 %v4388_v15  ;;  %4263 = vmatprep.subr.bf16.mxu0 %v4262_v16  ;;  %v2441_v15 = vld [vmem:[#allocation8 + $0x16c8] sm:$0xff] }
 0x2d8   : > { %4391 = vmatprep.subr.bf16.mxu1 %v4390_v20  ;;  %v2445_v16 = vld [vmem:[#allocation8 + $0x16e8] sm:$0xff]  ;;  %v4408_v20 = vpack.c.bf16 %v2438_v14, %v2434_v11  ;;  %v4296_v11 = vpack.c.bf16 %v2468_v2, %v2464_v1 }
 0x2d9   : > { %v4282_v58 = vpack.c.bf16 %v2445_v16, %v2441_v15  ;;  %v2472_v15 = vld [vmem:[#allocation8 + $0x17c0] sm:$0xff]  ;;  %v2895_v2 = vld [vmem:[%s5546_s5 + $0x20] sm:$0xff] }
 0x2da   : > { %4265 = vmatpush1.bf16.msra.mxu0 %v4264_v24  ;;  %v2446_v24 = vld [vmem:[#allocation8 + $0x16f0] sm:$0xff]  ;;  %v2476_v16 = vld [vmem:[#allocation8 + $0x17e0] sm:$0xff] }
 0x2db   : > { %4393 = vmatpush1.bf16.msra.mxu1 %v4392_v55  ;;  %4267 = vmatprep.subr.bf16.mxu0 %v4266_v26  ;;  %v2449_v55 = vld [vmem:[#allocation8 + $0x1708] sm:$0xff] }
 0x2dc   : > { %4395 = vmatprep.subr.bf16.mxu1 %v4394_v31  ;;  %v2453_v26 = vld [vmem:[#allocation8 + $0x1728] sm:$0xff]  ;;  %v4412_v31 = vpack.c.bf16 %v2446_v24, %v2442_v22  ;;  %v2940_v22 = vld [vmem:[%s5546_s5 + $0x188] sm:$0xff] }
 0x2dd   : > { %v4286_v32 = vpack.c.bf16 %v2453_v26, %v2449_v55  ;;  %v2222_v24 = vld [vmem:[#allocation2 + $0x58] sm:$0x3]  ;;  %v2221_v26 = vld [vmem:[#allocation2 + $0x50] sm:$0x3]  ;;  %v2894_v50 = vld [vmem:[%s5546_s5 + $0x18] sm:$0xff] }
 0x2de   : > { %4269 = vmatpush1.bf16.msra.mxu0 %v4268_v41  ;;  %v2454_v41 = vld [vmem:[#allocation8 + $0x1730] sm:$0xff]  ;;  %v4436_v59 = vpack.c.bf16 %v2894_v50, %v2893_v48  ;;  %v2914_v10 = vld [vmem:[%s5546_s5 + $0xb8] sm:$0xff] }
 0x2df   : > { %4397 = vmatpush1.bf16.msra.mxu1 %v4396_v42  ;;  %4271 = vmatprep.subr.bf16.mxu0 %v4270_v60  ;;  %v2457_v42 = vld [vmem:[#allocation8 + $0x1748] sm:$0xff]  ;;  %v2920_v48 = vld [vmem:[%s5546_s5 + $0xe8] sm:$0xff] }
 0x2e0   : > { %4399 = vmatprep.subr.bf16.mxu1 %v4398_v45  ;;  %v2461_v60 = vld [vmem:[#allocation8 + $0x1768] sm:$0xff]  ;;  %v4416_v45 = vpack.c.bf16 %v2454_v41, %v2450_v39  ;;  %v2507_v39 = vrot.slane %v2222_v24, 2  ;;  %v2948_v24 = vld [vmem:[%s5546_s5 + $0x1c8] sm:$0xff] }
 0x2e1   : > { %v4290_v47 = vpack.c.bf16 %v2461_v60, %v2457_v42  ;;  %v2910_v41 = vld [vmem:[%s5546_s5 + $0x98] sm:$0xff]  ;;  %v2941_v42 = vld [vmem:[%s5546_s5 + $0x190] sm:$0xff]  ;;  %v2915_v28 = vld [vmem:[%s5546_s5 + $0xc0] sm:$0xff] }
 0x2e2   : > { %4273 = vmatpush1.bf16.msra.mxu0 %v4272_v53  ;;  %v2462_v53 = vld [vmem:[#allocation8 + $0x1770] sm:$0xff]  ;;  %v2942_v60 = vld [vmem:[%s5546_s5 + $0x198] sm:$0xff] }
 0x2e3   : > { %4401 = vmatpush1.bf16.msra.mxu1 %v4400_v54  ;;  %4275 = vmatprep.subr.bf16.mxu0 %v4274_v56  ;;  %v2465_v54 = vld [vmem:[#allocation8 + $0x1788] sm:$0xff] }
 0x2e4   : > { %4403 = vmatprep.subr.bf16.mxu1 %v4402_v62  ;;  %v2469_v56 = vld [vmem:[#allocation8 + $0x17a8] sm:$0xff]  ;;  %v4420_v62 = vpack.c.bf16 %v2462_v53, %v2458_v51  ;;  %v2925_v51 = vld [vmem:[%s5546_s5 + $0x110] sm:$0xff]  ;;  %v4466_v53 = vpack.c.bf16 %v2942_v60, %v2941_v42 }
 0x2e5   : > { %v4294_v63 = vpack.c.bf16 %v2469_v56, %v2465_v54  ;;  %v2926_v54 = vld [vmem:[%s5546_s5 + $0x118] sm:$0xff]  ;;  %v2911_v56 = vld [vmem:[%s5546_s5 + $0xa0] sm:$0xff] }
 0x2e6   : > { %4277 = vmatpush1.bf16.msra.mxu0 %v4276_v5  ;;  %v2470_v5 = vld [vmem:[#allocation8 + $0x17b0] sm:$0xff]  ;;  %v2902_v42 = vld [vmem:[%s5546_s5 + $0x58] sm:$0xff] }
 0x2e7   : > { %4405 = vmatpush1.bf16.msra.mxu1 %v4404_v7  ;;  %4279 = vmatprep.subr.bf16.mxu0 %v4278_v9  ;;  %v2473_v7 = vld [vmem:[#allocation8 + $0x17c8] sm:$0xff] }
 0x2e8   : > { %4407 = vmatprep.subr.bf16.mxu1 %v4406_v12  ;;  %v2477_v9 = vld [vmem:[#allocation8 + $0x17e8] sm:$0xff]  ;;  %v4424_v12 = vpack.c.bf16 %v2470_v5, %v2466_v3  ;;  %v2896_v3 = vld [vmem:[%s5546_s5 + $0x28] sm:$0xff] }
 0x2e9   : > { %v4298_v14 = vpack.c.bf16 %v2477_v9, %v2473_v7  ;;  %v4440_v5 = vpack.c.bf16 %v2896_v3, %v2895_v2  ;;  %v2928_v7 = vld [vmem:[%s5546_s5 + $0x128] sm:$0xff]  ;;  %v2913_v9 = vld [vmem:[%s5546_s5 + $0xb0] sm:$0xff]  ;;  %v2951_v50 = vld [vmem:[%s5546_s5 + $0x1e0] sm:$0xff] }
 0x2ea   : > { %4281 = vmatpush1.bf16.msra.mxu0 %v4280_v19  ;;  %v2478_v19 = vld [vmem:[#allocation8 + $0x17f0] sm:$0xff]  ;;  %v2954_v2 = vld [vmem:[%s5546_s5 + $0x1f8] sm:$0xff]  ;;  %v2905_v3 = vld [vmem:[%s5546_s5 + $0x70] sm:$0xff] }
 0x2eb   : > { %4409 = vmatpush1.bf16.msra.mxu1 %v4408_v20  ;;  %4283 = vmatprep.subr.bf16.mxu0 %v4282_v58  ;;  %v2907_v20 = vld [vmem:[%s5546_s5 + $0x80] sm:$0xff]  ;;  %v2908_v58 = vld [vmem:[%s5546_s5 + $0x88] sm:$0xff]  ;;  %v4428_v55 = vpack.c.bf16 %v2478_v19, %v2474_v17  ;;  %v2898_v17 = vld [vmem:[%s5546_s5 + $0x38] sm:$0xff] }
 0x2ec   : > { %4411 = vmatprep.subr.bf16.mxu1 %v4410_v23  ;;  %v4300_v23 = vpack.c.bf16 %v2476_v16, %v2472_v15  ;;  %v4430_v27 = vpack.c.bf16 %v2908_v58, %v2907_v20  ;;  %v2897_v16 = vld [vmem:[%s5546_s5 + $0x30] sm:$0xff]  ;;  %v2930_v20 = vld [vmem:[%s5546_s5 + $0x138] sm:$0xff] }
 0x2ed   : > { %v4444_v19 = vpack.c.bf16 %v2898_v17, %v2897_v16 }
 0x2ee   : > { %4285 = vmatpush1.bf16.msra.mxu0 %v4284_v30  ;;  %v2496_v30 = vrot.slane %v5226_v34, 2  ;;  %v2909_v34 = vld [vmem:[%s5546_s5 + $0x90] sm:$0xff] }
 0x2ef   : > { %4413 = vmatpush1.bf16.msra.mxu1 %v4412_v31  ;;  %4287 = vmatprep.subr.bf16.mxu0 %v4286_v32  ;;  %v4462_v31 = vpack.c.bf16 %v2940_v22, %v2939_v21  ;;  %v2891_v32 = vld [vmem:[%s5546_s5] sm:$0xff]  ;;  %v2916_v21 = vld [vmem:[%s5546_s5 + $0xc8] sm:$0xff] }
 0x2f0   : > { %4415 = vmatprep.subr.bf16.mxu1 %v4414_v40  ;;  %v2924_v40 = vld [vmem:[%s5546_s5 + $0x108] sm:$0xff]  ;;  %v4432_v43 = vpack.c.bf16 %v2892_v33, %v2891_v32  ;;  %v2497_v6 = vsel %vm2488_vm4, %v2495_v29, %v2496_v30  ;;  %v2947_v22 = vld [vmem:[%s5546_s5 + $0x1c0] sm:$0xff]  ;;  %v2917_v33 = vld [vmem:[%s5546_s5 + $0xd0] sm:$0xff] }
 0x2f2   : > { %4289 = vmatpush1.bf16.msra.mxu0 %v4288_v44  ;;  %v2505_v44 = vrot.slane %v2221_v26, 2  ;;  %v2900_v26 = vld [vmem:[%s5546_s5 + $0x48] sm:$0xff] }
 0x2f3   : > { %4417 = vmatpush1.bf16.msra.mxu1 %v4416_v45  ;;  %4291 = vmatprep.subr.bf16.mxu0 %v4290_v47  ;;  %v4464_v45 = vpack.c.bf16 %v2924_v40, %v2923_v37  ;;  %v4434_v47 = vpack.c.bf16 %v2910_v41, %v2909_v34  ;;  %v2918_v37 = vld [vmem:[%s5546_s5 + $0xd8] sm:$0xff]  ;;  %v2901_v41 = vld [vmem:[%s5546_s5 + $0x50] sm:$0xff] }
 0x2f4   : > { %4419 = vmatprep.subr.bf16.mxu1 %v4418_v52  ;;  %v2508_v52 = vsel %vm2488_vm4, %v2499_v13, %v2507_v39  ;;  %v2944_v13 = vld [vmem:[%s5546_s5 + $0x1a8] sm:$0xff]  ;;  %v2949_v39 = vld [vmem:[%s5546_s5 + $0x1d0] sm:$0xff]  ;;  %v4450_v40 = vpack.c.bf16 %v2918_v37, %v2917_v33  ;;  %v2950_v34 = vld [vmem:[%s5546_s5 + $0x1d8] sm:$0xff] }
 0x2f5   : > { %v4470_v1 = vpack.c.bf16 %v2944_v13, %v2943_v25  ;;  %v4482_v60 = vpack.c.bf16 %v2950_v34, %v2949_v39  ;;  %v2935_v25 = vld [vmem:[%s5546_s5 + $0x160] sm:$0xff]  ;;  %v2936_v13 = vld [vmem:[%s5546_s5 + $0x168] sm:$0xff] }
 0x2f6   : > { %4293 = vmatpush1.bf16.msra.mxu0 %v4292_v61  ;;  %v2506_v61 = vsel %vm2488_vm4, %v2496_v30, %v2505_v44  ;;  %v2931_v30 = vld [vmem:[%s5546_s5 + $0x140] sm:$0xff]  ;;  %v2934_v44 = vld [vmem:[%s5546_s5 + $0x158] sm:$0xff] }
 0x2f7   : > { %4421 = vmatpush1.bf16.msra.mxu1 %v4420_v62  ;;  %4295 = vmatprep.subr.bf16.mxu0 %v4294_v63  ;;  %v4468_v62 = vpack.c.bf16 %v2926_v54, %v2925_v51  ;;  %v4438_v63 = vpack.c.bf16 %v2912_v57, %v2911_v56  ;;  %v2904_v54 = vld [vmem:[%s5546_s5 + $0x68] sm:$0xff] }
 0x2f8   : > { %4423 = vmatprep.subr.bf16.mxu1 %v4422_v4  ;;  %v2927_v4 = vld [vmem:[%s5546_s5 + $0x120] sm:$0xff] }
 0x2f9   : > { %v4472_v8 = vpack.c.bf16 %v2928_v7, %v2927_v4  ;;  %v2906_v4 = vld [vmem:[%s5546_s5 + $0x78] sm:$0xff] }
 0x2fa   : > { %4297 = vmatpush1.bf16.msra.mxu0 %v4296_v11  ;;  %v4442_v11 = vpack.c.bf16 %v2914_v10, %v2913_v9  ;;  %v4460_v7 = vpack.c.bf16 %v2906_v4, %v2905_v3  ;;  %v2937_v9 = vld [vmem:[%s5546_s5 + $0x170] sm:$0xff]  ;;  %v2938_v10 = vld [vmem:[%s5546_s5 + $0x178] sm:$0xff] }
 0x2fb   : > { %4425 = vmatpush1.bf16.msra.mxu1 %v4424_v12  ;;  %4299 = vmatprep.subr.bf16.mxu0 %v4298_v14  ;;  %v2945_v12 = vld [vmem:[%s5546_s5 + $0x1b0] sm:$0xff]  ;;  %v2946_v14 = vld [vmem:[%s5546_s5 + $0x1b8] sm:$0xff] }
 0x2fc   : > { %4427 = vmatprep.subr.bf16.mxu1 %v4426_v18  ;;  %v4474_v15 = vpack.c.bf16 %v2946_v14, %v2945_v12  ;;  %v2929_v18 = vld [vmem:[%s5546_s5 + $0x130] sm:$0xff] }
 0x2fd   : > { %v4476_v58 = vpack.c.bf16 %v2930_v20, %v2929_v18 }
 0x2fe   : > { %4301 = vmatpush1.bf16.msra.mxu0 %v4300_v23  ;;  %v4446_v23 = vpack.c.bf16 %v2916_v21, %v2915_v28 }
 0x2ff   : > { %4429 = vmatpush1.bf16.msra.mxu1 %v4428_v55  ;;  %4431 = vmatprep.subr.bf16.mxu0 %v4430_v27  ;;  %v2899_v55 = vld [vmem:[%s5546_s5 + $0x40] sm:$0xff]  ;;  %v4478_v27 = vpack.c.bf16 %v2948_v24, %v2947_v22 }
 0x300   : > { %4463 = vmatprep.subr.bf16.mxu1 %v4462_v31  ;;  %v4448_v29 = vpack.c.bf16 %v2900_v26, %v2899_v55  ;;  %v2932_v31 = vld [vmem:[%s5546_s5 + $0x148] sm:$0xff] }
 0x301   : > { %2659 = vmatmul.mubr.f32.vlgmr.msra.gmra.mrb[4].mxu0 %v2497_v6  ;;  %v4480_v32 = vpack.c.bf16 %v2932_v31, %v2931_v30 }
 0x302   : > { %2813 = vmatmul.mubr.f32.vlgmr.msra.gmra.mrb[4].mxu1 %v2497_v6  ;;  %2664 = vmatprep.mubr.f32.mxu0 %v2508_v52  ;;  %v2933_v6 = vld [vmem:[%s5546_s5 + $0x150] sm:$0xff] }
 0x303   : > { %2818 = vmatprep.mubr.f32.mxu1 %v2508_v52  ;;  %4433 = vmatpush3.bf16.msra.mxu0 %v4432_v43  ;;  %v4452_v43 = vpack.c.bf16 %v2902_v42, %v2901_v41  ;;  %v2952_v52 = vld [vmem:[%s5546_s5 + $0x1e8] sm:$0xff] }
 0x304   : > { %4465 = vmatpush3.bf16.msra.mxu1 %v4464_v45  ;;  %4435 = vmatprep.subr.bf16.mxu0 %v4434_v47  ;;  %v4484_v45 = vpack.c.bf16 %v2934_v44, %v2933_v6  ;;  %v2919_v47 = vld [vmem:[%s5546_s5 + $0xe0] sm:$0xff]  ;;  %v4486_v56 = vpack.c.bf16 %v2952_v52, %v2951_v50 }
 0x305   : > { %2665 = vmatmul.mubr.f32.gmra.mrb[6].mxu0 %v2506_v61  ;;  %4467 = vmatprep.subr.bf16.mxu1 %v4466_v53  ;;  %v4454_v51 = vpack.c.bf16 %v2920_v48, %v2919_v47  ;;  %v2903_v53 = vld [vmem:[%s5546_s5 + $0x60] sm:$0xff] }
 0x306   : > { %2819 = vmatmul.mubr.f32.gmra.mrb[6].mxu1 %v2506_v61  ;;  %v4456_v57 = vpack.c.bf16 %v2904_v54, %v2903_v53  ;;  %v2921_v61 = vld [vmem:[%s5546_s5 + $0xf0] sm:$0xff] }
 0x307   : > { %4437 = vmatpush3.bf16.msra.mxu0 %v4436_v59  ;;  %v4488_v59 = vpack.c.bf16 %v2936_v13, %v2935_v25 }
 0x308   : > { %4469 = vmatpush3.bf16.msra.mxu1 %v4468_v62  ;;  %4439 = vmatprep.subr.bf16.mxu0 %v4438_v63  ;;  %v2922_v62 = vld [vmem:[%s5546_s5 + $0xf8] sm:$0xff]  ;;  %v2953_v63 = vld [vmem:[%s5546_s5 + $0x1f0] sm:$0xff] }
 0x309   : > { %4471 = vmatprep.subr.bf16.mxu1 %v4470_v1  ;;  %v4458_v1 = vpack.c.bf16 %v2922_v62, %v2921_v61  ;;  %v4892_v61 = vmov 1983009808  }
 0x30a   : > { %v3100_v62 = vunpack.c.l.s4 %v4892_v61 }
 0x30b   : > { %4441 = vmatpush3.bf16.msra.mxu0 %v4440_v5  ;;  %v4490_v5 = vpack.c.bf16 %v2954_v2, %v2953_v63 }
 0x30c   : > { %4473 = vmatpush3.bf16.msra.mxu1 %v4472_v8  ;;  %4443 = vmatprep.subr.bf16.mxu0 %v4442_v11  ;;  %v4492_v8 = vpack.c.bf16 %v2938_v10, %v2937_v9  ;;  %v2833_v11 = vld [vmem:[#allocation9] sm:$0xf]  ;;  %v3101_v63 = vunpack.c.0.s8 %v3100_v62 }
 0x30d   : > { %4475 = vmatprep.subr.bf16.mxu1 %v4474_v15  ;;  %v2838_v14 = vrot.slane %v2833_v11, %v5169_v36  ;;  %v2846_v17 = vrot.slane %v2833_v11, %v949_v46  ;;  %v2842_v18 = vrot.slane %v2833_v11, %v945_v38  ;;  %v2850_v20 = vrot.slane %v2833_v11, %v953_v49 }
 0x30e   : > { %v3104_v2 = vsub.s32 %v3101_v63, %v5166_v35 }
 0x30f   : > { %4445 = vmatpush3.bf16.msra.mxu0 %v4444_v19 }
 0x310   : > { %4477 = vmatpush3.bf16.msra.mxu1 %v4476_v58  ;;  %4447 = vmatprep.subr.bf16.mxu0 %v4446_v23 }
 0x311   : > { %4479 = vmatprep.subr.bf16.mxu1 %v4478_v27 }
 0x313   : > { %4449 = vmatpush3.bf16.msra.mxu0 %v4448_v29 }
 0x314   : > { %4481 = vmatpush3.bf16.msra.mxu1 %v4480_v32  ;;  %4451 = vmatprep.subr.bf16.mxu0 %v4450_v40 }
 0x315   : > { %4483 = vmatprep.subr.bf16.mxu1 %v4482_v60 }
 0x317   : > { %4453 = vmatpush3.bf16.msra.mxu0 %v4452_v43 }
 0x318   : > { %4485 = vmatpush3.bf16.msra.mxu1 %v4484_v45  ;;  %4455 = vmatprep.subr.bf16.mxu0 %v4454_v51 }
 0x319   : > { %4487 = vmatprep.subr.bf16.mxu1 %v4486_v56 }
 0x31b   : > { %4457 = vmatpush3.bf16.msra.mxu0 %v4456_v57 }
 0x31c   : > { %4489 = vmatpush3.bf16.msra.mxu1 %v4488_v59  ;;  %4459 = vmatprep.subr.bf16.mxu0 %v4458_v1  ;;  %v3096_v1 = vld [vmem:[#allocation11] sm:$0xff] }
 0x31d   : > { %4491 = vmatprep.subr.bf16.mxu1 %v4490_v5  ;;  %v3098_v3 = vcombine.high %v3096_v1, %v3096_v1  ;;  %v3105_v4 = vrot.slane %v3096_v1, %v3104_v2 }
 0x31f   : > { %4461 = vmatpush3.bf16.msra.mxu0 %v4460_v7  ;;  %v3112_v5 = vrot.slane %v3098_v3, %v3104_v2  ;;  %v3113_v7 = vcombine.high %v3105_v4, %v3105_v4 }
 0x320   : > { %4493 = vmatpush3.bf16.msra.mxu1 %v4492_v8 }
 0x321   : > { %v3114_v9 = vcombine.high %v3112_v5, %v3112_v5  ;;  %3480 = vmatprep.subr.msk.mxu0 %vm3119_vm5, %v3113_v7 }
 0x323   : > { %3483 = vmatprep.subr.msk.mxu1 %vm3119_vm5, %v3114_v9 }
 0x3d4   : > { %v2660_v12 = vpop.f32.mrb[4].mxu0 }
 0x3d5   : > { %v2814_v15 = vpop.f32.mrb[4].mxu1  ;;  %v2662_v16 = vpop.f32.mrb[5].mxu0  ;;  %v5448_v28 = vadd.f32 %v2838_v14, %v2660_v12 }
 0x3d6   : > { %v2816_v19 = vpop.f32.mrb[5].mxu1  ;;  %v5452_v24 = vadd.f32 %v2846_v17, %v2814_v15  ;;  %v5454_v55 = vadd.f32 %v2842_v18, %v2662_v16 }
 0x3d7   : > { %v5460_v27 = vadd.f32 %v2850_v20, %v2816_v19 }
 0x3d8   : > { %v2666_v58 = vpop.f32.mrb[6].mxu0 }
 0x3d9   : > { %v5450_v21 = vadd.f32 %v2838_v14, %v2666_v58  ;;  %v2820_v22 = vpop.f32.mrb[6].mxu1  ;;  %v2668_v23 = vpop.f32.mrb[7].mxu0 }
 0x3da   : > { %v5456_v26 = vadd.f32 %v2846_v17, %v2820_v22  ;;  %v5458_v46 = vadd.f32 %v2842_v18, %v2668_v23  ;;  %v2822_v38 = vpop.f32.mrb[7].mxu1 }
 0x3db   : > { %v2863_v49 = vadd.f32 %v5450_v21, %v5448_v28  ;;  %v5464_v29 = vadd.f32 %v2850_v20, %v2822_v38 }
 0x3dc   : > { %v2877_v30 = vadd.f32 %v5456_v26, %v5452_v24  ;;  %v2870_v31 = vadd.f32 %v5458_v46, %v5454_v55 }
 0x3dd   : > { %v2864_v32 = vrot.slane %v2863_v49, 4  ;;  %v2884_v33 = vadd.f32 %v5464_v29, %v5460_v27 }
 0x3de   : > { %v2878_v37 = vrot.slane %v2877_v30, 4  ;;  %v2871_v39 = vrot.slane %v2870_v31, 4 }
 0x3df   : > { %v2865_v40 = vadd.f32 %v2864_v32, %v2863_v49  ;;  %v2885_v34 = vrot.slane %v2884_v33, 4 }
 0x3e0   : > { %v2879_v41 = vadd.f32 %v2878_v37, %v2877_v30  ;;  %v2872_v42 = vadd.f32 %v2871_v39, %v2870_v31 }
 0x3e1   : > { %v2866_v60 = vrot.slane %v2865_v40, 2  ;;  %v2886_v43 = vadd.f32 %v2885_v34, %v2884_v33 }
 0x3e2   : > { %v2880_v6 = vrot.slane %v2879_v41, 2  ;;  %v2873_v44 = vrot.slane %v2872_v42, 2 }
 0x3e3   : > { %v2867_v45 = vadd.f32 %v2866_v60, %v2865_v40  ;;  %v2887_v47 = vrot.slane %v2886_v43, 2 }
 0x3e4   : > { %v2881_v48 = vadd.f32 %v2880_v6, %v2879_v41  ;;  %v2874_v50 = vadd.f32 %v2873_v44, %v2872_v42 }
 0x3e5   : > { %v2868_v51 = vrot.slane %v2867_v45, 1  ;;  %v2888_v52 = vadd.f32 %v2887_v47, %v2886_v43 }
 0x3e6   : > { %v2882_v53 = vrot.slane %v2881_v48, 1  ;;  %v2875_v54 = vrot.slane %v2874_v50, 1 }
 0x3e7   : > { %v2889_v56 = vrot.slane %v2888_v52, 1  ;;  %v2869_v25 = vadd.f32 %v2868_v51, %v2867_v45 }
 0x3e8   : > { %v2876_v57 = vadd.f32 %v2875_v54, %v2874_v50  ;;  %v2883_v59 = vadd.f32 %v2882_v53, %v2881_v48 }
 0x3e9   : > { %v2890_v13 = vadd.f32 %v2889_v56, %v2888_v52 }
 0x3ea   : > { %3019 = vmatprep.mubr.f32.mxu0 %v2876_v57 }
 0x3eb   : > { %3089 = vmatprep.mubr.f32.mxu1 %v2890_v13  ;;  %3020 = vmatmul.mubr.f32.vlgmr.msra.gmra.mrb[8].mxu0 %v2869_v25 }
 0x3ec   : > { %3090 = vmatmul.mubr.f32.vlgmr.msra.gmra.mrb[8].mxu1 %v2883_v59  ;;  %3192 = vmatprep.mubr.f32.mxu0 %v4891_v0 }
 0x3ed   : > { %3263 = vmatprep.mubr.f32.mxu1 %v4891_v0  ;;  %3481 = vmatpush1.msk.msra.mxu0 %vm3119_vm5, %v3105_v4 }
 0x3ee   : > { %3484 = vmatpush1.msk.msra.mxu1 %vm3119_vm5, %v3112_v5 }
 0x4be   : > { %v3528_v10 = vpop.f32.mrb[8].mxu0 }
 0x4bf   : > { %v3563_v8 = vpop.f32.mrb[8].mxu1  ;;  %v3529_v11 = vpop.f32.mrb[9].mxu0 }
 0x4c0   : > { %v3530_v0 = vadd.f32 %v3529_v11, %v3528_v10  ;;  %v3564_v12 = vpop.f32.mrb[9].mxu1 }
 0x4c1   : > { %v3565_v14 = vadd.f32 %v3564_v12, %v3563_v8 }
 0x4c3   : > { %v3092_v15 = vadd.f32 %v3565_v14, %v3530_v0 }
 0x4c5   : > { %v3095_v16 = vmax.f32 %v3092_v15, 0.0 }
 0x4c7   : > { %3482 = vmatmul.mubr.msk.f32.vlgmr.msra.gmra.mrb[10].mxu0 %vm3115_vm6, %v3095_v16  ;;  %3485 = vmatmul.mubr.msk.f32.vlgmr.msra.gmra.mrb[10].mxu1 %vm3115_vm6, %v3095_v16 }
 0x59a   : > { %v3194_v35 = vpop.f32.mrb[10].mxu0  ;;  %v3265_v17 = vpop.f32.mrb[10].mxu1 }
 0x59b   : > { %v3486_v18 = vmul.f32 -1.442695, %v3194_v35  ;;  %v3488_v19 = vmul.f32 -1.442695, %v3265_v17  ;;  %v3196_v20 = vpop.f32.mrb[11].mxu0  ;;  %v3267_v58 = vpop.f32.mrb[11].mxu1 }
 0x59c   : > { %v3487_v22 = vmul.f32 -1.442695, %v3196_v20  ;;  %v3489_v23 = vmul.f32 -1.442695, %v3267_v58 }
 0x59d   : > { %4648 = vpow2.f32 %v3486_v18 }
 0x59e   : > { %4650 = vpow2.f32 %v3488_v19 }
 0x59f   : > { %4652 = vpow2.f32 %v3487_v22 }
 0x5a0   : > { %4654 = vpow2.f32 %v3489_v23 }
 0x5a7   : > { %v4649_v38 = vpop.eup %4648 }
 0x5a8   : > { %v4651_v49 = vpop.eup %4650  ;;  %v3282_v30 = vadd.f32 1.0, %v4649_v38 }
 0x5a9   : > { %v4653_v31 = vpop.eup %4652  ;;  %v3284_v32 = vadd.f32 1.0, %v4651_v49 }
 0x5aa   : > { %v4655_v33 = vpop.eup %4654  ;;  %4656 = vrcp.f32 %v3282_v30  ;;  %v3283_v37 = vadd.f32 1.0, %v4653_v31 }
 0x5ab   : > { %4658 = vrcp.f32 %v3284_v32  ;;  %v3285_v39 = vadd.f32 1.0, %v4655_v33 }
 0x5ac   : > { %4660 = vrcp.f32 %v3283_v37 }
 0x5ad   : > { %4662 = vrcp.f32 %v3285_v39 }
 0x5b4   : > { %v4657_v40 = vpop.eup %4656 }
 0x5b5   : > { %v4659_v34 = vpop.eup %4658  ;;  %v3297_v41 = vrot.slane %v4657_v40, %v5169_v36 }
 0x5b6   : > { %v4661_v42 = vpop.eup %4660  ;;  %v3305_v60 = vrot.slane %v4659_v34, %v5169_v36 }
 0x5b7   : > { %v4663_v43 = vpop.eup %4662  ;;  %v3310_v6 = vmul.f32 %v3297_v41, %v5448_v28  ;;  %v3314_v44 = vmul.f32 %v3297_v41, %v5450_v21  ;;  %v3301_v45 = vrot.slane %v4661_v42, %v5169_v36 }
 0x5b8   : > { %v3312_v47 = vmul.f32 %v3305_v60, %v5452_v24  ;;  %v3316_v48 = vmul.f32 %v3305_v60, %v5456_v26  ;;  %v3309_v50 = vrot.slane %v4663_v43, %v5169_v36 }
 0x5b9   : > { %3318 = vst [vmem:[%s338_s29] sm:$0xff] %v3310_v6  ;;  %3322 = vst [vmem:[%s338_s29 + $0x20] sm:$0xff] %v3314_v44  ;;  %v3311_v51 = vmul.f32 %v3301_v45, %v5454_v55  ;;  %v3315_v52 = vmul.f32 %v3301_v45, %v5458_v46 }
 0x5ba   : > { %3320 = vst [vmem:[%s338_s29 + $0x10] sm:$0xff] %v3312_v47  ;;  %3324 = vst [vmem:[%s338_s29 + $0x30] sm:$0xff] %v3316_v48  ;;  %v3313_v36 = vmul.f32 %v3309_v50, %v5460_v27  ;;  %v3317_v28 = vmul.f32 %v3309_v50, %v5464_v29 }
 0x5bb   : > { %3319 = vst [vmem:[%s338_s29 + $0x8] sm:$0xff] %v3311_v51  ;;  %3323 = vst [vmem:[%s338_s29 + $0x28] sm:$0xff] %v3315_v52 }
 0x5bc   : > { %3321 = vst [vmem:[%s338_s29 + $0x18] sm:$0xff] %v3313_v36  ;;  %3325 = vst [vmem:[%s338_s29 + $0x38] sm:$0xff] %v3317_v28 }
 0x5bd   : > { %4821 = shalt.err (!%p4818_p1)
}
 0x5be   : > { %s4822_s22 = scalar_lea.hbm %s5492_s20, 1024  ;;  %s4826_s16 = scalar_lea.hbm %s5548_s7, 2048 }
 0x5bf   : > { %p4823_p0 = scmp.ne.s32.totalorder %s5492_s20, %s4822_s22  ;;  %p4827_p9 = scmp.lt.u32.totalorder %s5492_s20, %s5548_s7 }
 0x5c0   : > { %p4828_p12 = scmp.lt.u32.totalorder %s4826_s16, %s4822_s22  ;;  %p4830_p2 = scmp.lt.u32.totalorder %s4822_s22, %s5492_s20 }
 0x5c1   : > { %p4824_p6 = pnand %p4823_p0, %p5574_p3 }
 0x5c2   : > { %p4829_p10 = por %p4828_p12, %p4827_p9 }
 0x5c3   : > { %p4825_p5 = pneg %p4824_p6 }
 0x5c4   : > { %p4831_p4 = por %p4830_p2, %p4829_p10 }
 0x5c6   : > { %p4832_p7 = pnand %p4831_p4, %p4825_p5 }
 0x5c8   : > { %4835 = shalt.err (!%p4832_p7)
}
 0x5c9   : > { %s4894_s10 = smov 512   ;;  %s4895_s13 = smov 32  }
 0x5ca   : > { %4571 = dma.vmem_to_hbm [thread:$0]  (%p5574_p3), %s5494_s14, 1024, %s5492_s20, %s5500_s2, %s4894_s10, %s4894_s10, %s4895_s13  }
 0x5cb PF: > { %p4603_p8 = scmp.ge.s32.totalorder %s4882_s27, 2  ;;  %s3355_s18 = sand.u32 1, %s4870_s24  }
 0x5cc   : > { %p5575_p11 = scmp.ne.s32.totalorder %s5561_s12, 0  ;;  %s3356_s9 = scalar_lea.sflag [#allocation5], %s3355_s18 }
 0x5ce   : > { %p4590_p13 = pnand %p4603_p8, %p5575_p11 }
 0x5d0   : > { %4865 = dma.done.wait (!%p4590_p13), %s3356_s9, 1024  }
 0x5d1   : > { %4867 = vsyncadd (!%p4590_p13), %s3356_s9, 4294966272  ;;  %s5576_s27 = sld [smem:[#allocation18_spill]]  ;;  %s5577_s29 = sld [smem:[#allocation17_spill]] }
 0x5d2   : > { %s5578_s26 = sld [smem:[#allocation19_spill]]  ;;  %s5579_s24 = smov %s4874_s25 }
 0x5d7   : > { %p20_p1 = scmp.ge.s32.totalorder %s5576_s27, 4   ;;  %s5580_s25 = smov %s5577_s29 }
 0x5d9   :  { %22 = sbr.rel (!%p20_p1) target bundleno = 9 (0x9), region = 109 }
 0x5e0   :  { %3361 = vsyncpa [#allocation4], 1 }
 0x5e1   :  { %3363 = vsyncpa [#allocation4 + $0x1], 1 }
 0x5e2   :  { %3364 = vsyncpa [#allocation7], 1 }
 0x5e3   :  { %3365 = vsyncpa [#allocation10], 1 }
 0x5e4   :  { %3366 = vsyncpa [#allocation5], 1 }
 0x5e5   :  { %3368 = vsyncpa [#allocation5 + $0x1], 1 }

</bundles_post_ra>
